<compile_context>
chip_gen: v7x
topology: tpu7x:2x2x1
jax: 0.10.0
libtpu: 0.0.40
codegen_flags: <defaults>
</compile_context>

<pallas_src>
import jax
import jax.numpy as jnp
from jax import lax
from jax.experimental import pallas as pl
from jax.experimental.pallas import tpu as pltpu


def _resblock_kernel(x_ref, w1_ref, t1_ref, w2_ref, t2_ref, o_ref, pad_buf):
    # x_ref : (1, H, W, Cp) bf16 input tile for one batch element (no spatial pad)
    # w*_ref: (9*Cp, Cp) bf16 folded conv weights (im2col layout, BN scale folded in)
    # t*_ref: (1, Cp) f32 folded bias+BN shift
    # o_ref : (1, H, W, Cp) f32 output tile
    # pad_buf: (H+2, W+2, Cp) f32 VMEM scratch holding the halo'd activation
    H = o_ref.shape[1]
    W = o_ref.shape[2]
    Cp = o_ref.shape[3]

    # (Re)zero only the 1-pixel halo border; the interior is fully overwritten below.
    # Cheap (4 thin strips) and megacore-safe, unlike zeroing once at program_id==0.
    zrow = jnp.zeros((1, W + 2, Cp), dtype=pad_buf.dtype)
    zcol = jnp.zeros((H + 2, 1, Cp), dtype=pad_buf.dtype)
    pad_buf[0:1, :, :] = zrow
    pad_buf[H + 1:H + 2, :, :] = zrow
    pad_buf[:, 0:1, :] = zcol
    pad_buf[:, W + 1:W + 2, :] = zcol

    xf = x_ref[0].astype(jnp.float32)                       # (H, W, Cp)

    def conv3x3(w_ref):
        # im2col: single (H*W, 9*Cp) @ (9*Cp, Cp) bf16 matmul, f32 accumulation.
        xp = pad_buf[...]                                   # (H+2, W+2, Cp)
        taps = [xp[dh:dh + H, dw:dw + W, :]
                for dh in range(3) for dw in range(3)]
        patches = jnp.concatenate(taps, axis=-1).reshape(H * W, 9 * Cp)
        return jnp.dot(patches.astype(jnp.bfloat16), w_ref[...],
                       preferred_element_type=jnp.float32)  # (H*W, Cp) f32

    # ---- conv1 + folded bias/BN + ReLU
    pad_buf[1:H + 1, 1:W + 1, :] = xf
    y1 = jnp.maximum(conv3x3(w1_ref) + t1_ref[...], 0.0)

    # ---- conv2 + folded bias/BN + residual + ReLU
    pad_buf[1:H + 1, 1:W + 1, :] = y1.reshape(H, W, Cp)
    y2 = conv3x3(w2_ref) + t2_ref[...]
    out = jnp.maximum(y2 + xf.reshape(H * W, Cp), 0.0)
    o_ref[...] = out.reshape(1, H, W, Cp).astype(o_ref.dtype)


def residual_block_pallas_nhwc(x_nhwc, w1, b1, s1, t1, w2, b2, s2, t2):
    """NHWC entry point. x_nhwc: (N,H,W,C) f32. w*: (3,3,C,C) HWIO. b*/s*/t*: (1,C)."""
    N, H, W, C = x_nhwc.shape
    Cp = ((C + 127) // 128) * 128                           # lane-dense channel pad

    def fold(w, b, s, t):
        # (conv(x, w) + b) * s + t  ==  conv(x, w * s) + (b * s + t)
        wf = w * s.reshape(1, 1, 1, C)
        tf = (b.reshape(C) * s.reshape(C) + t.reshape(C)).reshape(1, C)
        wf = jnp.pad(wf, ((0, 0), (0, 0), (0, Cp - C), (0, Cp - C)))
        tf = jnp.pad(tf, ((0, 0), (0, Cp - C)))
        return wf.reshape(9 * Cp, Cp).astype(jnp.bfloat16), tf.astype(jnp.float32)

    w1m, t1v = fold(w1, b1, s1, t1)
    w2m, t2v = fold(w2, b2, s2, t2)
    xp = jnp.pad(x_nhwc, ((0, 0), (0, 0), (0, 0), (0, Cp - C))).astype(jnp.bfloat16)

    grid_spec = pltpu.PrefetchScalarGridSpec(
        num_scalar_prefetch=0,
        grid=(N,),
        in_specs=[
            pl.BlockSpec((1, H, W, Cp), lambda n: (n, 0, 0, 0)),
            pl.BlockSpec((9 * Cp, Cp), lambda n: (0, 0)),
            pl.BlockSpec((1, Cp), lambda n: (0, 0)),
            pl.BlockSpec((9 * Cp, Cp), lambda n: (0, 0)),
            pl.BlockSpec((1, Cp), lambda n: (0, 0)),
        ],
        out_specs=pl.BlockSpec((1, H, W, Cp), lambda n: (n, 0, 0, 0)),
        scratch_shapes=[pltpu.VMEM((H + 2, W + 2, Cp), jnp.float32)],
    )

    out = pl.pallas_call(
        _resblock_kernel,
        out_shape=jax.ShapeDtypeStruct((N, H, W, Cp), jnp.float32),
        grid_spec=grid_spec,
        compiler_params=pltpu.CompilerParams(
            dimension_semantics=("parallel",)),
    )(xp, w1m, t1v, w2m, t2v)
    return out[..., :C]


@jax.jit
def residual_block_pallas(x_nchw, w1, b1, s1, t1, w2, b2, s2, t2):
    """PyTorch-parity NCHW wrapper (use the NHWC entry point to avoid these transposes)."""
    x_nhwc = jnp.transpose(x_nchw, (0, 2, 3, 1))
    y = residual_block_pallas_nhwc(x_nhwc, w1, b1, s1, t1, w2, b2, s2, t2)
    return jnp.transpose(y, (0, 3, 1, 2))


def _reference_nchw(x, w1_hwio, b1, s1, t1, w2_hwio, b2, s2, t2):
    """Pure-JAX f32 reference in NCHW using lax.conv_general_dilated."""
    def conv(x, w_hwio, b):
        w_oihw = jnp.transpose(w_hwio, (3, 2, 0, 1))        # HWIO -> OIHW
        y = lax.conv_general_dilated(
            x, w_oihw, window_strides=(1, 1), padding=((1, 1), (1, 1)),
            dimension_numbers=("NCHW", "OIHW", "NCHW"))
        return y + b.reshape(1, -1, 1, 1)

    def bn(x, s, t):
        return x * s.reshape(1, -1, 1, 1) + t.reshape(1, -1, 1, 1)

    h = jnp.maximum(bn(conv(x, w1_hwio, b1.reshape(-1)), s1.reshape(-1), t1.reshape(-1)), 0.0)
    h = bn(conv(h, w2_hwio, b2.reshape(-1)), s2.reshape(-1), t2.reshape(-1))
    return jnp.maximum(h + x, 0.0)


if __name__ == "__main__":
    N, C, H, W = 2, 4, 16, 16  # num_filters = 4
    key = jax.random.PRNGKey(0)
    kx, k1w, k1b, k2w, k2b = jax.random.split(key, 5)

    x = jax.random.normal(kx, (N, C, H, W), dtype=jnp.float32)

    # Deterministic init mimicking PyTorch Conv2d default (U[-k, k], k = 1/sqrt(C*3*3)),
    # weights built directly in HWIO layout.
    fan_in = C * 3 * 3
    bound = 1.0 / (fan_in ** 0.5)
    w1 = jax.random.uniform(k1w, (3, 3, C, C), jnp.float32, -bound, bound)
    b1 = jax.random.uniform(k1b, (1, C), jnp.float32, -bound, bound)
    w2 = jax.random.uniform(k2w, (3, 3, C, C), jnp.float32, -bound, bound)
    b2 = jax.random.uniform(k2b, (1, C), jnp.float32, -bound, bound)

    # BatchNorm (inference): gamma=1, beta=0, running_mean=0, running_var=1, eps=1e-5
    eps = 1e-5
    gamma = jnp.ones((1, C), jnp.float32)
    beta = jnp.zeros((1, C), jnp.float32)
    rmean = jnp.zeros((1, C), jnp.float32)
    rvar = jnp.ones((1, C), jnp.float32)
    s1 = gamma / jnp.sqrt(rvar + eps)
    t1 = beta - rmean * s1
    s2 = gamma / jnp.sqrt(rvar + eps)
    t2 = beta - rmean * s2

    out = residual_block_pallas(x, w1, b1, s1, t1, w2, b2, s2, t2)
    out = jax.block_until_ready(out)

    ref = _reference_nchw(x, w1, b1, s1, t1, w2, b2, s2, t2)
    assert out.shape == (N, C, H, W)
    max_err = jnp.max(jnp.abs(out - ref))
    # bf16 MXU inputs -> mixed-precision tolerance vs the f32 reference.
    assert jnp.allclose(out, ref, atol=3e-2, rtol=2e-2), f"mismatch vs reference (max abs err {max_err})"

    print("KERNEL_OK")
</pallas_src>

<mosaic_0001>
module attributes {stable_mosaic.version = 11 : i64} {
  func.func @_resblock_kernel(%arg0: i32, %arg1: memref<1x16x16x128xbf16, #tpu.memory_space<vmem>>, %arg2: memref<1152x128xbf16, #tpu.memory_space<vmem>>, %arg3: memref<1x128xf32, #tpu.memory_space<vmem>>, %arg4: memref<1152x128xbf16, #tpu.memory_space<vmem>>, %arg5: memref<1x128xf32, #tpu.memory_space<vmem>>, %arg6: memref<1x16x16x128xf32, #tpu.memory_space<vmem>>, %arg7: memref<18x18x128xf32, #tpu.memory_space<vmem>>) attributes {dimension_semantics = [#tpu.dimension_semantics<parallel>], iteration_bounds = array<i64: 2>, scalar_prefetch = 0 : i64, scratch_operands = 1 : i64, tpu.core_type = #tpu.core_type<tc>, window_params = [{transform_indices = @transform_0, window_bounds = array<i64: 1, 16, 16, 128>}, {pipeline_mode = #tpu.pipeline_mode<synchronous>, transform_indices = @transform_1, window_bounds = array<i64: 1152, 128>}, {pipeline_mode = #tpu.pipeline_mode<synchronous>, transform_indices = @transform_2, window_bounds = array<i64: 1, 128>}, {pipeline_mode = #tpu.pipeline_mode<synchronous>, transform_indices = @transform_3, window_bounds = array<i64: 1152, 128>}, {pipeline_mode = #tpu.pipeline_mode<synchronous>, transform_indices = @transform_4, window_bounds = array<i64: 1, 128>}, {transform_indices = @transform_5, window_bounds = array<i64: 1, 16, 16, 128>}]} {
    %cst = arith.constant 0.000000e+00 : f32
    %0 = vector.broadcast %cst : f32 to vector<1x18x128xf32>
    %cst_0 = arith.constant 0.000000e+00 : f32
    %1 = vector.broadcast %cst_0 : f32 to vector<18x1x128xf32>
    %c0 = arith.constant 0 : index
    %c0_1 = arith.constant 0 : index
    %c0_2 = arith.constant 0 : index
    %2 = vector.load %arg7[%c0, %c0_1, %c0_2] : memref<18x18x128xf32, #tpu.memory_space<vmem>>, vector<1x18x128xf32>
    tpu.vector_store %arg7[%c0, %c0_1, %c0_2], %0 {strides = array<i32>} : memref<18x18x128xf32, #tpu.memory_space<vmem>>, vector<1x18x128xf32>,
    %c17 = arith.constant 17 : index
    %c0_3 = arith.constant 0 : index
    %c0_4 = arith.constant 0 : index
    %3 = vector.load %arg7[%c17, %c0_3, %c0_4] : memref<18x18x128xf32, #tpu.memory_space<vmem>>, vector<1x18x128xf32>
    tpu.vector_store %arg7[%c17, %c0_3, %c0_4], %0 {strides = array<i32>} : memref<18x18x128xf32, #tpu.memory_space<vmem>>, vector<1x18x128xf32>,
    %c0_5 = arith.constant 0 : index
    %c0_6 = arith.constant 0 : index
    %c0_7 = arith.constant 0 : index
    %4 = vector.load %arg7[%c0_5, %c0_6, %c0_7] : memref<18x18x128xf32, #tpu.memory_space<vmem>>, vector<18x1x128xf32>
    tpu.vector_store %arg7[%c0_5, %c0_6, %c0_7], %1 {strides = array<i32>} : memref<18x18x128xf32, #tpu.memory_space<vmem>>, vector<18x1x128xf32>,
    %c0_8 = arith.constant 0 : index
    %c17_9 = arith.constant 17 : index
    %c0_10 = arith.constant 0 : index
    %5 = vector.load %arg7[%c0_8, %c17_9, %c0_10] : memref<18x18x128xf32, #tpu.memory_space<vmem>>, vector<18x1x128xf32>
    tpu.vector_store %arg7[%c0_8, %c17_9, %c0_10], %1 {strides = array<i32>} : memref<18x18x128xf32, #tpu.memory_space<vmem>>, vector<18x1x128xf32>,
    %c0_11 = arith.constant 0 : index
    %c0_12 = arith.constant 0 : index
    %c0_13 = arith.constant 0 : index
    %c0_14 = arith.constant 0 : index
    %6 = vector.load %arg1[%c0_11, %c0_12, %c0_13, %c0_14] : memref<1x16x16x128xbf16, #tpu.memory_space<vmem>>, vector<1x16x16x128xbf16>
    %7 = vector.shape_cast %6 : vector<1x16x16x128xbf16> to vector<16x16x128xbf16>
    %8 = arith.extf %7 : vector<16x16x128xbf16> to vector<16x16x128xf32>
    %c1 = arith.constant 1 : index
    %c1_15 = arith.constant 1 : index
    %c0_16 = arith.constant 0 : index
    %9 = vector.load %arg7[%c1, %c1_15, %c0_16] : memref<18x18x128xf32, #tpu.memory_space<vmem>>, vector<16x16x128xf32>
    tpu.vector_store %arg7[%c1, %c1_15, %c0_16], %8 {strides = array<i32>} : memref<18x18x128xf32, #tpu.memory_space<vmem>>, vector<16x16x128xf32>,
    %c0_17 = arith.constant 0 : index
    %c0_18 = arith.constant 0 : index
    %c0_19 = arith.constant 0 : index
    %10 = vector.load %arg7[%c0_17, %c0_18, %c0_19] : memref<18x18x128xf32, #tpu.memory_space<vmem>>, vector<18x18x128xf32>
    %11 = vector.extract_strided_slice %10 {offsets = [0, 0, 0], sizes = [16, 16, 128], strides = [1, 1, 1]} : vector<18x18x128xf32> to vector<16x16x128xf32>
    %12 = vector.extract_strided_slice %10 {offsets = [0, 1, 0], sizes = [16, 16, 128], strides = [1, 1, 1]} : vector<18x18x128xf32> to vector<16x16x128xf32>
    %13 = vector.extract_strided_slice %10 {offsets = [0, 2, 0], sizes = [16, 16, 128], strides = [1, 1, 1]} : vector<18x18x128xf32> to vector<16x16x128xf32>
    %14 = vector.extract_strided_slice %10 {offsets = [1, 0, 0], sizes = [16, 16, 128], strides = [1, 1, 1]} : vector<18x18x128xf32> to vector<16x16x128xf32>
    %15 = vector.extract_strided_slice %10 {offsets = [1, 1, 0], sizes = [16, 16, 128], strides = [1, 1, 1]} : vector<18x18x128xf32> to vector<16x16x128xf32>
    %16 = vector.extract_strided_slice %10 {offsets = [1, 2, 0], sizes = [16, 16, 128], strides = [1, 1, 1]} : vector<18x18x128xf32> to vector<16x16x128xf32>
    %17 = vector.extract_strided_slice %10 {offsets = [2, 0, 0], sizes = [16, 16, 128], strides = [1, 1, 1]} : vector<18x18x128xf32> to vector<16x16x128xf32>
    %18 = vector.extract_strided_slice %10 {offsets = [2, 1, 0], sizes = [16, 16, 128], strides = [1, 1, 1]} : vector<18x18x128xf32> to vector<16x16x128xf32>
    %19 = vector.extract_strided_slice %10 {offsets = [2, 2, 0], sizes = [16, 16, 128], strides = [1, 1, 1]} : vector<18x18x128xf32> to vector<16x16x128xf32>
    %20 = tpu.concatenate %11, %12, %13, %14, %15, %16, %17, %18, %19 in 2 : vector<16x16x128xf32>, vector<16x16x128xf32>, vector<16x16x128xf32>, vector<16x16x128xf32>, vector<16x16x128xf32>, vector<16x16x128xf32>, vector<16x16x128xf32>, vector<16x16x128xf32>, vector<16x16x128xf32> -> vector<16x16x1152xf32>
    %21 = vector.shape_cast %20 : vector<16x16x1152xf32> to vector<256x1152xf32>
    %22 = arith.truncf %21 : vector<256x1152xf32> to vector<256x1152xbf16>
    %c0_20 = arith.constant 0 : index
    %c0_21 = arith.constant 0 : index
    %23 = vector.load %arg2[%c0_20, %c0_21] : memref<1152x128xbf16, #tpu.memory_space<vmem>>, vector<1152x128xbf16>
    %cst_22 = arith.constant dense<0.000000e+00> : vector<256x128xf32>
    %24 = tpu.matmul %22, %23, %cst_22 {dimension_numbers = #tpu.dot_dimension_numbers<[1], [0], [0], [1], [0, 0, 1, 1], [], []>} : vector<256x1152xbf16>, vector<1152x128xbf16>, vector<256x128xf32> -> vector<256x128xf32>
    %c0_23 = arith.constant 0 : index
    %c0_24 = arith.constant 0 : index
    %25 = vector.load %arg3[%c0_23, %c0_24] : memref<1x128xf32, #tpu.memory_space<vmem>>, vector<1x128xf32>
    %26 = vector.broadcast %25 : vector<1x128xf32> to vector<256x128xf32>
    %27 = arith.addf %24, %26 : vector<256x128xf32>
    %cst_25 = arith.constant 0.000000e+00 : f32
    %28 = vector.broadcast %cst_25 : f32 to vector<256x128xf32>
    %29 = arith.maximumf %27, %28 : vector<256x128xf32>
    %30 = vector.shape_cast %29 : vector<256x128xf32> to vector<16x16x128xf32>
    %c1_26 = arith.constant 1 : index
    %c1_27 = arith.constant 1 : index
    %c0_28 = arith.constant 0 : index
    %31 = vector.load %arg7[%c1_26, %c1_27, %c0_28] : memref<18x18x128xf32, #tpu.memory_space<vmem>>, vector<16x16x128xf32>
    tpu.vector_store %arg7[%c1_26, %c1_27, %c0_28], %30 {strides = array<i32>} : memref<18x18x128xf32, #tpu.memory_space<vmem>>, vector<16x16x128xf32>,
    %c0_29 = arith.constant 0 : index
    %c0_30 = arith.constant 0 : index
    %c0_31 = arith.constant 0 : index
    %32 = vector.load %arg7[%c0_29, %c0_30, %c0_31] : memref<18x18x128xf32, #tpu.memory_space<vmem>>, vector<18x18x128xf32>
    %33 = vector.extract_strided_slice %32 {offsets = [0, 0, 0], sizes = [16, 16, 128], strides = [1, 1, 1]} : vector<18x18x128xf32> to vector<16x16x128xf32>
    %34 = vector.extract_strided_slice %32 {offsets = [0, 1, 0], sizes = [16, 16, 128], strides = [1, 1, 1]} : vector<18x18x128xf32> to vector<16x16x128xf32>
    %35 = vector.extract_strided_slice %32 {offsets = [0, 2, 0], sizes = [16, 16, 128], strides = [1, 1, 1]} : vector<18x18x128xf32> to vector<16x16x128xf32>
    %36 = vector.extract_strided_slice %32 {offsets = [1, 0, 0], sizes = [16, 16, 128], strides = [1, 1, 1]} : vector<18x18x128xf32> to vector<16x16x128xf32>
    %37 = vector.extract_strided_slice %32 {offsets = [1, 1, 0], sizes = [16, 16, 128], strides = [1, 1, 1]} : vector<18x18x128xf32> to vector<16x16x128xf32>
    %38 = vector.extract_strided_slice %32 {offsets = [1, 2, 0], sizes = [16, 16, 128], strides = [1, 1, 1]} : vector<18x18x128xf32> to vector<16x16x128xf32>
    %39 = vector.extract_strided_slice %32 {offsets = [2, 0, 0], sizes = [16, 16, 128], strides = [1, 1, 1]} : vector<18x18x128xf32> to vector<16x16x128xf32>
    %40 = vector.extract_strided_slice %32 {offsets = [2, 1, 0], sizes = [16, 16, 128], strides = [1, 1, 1]} : vector<18x18x128xf32> to vector<16x16x128xf32>
    %41 = vector.extract_strided_slice %32 {offsets = [2, 2, 0], sizes = [16, 16, 128], strides = [1, 1, 1]} : vector<18x18x128xf32> to vector<16x16x128xf32>
    %42 = tpu.concatenate %33, %34, %35, %36, %37, %38, %39, %40, %41 in 2 : vector<16x16x128xf32>, vector<16x16x128xf32>, vector<16x16x128xf32>, vector<16x16x128xf32>, vector<16x16x128xf32>, vector<16x16x128xf32>, vector<16x16x128xf32>, vector<16x16x128xf32>, vector<16x16x128xf32> -> vector<16x16x1152xf32>
    %43 = vector.shape_cast %42 : vector<16x16x1152xf32> to vector<256x1152xf32>
    %44 = arith.truncf %43 : vector<256x1152xf32> to vector<256x1152xbf16>
    %c0_32 = arith.constant 0 : index
    %c0_33 = arith.constant 0 : index
    %45 = vector.load %arg4[%c0_32, %c0_33] : memref<1152x128xbf16, #tpu.memory_space<vmem>>, vector<1152x128xbf16>
    %cst_34 = arith.constant dense<0.000000e+00> : vector<256x128xf32>
    %46 = tpu.matmul %44, %45, %cst_34 {dimension_numbers = #tpu.dot_dimension_numbers<[1], [0], [0], [1], [0, 0, 1, 1], [], []>} : vector<256x1152xbf16>, vector<1152x128xbf16>, vector<256x128xf32> -> vector<256x128xf32>
    %c0_35 = arith.constant 0 : index
    %c0_36 = arith.constant 0 : index
    %47 = vector.load %arg5[%c0_35, %c0_36] : memref<1x128xf32, #tpu.memory_space<vmem>>, vector<1x128xf32>
    %48 = vector.broadcast %47 : vector<1x128xf32> to vector<256x128xf32>
    %49 = arith.addf %46, %48 : vector<256x128xf32>
    %50 = vector.shape_cast %8 : vector<16x16x128xf32> to vector<256x128xf32>
    %51 = arith.addf %49, %50 : vector<256x128xf32>
    %cst_37 = arith.constant 0.000000e+00 : f32
    %52 = vector.broadcast %cst_37 : f32 to vector<256x128xf32>
    %53 = arith.maximumf %51, %52 : vector<256x128xf32>
    %54 = vector.shape_cast %53 : vector<256x128xf32> to vector<1x16x16x128xf32>
    %c0_38 = arith.constant 0 : index
    %c0_39 = arith.constant 0 : index
    %c0_40 = arith.constant 0 : index
    %c0_41 = arith.constant 0 : index
    %55 = vector.load %arg6[%c0_38, %c0_39, %c0_40, %c0_41] : memref<1x16x16x128xf32, #tpu.memory_space<vmem>>, vector<1x16x16x128xf32>
    tpu.vector_store %arg6[%c0_38, %c0_39, %c0_40, %c0_41], %54 {strides = array<i32>} : memref<1x16x16x128xf32, #tpu.memory_space<vmem>>, vector<1x16x16x128xf32>,
    return
  }
  func.func @transform_0(%arg0: i32) -> (i32, i32, i32, i32) {
    %c0_i32 = arith.constant 0 : i32
    %c0_i32_0 = arith.constant 0 : i32
    %c0_i32_1 = arith.constant 0 : i32
    %c0_i32_2 = arith.constant 0 : i32
    return %arg0, %c0_i32, %c0_i32_0, %c0_i32_1 : i32, i32, i32, i32
  }
  func.func @transform_1(%arg0: i32) -> (i32, i32) {
    %c0_i32 = arith.constant 0 : i32
    %c0_i32_0 = arith.constant 0 : i32
    %c0_i32_1 = arith.constant 0 : i32
    return %c0_i32, %c0_i32_0 : i32, i32
  }
  func.func @transform_2(%arg0: i32) -> (i32, i32) {
    %c0_i32 = arith.constant 0 : i32
    %c0_i32_0 = arith.constant 0 : i32
    %c0_i32_1 = arith.constant 0 : i32
    return %c0_i32, %c0_i32_0 : i32, i32
  }
  func.func @transform_3(%arg0: i32) -> (i32, i32) {
    %c0_i32 = arith.constant 0 : i32
    %c0_i32_0 = arith.constant 0 : i32
    %c0_i32_1 = arith.constant 0 : i32
    return %c0_i32, %c0_i32_0 : i32, i32
  }
  func.func @transform_4(%arg0: i32) -> (i32, i32) {
    %c0_i32 = arith.constant 0 : i32
    %c0_i32_0 = arith.constant 0 : i32
    %c0_i32_1 = arith.constant 0 : i32
    return %c0_i32, %c0_i32_0 : i32, i32
  }
  func.func @transform_5(%arg0: i32) -> (i32, i32, i32, i32) {
    %c0_i32 = arith.constant 0 : i32
    %c0_i32_0 = arith.constant 0 : i32
    %c0_i32_1 = arith.constant 0 : i32
    %c0_i32_2 = arith.constant 0 : i32
    return %arg0, %c0_i32, %c0_i32_0, %c0_i32_1 : i32, i32, i32, i32
  }
}

</mosaic_0001>

<bundles_post_ra>
// kernel: residual_block_pallas.1
= control target key start
LH: loop header
LB: loop body
LE: loop exit
PB: predicated region body
PF: predicated region fallthrough
CT: control target
= control target key end

     0   :  { %s5659_s18 = smov 0   ;;  %s7886_s0 = inlined_call_operand.vmem [shape: bf16[2,16,16,128], index: 0, kind: input, shape index: {}]   ;;  %s7887_s1 = inlined_call_operand.vmem [shape: bf16[1152,128], index: 1, kind: input, shape index: {}]   ;;  %s7888_s2 = inlined_call_operand.vmem [shape: f32[1,128], index: 2, kind: input, shape index: {}]   ;;  %s7889_s3 = inlined_call_operand.vmem [shape: bf16[1152,128], index: 3, kind: input, shape index: {}]   ;;  %s7890_s4 = inlined_call_operand.vmem [shape: f32[1,128], index: 4, kind: input, shape index: {}]   ;;  %s7891_s5 = inlined_call_operand.vmem [shape: f32[2,16,16,128], index: 5, kind: output, shape index: {}]  }
   0x1 LB: > { %s4187_s19 = sadd.s32 4294967295, %s5626_s18   ;;  %p4191_p0 = scmp.ge.s32.totalorder %s5626_s18, 1  ;;  %s5626_s18 = sphi %s5659_s18, %s15_s18  }
   0x2   : > { %p187_p1 = scmp.lt.s32.totalorder %s5626_s18, 3 }
   0x4   : > { %p188_p2 = pnand %p4191_p0, %p187_p1 }
   0x6   : > { %191 = sbr.rel (%p188_p2) target bundleno = 1062 (0x426), region = 40 }
   0xd   : > { %v5474_v0 = vld [vmem:[%s7887_s1 + $0x40] sm:$0xff]   ;;  %v5628_v2 = vmov 0.0   ;;  %v5478_v5 = vld [vmem:[%s7887_s1 + $0x48] sm:$0xff]   ;;  %v5482_v9 = vld [vmem:[%s7887_s1 + $0x50] sm:$0xff]   ;;  %p215_p3 = scmp.lt.s32.totalorder %s4187_s19, 1  ;;  %vm468_vm0 = vcmask 1046528  }
   0xe   : > { %v5475_v1 = vld [vmem:[%s7887_s1] sm:$0xff]   ;;  %226 = vst [vmem:[#allocation2] sm:$0xff] %v5628_v2  ;;  %227 = vst [vmem:[#allocation2 + $0x8] sm:$0xff] %v5628_v2  ;;  %4425 = vmatprep.subr.bf16.mxu0 %v5474_v0  ;;  %v5479_v6 = vld [vmem:[%s7887_s1 + $0x8] sm:$0xff]   ;;  %v470_v32 = vrot.slane %v5628_v2, 1  ;;  %v583_v48 = vrot.slane %v5628_v2, 2 }
   0xf   : > { %228 = vst [vmem:[#allocation2 + $0x10] sm:$0x3] %v5628_v2  ;;  %230 = vst [vmem:[#allocation2 + $0x198] sm:$0xff] %v5628_v2  ;;  %v5476_v3 = vld [vmem:[%s7887_s1 + $0xc0] sm:$0xff]   ;;  %4426 = vmatpush3.bf16.msra.mxu0 %v5475_v1  ;;  %v5480_v7 = vld [vmem:[%s7887_s1 + $0xc8] sm:$0xff]   ;;  %s8065_s19 = smov (!%p215_p3, %s4187_s19), 1 }
  0x10   : > { %232 = vst [vmem:[#allocation2 + $0x1a8] sm:$0x3] %v5628_v2  ;;  %234 = vst [vmem:[#allocation2 + $0x18] sm:$0x1] %v5628_v2  ;;  %v5477_v4 = vld [vmem:[%s7887_s1 + $0x80] sm:$0xff]   ;;  %4537 = vmatprep.subr.bf16.mxu1 %v5476_v3  ;;  %4427 = vmatprep.subr.bf16.mxu0 %v5478_v5  ;;  %v5481_v8 = vld [vmem:[%s7887_s1 + $0x88] sm:$0xff]  }
  0x11   : > { %235 = vst [vmem:[#allocation2 + $0x30] sm:$0x1] %v5628_v2  ;;  %236 = vst [vmem:[#allocation2 + $0x48] sm:$0x1] %v5628_v2  ;;  %4538 = vmatpush3.bf16.msra.mxu1 %v5477_v4  ;;  %v5483_v10 = vld [vmem:[%s7887_s1 + $0x10] sm:$0xff]   ;;  %v5486_v13 = vld [vmem:[%s7887_s1 + $0x58] sm:$0xff]  }
  0x12   : > { %237 = vst [vmem:[#allocation2 + $0x60] sm:$0x1] %v5628_v2  ;;  %238 = vst [vmem:[#allocation2 + $0x78] sm:$0x1] %v5628_v2  ;;  %4539 = vmatprep.subr.bf16.mxu1 %v5480_v7  ;;  %v5484_v11 = vld [vmem:[%s7887_s1 + $0xd0] sm:$0xff]   ;;  %v5487_v14 = vld [vmem:[%s7887_s1 + $0x18] sm:$0xff]  }
  0x13   : > { %239 = vst [vmem:[#allocation2 + $0x90] sm:$0x1] %v5628_v2  ;;  %240 = vst [vmem:[#allocation2 + $0xa8] sm:$0x1] %v5628_v2  ;;  %4428 = vmatpush3.bf16.msra.mxu0 %v5479_v6  ;;  %v5485_v12 = vld [vmem:[%s7887_s1 + $0x90] sm:$0xff]   ;;  %v5488_v15 = vld [vmem:[%s7887_s1 + $0xd8] sm:$0xff]  }
  0x14   : > { %241 = vst [vmem:[#allocation2 + $0xc0] sm:$0x1] %v5628_v2  ;;  %242 = vst [vmem:[#allocation2 + $0xd8] sm:$0x1] %v5628_v2  ;;  %4429 = vmatprep.subr.bf16.mxu0 %v5482_v9  ;;  %v5489_v16 = vld [vmem:[%s7887_s1 + $0x98] sm:$0xff]   ;;  %v5490_v17 = vld [vmem:[%s7887_s1 + $0x60] sm:$0xff]  }
  0x15   : > { %243 = vst [vmem:[#allocation2 + $0xf0] sm:$0x1] %v5628_v2  ;;  %244 = vst [vmem:[#allocation2 + $0x108] sm:$0x1] %v5628_v2  ;;  %4540 = vmatpush3.bf16.msra.mxu1 %v5481_v8  ;;  %v5491_v18 = vld [vmem:[%s7887_s1 + $0x20] sm:$0xff]   ;;  %v5494_v21 = vld [vmem:[%s7887_s1 + $0x68] sm:$0xff]  }
  0x16   : > { %245 = vst [vmem:[#allocation2 + $0x120] sm:$0x1] %v5628_v2  ;;  %246 = vst [vmem:[#allocation2 + $0x138] sm:$0x1] %v5628_v2  ;;  %4541 = vmatprep.subr.bf16.mxu1 %v5484_v11  ;;  %v5492_v19 = vld [vmem:[%s7887_s1 + $0xe0] sm:$0xff]   ;;  %v5495_v22 = vld [vmem:[%s7887_s1 + $0x28] sm:$0xff]  }
  0x17   : > { %247 = vst [vmem:[#allocation2 + $0x150] sm:$0x1] %v5628_v2  ;;  %248 = vst [vmem:[#allocation2 + $0x168] sm:$0x1] %v5628_v2  ;;  %4430 = vmatpush3.bf16.msra.mxu0 %v5483_v10  ;;  %v5493_v20 = vld [vmem:[%s7887_s1 + $0xa0] sm:$0xff]   ;;  %v5496_v23 = vld [vmem:[%s7887_s1 + $0xe8] sm:$0xff]  }
  0x18   : > { %249 = vst [vmem:[#allocation2 + $0x180] sm:$0x1] %v5628_v2  ;;  %252 = vst [vmem:[#allocation2 + $0x29] sm:$0x1] %v5628_v2  ;;  %4431 = vmatprep.subr.bf16.mxu0 %v5486_v13  ;;  %v5497_v24 = vld [vmem:[%s7887_s1 + $0xa8] sm:$0xff]   ;;  %v5498_v25 = vld [vmem:[%s7887_s1 + $0x70] sm:$0xff]  }
  0x19   : > { %253 = vst [vmem:[#allocation2 + $0x41] sm:$0x1] %v5628_v2  ;;  %254 = vst [vmem:[#allocation2 + $0x59] sm:$0x1] %v5628_v2  ;;  %4542 = vmatpush3.bf16.msra.mxu1 %v5485_v12  ;;  %v5499_v26 = vld [vmem:[%s7887_s1 + $0x30] sm:$0xff]   ;;  %v5502_v29 = vld [vmem:[%s7887_s1 + $0x78] sm:$0xff]  }
  0x1a   : > { %255 = vst [vmem:[#allocation2 + $0x71] sm:$0x1] %v5628_v2  ;;  %256 = vst [vmem:[#allocation2 + $0x89] sm:$0x1] %v5628_v2  ;;  %4543 = vmatprep.subr.bf16.mxu1 %v5488_v15  ;;  %v5500_v27 = vld [vmem:[%s7887_s1 + $0xf0] sm:$0xff]   ;;  %s4344_s7 = sshll.u32 %s8065_s19, 7 }
  0x1b   : > { %257 = vst [vmem:[#allocation2 + $0xa1] sm:$0x1] %v5628_v2  ;;  %258 = vst [vmem:[#allocation2 + $0xb9] sm:$0x1] %v5628_v2  ;;  %4432 = vmatpush3.bf16.msra.mxu0 %v5487_v14  ;;  %v5501_v28 = vld [vmem:[%s7887_s1 + $0xb0] sm:$0xff]   ;;  %v5503_v30 = vld [vmem:[%s7887_s1 + $0x38] sm:$0xff]   ;;  %s5812_s14 = scalar_lea.vmem %s7886_s0, %s4344_s7 }
  0x1c   : > { %259 = vst [vmem:[#allocation2 + $0xd1] sm:$0x1] %v5628_v2  ;;  %260 = vst [vmem:[#allocation2 + $0xe9] sm:$0x1] %v5628_v2  ;;  %4433 = vmatprep.subr.bf16.mxu0 %v5490_v17  ;;  %v5504_v31 = vld [vmem:[%s7887_s1 + $0xf8] sm:$0xff]   ;;  %v5506_v38 = vld [vmem:[%s7887_s1 + $0x140] sm:$0xff]  }
  0x1d   : > { %261 = vst [vmem:[#allocation2 + $0x101] sm:$0x1] %v5628_v2  ;;  %262 = vst [vmem:[#allocation2 + $0x119] sm:$0x1] %v5628_v2  ;;  %4544 = vmatpush3.bf16.msra.mxu1 %v5489_v16  ;;  %v5505_v37 = vld [vmem:[%s7887_s1 + $0xb8] sm:$0xff]   ;;  %v5824_v42 = vld [vmem:[%s5812_s14] sm:$0xff]  }
  0x1e   : > { %263 = vst [vmem:[#allocation2 + $0x131] sm:$0x1] %v5628_v2  ;;  %264 = vst [vmem:[#allocation2 + $0x149] sm:$0x1] %v5628_v2  ;;  %4545 = vmatprep.subr.bf16.mxu1 %v5492_v19  ;;  %v7922_v44 = vunpack.c.l.bf16 %v5824_v42  ;;  %v7920_v45 = vunpack.c.h.bf16 %v5824_v42  ;;  %v5507_v46 = vld [vmem:[%s7887_s1 + $0x100] sm:$0xff]   ;;  %v5832_v47 = vld [vmem:[%s5812_s14 + $0x8] sm:$0xff]  }
  0x1f   : > { %265 = vst [vmem:[#allocation2 + $0x161] sm:$0x1] %v5628_v2  ;;  %266 = vst [vmem:[#allocation2 + $0x179] sm:$0x1] %v5628_v2  ;;  %4434 = vmatpush3.bf16.msra.mxu0 %v5491_v18  ;;  %v7923_v49 = vunpack.c.l.bf16 %v5832_v47  ;;  %v7921_v50 = vunpack.c.h.bf16 %v5832_v47  ;;  %v5508_v51 = vld [vmem:[%s7887_s1 + $0x148] sm:$0xff]   ;;  %v5841_v52 = vld [vmem:[%s5812_s14 + $0x10] sm:$0xff]  }
  0x20   : > { %267 = vst [vmem:[#allocation2 + $0x191] sm:$0x1] %v5628_v2  ;;  %233 = vst [vmem:[#allocation2] sm:$0x1] %v5628_v2  ;;  %4435 = vmatprep.subr.bf16.mxu0 %v5494_v21  ;;  %v7918_v55 = vunpack.c.l.bf16 %v5841_v52  ;;  %v7916_v56 = vunpack.c.h.bf16 %v5841_v52  ;;  %vm581_vm1 = vcmask 1045504   ;;  %v5854_v57 = vld [vmem:[%s5812_s14 + $0x18] sm:$0xff]  }
  0x21   : > { %251 = vst [vmem:[#allocation2 + $0x11] sm:$0x1] %v5628_v2  ;;  %250 = vst [vmem:[#allocation2 + $0x198] sm:$0x1] %v5628_v2  ;;  %4546 = vmatpush3.bf16.msra.mxu1 %v5493_v20  ;;  %v5509_v58 = vld [vmem:[%s7887_s1 + $0x108] sm:$0xff]   ;;  %v7919_v59 = vunpack.c.l.bf16 %v5854_v57  ;;  %v7917_v60 = vunpack.c.h.bf16 %v5854_v57  ;;  %v5866_v61 = vld [vmem:[%s5812_s14 + $0x20] sm:$0xff]  }
  0x22   : > { %268 = vst [vmem:[#allocation2 + $0x1a9] sm:$0x1] %v5628_v2  ;;  %4547 = vmatprep.subr.bf16.mxu1 %v5496_v23  ;;  %7958 = vst [vmem:[#allocation3_spill] sm:$0xff] %v5824_v42  ;;  %v5510_v62 = vld [vmem:[%s7887_s1 + $0x150] sm:$0xff]   ;;  %v7914_v63 = vunpack.c.l.bf16 %v5866_v61  ;;  %v7910_v0 = vunpack.c.h.bf16 %v5866_v61  ;;  %v5874_v1 = vld [vmem:[%s5812_s14 + $0x28] sm:$0xff]   ;;  %s4345_s17 = sshll.u32 %s8065_s19, 8 }
  0x23   : > { %4436 = vmatpush3.bf16.msra.mxu0 %v5495_v22  ;;  %7959 = vst [vmem:[#allocation4_spill] sm:$0xff] %v5832_v47  ;;  %7960 = vst [vmem:[#allocation5_spill] sm:$0xff] %v5841_v52  ;;  %v5511_v4 = vld [vmem:[%s7887_s1 + $0x110] sm:$0xff]   ;;  %v7915_v5 = vunpack.c.l.bf16 %v5874_v1  ;;  %v7911_v6 = vunpack.c.h.bf16 %v5874_v1  ;;  %v5512_v8 = vld [vmem:[%s7887_s1 + $0x158] sm:$0xff]   ;;  %s7758_s19 = scalar_lea.vmem %s7891_s5, %s4345_s17 }
  0x24   : > { %4437 = vmatprep.subr.bf16.mxu0 %v5498_v25  ;;  %334 = vst [vmem:[#allocation2 + $0x19] sm:$0xff] %v7922_v44  ;;  %335 = vst [vmem:[#allocation2 + $0x21] sm:$0xff] %v7920_v45  ;;  %v5892_v7 = vld [vmem:[%s5812_s14 + $0x30] sm:$0xff]   ;;  %v5904_v11 = vld [vmem:[%s5812_s14 + $0x38] sm:$0xff]  }
  0x25   : > { %4548 = vmatpush3.bf16.msra.mxu1 %v5497_v24  ;;  %336 = vst [vmem:[#allocation2 + $0x31] sm:$0xff] %v7923_v49  ;;  %337 = vst [vmem:[#allocation2 + $0x39] sm:$0xff] %v7921_v50  ;;  %v7896_v9 = vunpack.c.l.bf16 %v5892_v7  ;;  %v7894_v10 = vunpack.c.h.bf16 %v5892_v7  ;;  %v7909_v16 = vunpack.c.l.bf16 %v5904_v11  ;;  %v7895_v17 = vunpack.c.h.bf16 %v5904_v11  ;;  %v5535_v49 = vld [vmem:[%s7887_s1 + $0x1b0] sm:$0xff]   ;;  %v5537_v50 = vld [vmem:[%s7887_s1 + $0x1b8] sm:$0xff]  }
  0x26   : > { %4549 = vmatprep.subr.bf16.mxu1 %v5500_v27  ;;  %7961 = vst [vmem:[#allocation6_spill] sm:$0xff] %v5854_v57  ;;  %338 = vst [vmem:[#allocation2 + $0x49] sm:$0xff] %v7918_v55 }
  0x27   : > { %4438 = vmatpush3.bf16.msra.mxu0 %v5499_v26  ;;  %v366_v33 = vld [vmem:[#allocation2] sm:$0xff]  ;;  %339 = vst [vmem:[#allocation2 + $0x51] sm:$0xff] %v7916_v56  ;;  %7962 = vst [vmem:[#allocation7_spill] sm:$0xff] %v5866_v61 }
  0x28   : > { %4439 = vmatprep.subr.bf16.mxu0 %v5502_v29  ;;  %v368_v34 = vld [vmem:[#allocation2 + $0x10] sm:$0x3]  ;;  %v469_v35 = vrot.slane %v366_v33, 1  ;;  %v728_v41 = vpack.c.bf16 %v5628_v2, %v366_v33  ;;  %v582_v54 = vrot.slane %v366_v33, 2  ;;  %7963 = vst [vmem:[#allocation8_spill] sm:$0xff] %v5874_v1  ;;  %340 = vst [vmem:[#allocation2 + $0x61] sm:$0xff] %v7919_v59 }
  0x29   : > { %4550 = vmatpush3.bf16.msra.mxu1 %v5501_v28  ;;  %v472_v36 = vrot.slane %v368_v34, 1  ;;  %v585_v53 = vrot.slane %v368_v34, 2  ;;  %341 = vst [vmem:[#allocation2 + $0x69] sm:$0xff] %v7917_v60  ;;  %342 = vst [vmem:[#allocation2 + $0x79] sm:$0xff] %v7914_v63 }
  0x2a   : > { %4551 = vmatprep.subr.bf16.mxu1 %v5504_v31  ;;  %v471_v39 = vsel %vm468_vm0, %v469_v35, %v470_v32  ;;  %v584_v2 = vsel %vm581_vm1, %v582_v54, %v583_v48  ;;  %343 = vst [vmem:[#allocation2 + $0x81] sm:$0xff] %v7910_v0  ;;  %7964 = vst [vmem:[#allocation9_spill] sm:$0xff] %v5892_v7 }
  0x2b   : > { %4440 = vmatpush3.bf16.msra.mxu0 %v5503_v30  ;;  %v473_v40 = vsel %vm468_vm0, %v470_v32, %v472_v36  ;;  %v586_v3 = vsel %vm581_vm1, %v583_v48, %v585_v53  ;;  %344 = vst [vmem:[#allocation2 + $0x91] sm:$0xff] %v7915_v5  ;;  %345 = vst [vmem:[#allocation2 + $0x99] sm:$0xff] %v7911_v6  ;;  %v369_v12 = vld [vmem:[#allocation2 + $0x18] sm:$0xff]  ;;  %v370_v13 = vld [vmem:[#allocation2 + $0x20] sm:$0xff] }
  0x2c   : > { %v729_v43 = vpack.c.bf16 %v473_v40, %v471_v39  ;;  %4649 = vmatprep.subr.bf16.mxu0 %v5506_v38  ;;  %7965 = vst [vmem:[#allocation10_spill] sm:$0xff] %v5904_v11  ;;  %v730_v14 = vpack.c.bf16 %v586_v3, %v584_v2  ;;  %v371_v15 = vld [vmem:[#allocation2 + $0x28] sm:$0x3]  ;;  %v731_v18 = vpack.c.bf16 %v370_v13, %v369_v12  ;;  %v474_v19 = vrot.slane %v369_v12, 1  ;;  %v372_v22 = vld [vmem:[#allocation2 + $0x30] sm:$0xff]  ;;  %v373_v23 = vld [vmem:[#allocation2 + $0x38] sm:$0xff] }
  0x2d   : > { %4552 = vmatpush3.bf16.msra.mxu1 %v5505_v37  ;;  %v475_v20 = vrot.slane %v370_v13, 1  ;;  %v477_v21 = vrot.slane %v371_v15, 1  ;;  %346 = vst [vmem:[#allocation2 + $0xa9] sm:$0xff] %v7896_v9  ;;  %347 = vst [vmem:[#allocation2 + $0xb1] sm:$0xff] %v7894_v10  ;;  %v5912_v24 = vpack.c.bf16 %v373_v23, %v372_v22  ;;  %v587_v25 = vrot.slane %v369_v12, 2  ;;  %v5513_v36 = vld [vmem:[%s7887_s1 + $0x118] sm:$0xff]  }
  0x2e   : > { %1397 = vmatprep.mubr.bf16.mxu0 %v729_v43  ;;  %v588_v26 = vrot.slane %v370_v13, 2  ;;  %v590_v27 = vrot.slane %v371_v15, 2  ;;  %v374_v28 = vld [vmem:[#allocation2 + $0x40] sm:$0x3]  ;;  %348 = vst [vmem:[#allocation2 + $0xc1] sm:$0xff] %v7909_v16  ;;  %349 = vst [vmem:[#allocation2 + $0xc9] sm:$0xff] %v7895_v17  ;;  %1558 = vmatprep.mubr.bf16.mxu1 %v731_v18 }
  0x2f   : > { %1398 = vmatmul.mubr.bf16.vlgmr.msra.gmra.mrb[0].mxu0 %v728_v41  ;;  %v476_v29 = vsel %vm468_vm0, %v474_v19, %v475_v20  ;;  %v478_v30 = vsel %vm468_vm0, %v475_v20, %v477_v21  ;;  %v479_v31 = vrot.slane %v372_v22, 1  ;;  %v480_v32 = vrot.slane %v373_v23, 1  ;;  %v5922_v35 = vld [vmem:[#allocation2 + $0x58] sm:$0x3]  ;;  %v375_v40 = vld [vmem:[#allocation2 + $0x48] sm:$0xff]  ;;  %v5514_v41 = vld [vmem:[%s7887_s1 + $0x160] sm:$0xff]  }
  0x30   : > { %4650 = vmatpush3.bf16.msra.mxu0 %v5507_v46  ;;  %1559 = vmatmul.mubr.bf16.vlgmr.msra.gmra.mrb[0].mxu1 %v730_v14  ;;  %v5920_v33 = vpack.c.bf16 %v478_v30, %v476_v29  ;;  %v482_v34 = vrot.slane %v374_v28, 1  ;;  %v589_v37 = vsel %vm581_vm1, %v587_v25, %v588_v26  ;;  %v591_v38 = vsel %vm581_vm1, %v588_v26, %v590_v27  ;;  %v376_v46 = vld [vmem:[#allocation2 + $0x50] sm:$0xff]  ;;  %v5515_v3 = vld [vmem:[%s7887_s1 + $0x120] sm:$0xff]   ;;  %v5960_v21 = vld [vmem:[#allocation2 + $0x68] sm:$0xff] }
  0x31   : > { %4651 = vmatprep.subr.bf16.mxu0 %v5508_v51  ;;  %1566 = vmatprep.mubr.bf16.mxu1 %v5912_v24  ;;  %v481_v39 = vsel %vm468_vm0, %v479_v31, %v480_v32  ;;  %v484_v48 = vrot.slane %v375_v40, 1  ;;  %v485_v53 = vrot.slane %v376_v46, 1  ;;  %v487_v54 = vrot.slane %v5922_v35, 1  ;;  %v5949_v14 = vld [vmem:[#allocation2 + $0x70] sm:$0x3]  ;;  %v5951_v15 = vld [vmem:[#allocation2 + $0x60] sm:$0xff] }
  0x32   : > { %1405 = vmatprep.mubr.bf16.mxu0 %v5920_v33  ;;  %v483_v43 = vsel %vm468_vm0, %v480_v32, %v482_v34  ;;  %v593_v2 = vrot.slane %v373_v23, 2  ;;  %v489_v25 = vrot.slane %v5951_v15, 1  ;;  %v490_v26 = vrot.slane %v5960_v21, 1  ;;  %v5519_v32 = vld [vmem:[%s7887_s1 + $0x130] sm:$0xff]   ;;  %v5529_v17 = vld [vmem:[%s7887_s1 + $0x138] sm:$0xff]  }
  0x33   : > { %v5936_v51 = vpack.c.bf16 %v483_v43, %v481_v39  ;;  %v486_v12 = vsel %vm468_vm0, %v484_v48, %v485_v53  ;;  %v488_v13 = vsel %vm468_vm0, %v485_v53, %v487_v54  ;;  %v492_v27 = vrot.slane %v5949_v14, 1  ;;  %v5520_v39 = vld [vmem:[%s7887_s1 + $0x1c0] sm:$0xff]   ;;  %v5994_v43 = vld [vmem:[#allocation2 + $0x88] sm:$0x3] }
  0x34   : > { %4652 = vmatpush3.bf16.msra.mxu0 %v5509_v58  ;;  %v5939_v58 = vpack.c.bf16 %v591_v38, %v589_v37  ;;  %v5958_v20 = vpack.c.bf16 %v488_v13, %v486_v12  ;;  %v597_v30 = vrot.slane %v375_v40, 2  ;;  %v598_v31 = vrot.slane %v376_v46, 2  ;;  %4761 = vmatprep.subr.bf16.mxu1 %v5520_v39  ;;  %v6016_v13 = vld [vmem:[%s5812_s14 + $0x48] sm:$0xff]   ;;  %v5525_v39 = vld [vmem:[%s7887_s1 + $0x190] sm:$0xff]  }
  0x35   : > { %4653 = vmatprep.subr.bf16.mxu0 %v5510_v62  ;;  %v592_v62 = vrot.slane %v372_v22, 2  ;;  %v5517_v22 = vld [vmem:[%s7887_s1 + $0x128] sm:$0xff]   ;;  %v5982_v34 = vpack.c.bf16 %v5960_v21, %v5951_v15  ;;  %v491_v37 = vsel %vm468_vm0, %v489_v25, %v490_v26  ;;  %v493_v38 = vsel %vm468_vm0, %v490_v26, %v492_v27  ;;  %7967 = vst [vmem:[#allocation12_spill] sm:$0xff] %v6016_v13  ;;  %v5524_v25 = vld [vmem:[%s7887_s1 + $0x1d0] sm:$0xff]  }
  0x36   : > { %v599_v48 = vsel %vm581_vm1, %v597_v30, %v598_v31  ;;  %v6004_v53 = vpack.c.bf16 %v493_v38, %v491_v37  ;;  %v602_v54 = vrot.slane %v5951_v15, 2  ;;  %v497_v12 = vrot.slane %v5994_v43, 1  ;;  %v5523_v15 = vld [vmem:[%s7887_s1 + $0x188] sm:$0xff]   ;;  %v6033_v26 = vld [vmem:[#allocation2 + $0x90] sm:$0xff]  ;;  %v6054_v38 = vld [vmem:[#allocation2 + $0x98] sm:$0xff] }
  0x37   : > { %1406 = vmatmul.mubr.bf16.gmra.mrb[4].mxu0 %v731_v18  ;;  %v5516_v18 = vld [vmem:[%s7887_s1 + $0x168] sm:$0xff]   ;;  %v594_v19 = vsel %vm581_vm1, %v592_v62, %v593_v2  ;;  %v612_v16 = vrot.slane %v6033_v26, 2  ;;  %v613_v0 = vrot.slane %v6054_v38, 2  ;;  %v6167_v6 = vld [vmem:[#allocation2 + $0xd0] sm:$0x3] }
  0x38   : > { %4654 = vmatpush3.bf16.msra.mxu0 %v5511_v4  ;;  %1413 = vmatprep.mubr.bf16.mxu0 %v5936_v51  ;;  %v5945_v4 = vpack.c.bf16 %v376_v46, %v375_v40  ;;  %v5990_v40 = vld [vmem:[#allocation2 + $0x78] sm:$0xff]  ;;  %v5997_v46 = vld [vmem:[%s5812_s14 + $0x40] sm:$0xff]   ;;  %v5522_v62 = vld [vmem:[%s7887_s1 + $0x1c8] sm:$0xff]   ;;  %v7983_v1 = vrot.slane %v6167_v6, 2 }
  0x39   : > { %4655 = vmatprep.subr.bf16.mxu0 %v5512_v8  ;;  %v595_v8 = vrot.slane %v374_v28, 2  ;;  %1567 = vmatmul.mubr.bf16.gmra.mrb[4].mxu1 %v5939_v58  ;;  %v5518_v28 = vld [vmem:[%s7887_s1 + $0x170] sm:$0xff]   ;;  %7966 = vst [vmem:[#allocation11_spill] sm:$0xff] %v5997_v46  ;;  %v7893_v27 = vunpack.c.l.bf16 %v5997_v46  ;;  %v7892_v30 = vunpack.c.h.bf16 %v5997_v46  ;;  %v614_v63 = vsel %vm581_vm1, %v612_v16, %v613_v0 }
  0x3a   : > { %1574 = vmatprep.mubr.bf16.mxu1 %v5945_v4 }
  0x3b   : > { %v596_v23 = vsel %vm581_vm1, %v593_v2, %v595_v8  ;;  %350 = vst [vmem:[#allocation2 + $0xd9] sm:$0xff] %v7893_v27  ;;  %351 = vst [vmem:[#allocation2 + $0xe1] sm:$0xff] %v7892_v30  ;;  %v500_v30 = vrot.slane %v6054_v38, 1 }
  0x3c   : > { %4656 = vmatpush3.bf16.msra.mxu0 %v5513_v36  ;;  %v5974_v29 = vpack.c.bf16 %v596_v23, %v594_v19  ;;  %v600_v36 = vrot.slane %v5922_v35, 2  ;;  %v5521_v35 = vld [vmem:[%s7887_s1 + $0x180] sm:$0xff]   ;;  %v605_v19 = vrot.slane %v5949_v14, 2  ;;  %v6027_v23 = vld [vmem:[%s5812_s14 + $0x58] sm:$0xff]  }
  0x3d   : > { %4657 = vmatprep.subr.bf16.mxu0 %v5514_v41  ;;  %v5992_v41 = vld [vmem:[#allocation2 + $0x80] sm:$0xff]  ;;  %4762 = vmatpush3.bf16.msra.mxu1 %v5521_v35  ;;  %7969 = vst [vmem:[#allocation14_spill] sm:$0xff] %v6027_v23  ;;  %v7908_v27 = vunpack.c.h.bf16 %v6027_v23 }
  0x3e   : > { %v601_v2 = vsel %vm581_vm1, %v598_v31, %v600_v36  ;;  %v495_v8 = vrot.slane %v5992_v41, 1  ;;  %4763 = vmatprep.subr.bf16.mxu1 %v5522_v62  ;;  %v6042_v14 = vld [vmem:[#allocation2 + $0xa0] sm:$0x3]  ;;  %v6046_v31 = vld [vmem:[%s5812_s14 + $0x68] sm:$0xff]   ;;  %v499_v62 = vrot.slane %v6033_v26, 1 }
  0x3f   : > { %1414 = vmatmul.mubr.bf16.gmra.mrb[8].mxu0 %v5912_v24  ;;  %7971 = vst [vmem:[#allocation16_spill] sm:$0xff] %v6046_v31  ;;  %v502_v9 = vrot.slane %v6042_v14, 1  ;;  %357 = vst [vmem:[#allocation2 + $0x129] sm:$0xff] %v7908_v27 }
  0x40   : > { %4658 = vmatpush3.bf16.msra.mxu0 %v5515_v3  ;;  %1421 = vmatprep.mubr.bf16.mxu0 %v5958_v20  ;;  %v494_v3 = vrot.slane %v5990_v40, 1  ;;  %v498_v37 = vsel %vm468_vm0, %v495_v8, %v497_v12 }
  0x41   : > { %4659 = vmatprep.subr.bf16.mxu0 %v5516_v18  ;;  %1575 = vmatmul.mubr.bf16.gmra.mrb[8].mxu1 %v5974_v29  ;;  %v603_v18 = vrot.slane %v5960_v21, 2  ;;  %v6039_v21 = vpack.c.bf16 %v601_v2, %v599_v48  ;;  %v7898_v2 = vunpack.c.l.bf16 %v6016_v13 }
  0x42   : > { %1582 = vmatprep.mubr.bf16.mxu1 %v5982_v34  ;;  %v496_v36 = vsel %vm468_vm0, %v494_v3, %v495_v8  ;;  %4764 = vmatpush3.bf16.msra.mxu1 %v5523_v15  ;;  %v5526_v3 = vld [vmem:[%s7887_s1 + $0x1d8] sm:$0xff]   ;;  %v6200_v56 = vld [vmem:[#allocation2 + $0xe8] sm:$0x3]  ;;  %v6206_v55 = vld [vmem:[#allocation2 + $0xe0] sm:$0xff] }
  0x43   : > { %v604_v35 = vsel %vm581_vm1, %v602_v54, %v603_v18  ;;  %v606_v48 = vsel %vm581_vm1, %v603_v18, %v605_v19  ;;  %4765 = vmatprep.subr.bf16.mxu1 %v5524_v25  ;;  %v5528_v8 = vld [vmem:[%s7887_s1 + $0x178] sm:$0xff]   ;;  %v7897_v54 = vunpack.c.h.bf16 %v6016_v13  ;;  %v7901_v18 = vunpack.c.l.bf16 %v6027_v23  ;;  %v6078_v19 = vld [vmem:[%s5812_s14 + $0x70] sm:$0xff]   ;;  %352 = vst [vmem:[#allocation2 + $0xf1] sm:$0xff] %v7898_v2 }
  0x44   : > { %4660 = vmatpush3.bf16.msra.mxu0 %v5517_v22  ;;  %v6024_v22 = vld [vmem:[%s5812_s14 + $0x50] sm:$0xff]   ;;  %7972 = vst [vmem:[#allocation17_spill] sm:$0xff] %v6078_v19  ;;  %v6081_v25 = vpack.c.bf16 %v498_v37, %v496_v36  ;;  %v7907_v37 = vunpack.c.l.bf16 %v6046_v31  ;;  %v607_v2 = vrot.slane %v5990_v40, 2 }
  0x45   : > { %4661 = vmatprep.subr.bf16.mxu0 %v5518_v28  ;;  %7968 = vst [vmem:[#allocation13_spill] sm:$0xff] %v6024_v22  ;;  %v6037_v28 = vld [vmem:[%s5812_s14 + $0x60] sm:$0xff]   ;;  %v7900_v12 = vunpack.c.l.bf16 %v6024_v22  ;;  %v7899_v15 = vunpack.c.h.bf16 %v6024_v22  ;;  %353 = vst [vmem:[#allocation2 + $0xf9] sm:$0xff] %v7897_v54  ;;  %v5527_v54 = vld [vmem:[%s7887_s1 + $0x198] sm:$0xff]  }
  0x46   : > { %7970 = vst [vmem:[#allocation15_spill] sm:$0xff] %v6037_v28  ;;  %v7906_v10 = vunpack.c.l.bf16 %v6037_v28  ;;  %356 = vst [vmem:[#allocation2 + $0x121] sm:$0xff] %v7901_v18  ;;  %v7902_v36 = vunpack.c.h.bf16 %v6037_v28  ;;  %4766 = vmatpush3.bf16.msra.mxu1 %v5525_v39  ;;  %v5530_v39 = vld [vmem:[%s7887_s1 + $0x1e0] sm:$0xff]   ;;  %v610_v18 = vrot.slane %v5994_v43, 2  ;;  %v501_v43 = vsel %vm468_vm0, %v499_v62, %v500_v30  ;;  %v5532_v62 = vld [vmem:[%s7887_s1 + $0x1e8] sm:$0xff]  }
  0x47   : > { %1422 = vmatmul.mubr.bf16.gmra.mrb[12].mxu0 %v5945_v4  ;;  %354 = vst [vmem:[#allocation2 + $0x109] sm:$0xff] %v7900_v12  ;;  %355 = vst [vmem:[#allocation2 + $0x111] sm:$0xff] %v7899_v15  ;;  %4767 = vmatprep.subr.bf16.mxu1 %v5526_v3  ;;  %v7903_v15 = vunpack.c.l.bf16 %v6078_v19  ;;  %v7905_v12 = vunpack.c.h.bf16 %v6078_v19  ;;  %v6129_v3 = vld [vmem:[#allocation2 + $0xa8] sm:$0xff]  ;;  %v6258_v16 = vld [vmem:[#allocation2 + $0x130] sm:$0x3] }
  0x48   : > { %4662 = vmatpush3.bf16.msra.mxu0 %v5519_v32  ;;  %1429 = vmatprep.mubr.bf16.mxu0 %v6004_v53  ;;  %v6050_v32 = vpack.c.bf16 %v5992_v41, %v5990_v40  ;;  %358 = vst [vmem:[#allocation2 + $0x139] sm:$0xff] %v7906_v10  ;;  %v608_v40 = vrot.slane %v5992_v41, 2  ;;  %359 = vst [vmem:[#allocation2 + $0x141] sm:$0xff] %v7902_v36  ;;  %v6137_v41 = vpack.c.bf16 %v6054_v38, %v6033_v26  ;;  %v6143_v36 = vld [vmem:[#allocation2 + $0xb8] sm:$0x3]  ;;  %v6180_v38 = vld [vmem:[#allocation2 + $0xc0] sm:$0xff] }
  0x49   : > { %1583 = vmatmul.mubr.bf16.gmra.mrb[12].mxu1 %v6039_v21  ;;  %4663 = vmatprep.subr.bf16.mxu0 %v5528_v8  ;;  %v7904_v8 = vunpack.c.h.bf16 %v6046_v31  ;;  %360 = vst [vmem:[#allocation2 + $0x151] sm:$0xff] %v7907_v37  ;;  %362 = vst [vmem:[#allocation2 + $0x169] sm:$0xff] %v7903_v15  ;;  %v5531_v15 = vld [vmem:[%s7887_s1 + $0x1a0] sm:$0xff]   ;;  %v6154_v10 = vld [vmem:[%s5812_s14 + $0x78] sm:$0xff]   ;;  %v7976_v7 = vrot.slane %v6143_v36, 2 }
  0x4a   : > { %1590 = vmatprep.mubr.bf16.mxu1 %v6050_v32  ;;  %363 = vst [vmem:[#allocation2 + $0x171] sm:$0xff] %v7905_v12  ;;  %4768 = vmatpush3.bf16.msra.mxu1 %v5527_v54  ;;  %7973 = vst [vmem:[#allocation18_spill] sm:$0xff] %v6154_v10  ;;  %v7913_v54 = vunpack.c.l.bf16 %v6154_v10  ;;  %v7912_v37 = vunpack.c.h.bf16 %v6154_v10 }
  0x4b   : > { %361 = vst [vmem:[#allocation2 + $0x159] sm:$0xff] %v7904_v8  ;;  %v504_v8 = vrot.slane %v6129_v3, 1  ;;  %4769 = vmatprep.subr.bf16.mxu1 %v5530_v39  ;;  %v507_v39 = vrot.slane %v6143_v36, 1 }
  0x4c   : > { %4664 = vmatpush3.bf16.msra.mxu0 %v5529_v17  ;;  %v6126_v17 = vpack.c.bf16 %v606_v48, %v604_v35  ;;  %v503_v35 = vsel %vm468_vm0, %v500_v30, %v502_v9  ;;  %v6141_v48 = vld [vmem:[#allocation2 + $0xb0] sm:$0xff]  ;;  %v609_v9 = vsel %vm581_vm1, %v607_v2, %v608_v40  ;;  %v611_v30 = vsel %vm581_vm1, %v608_v40, %v610_v18  ;;  %v5533_v2 = vld [vmem:[%s7887_s1 + $0x1a8] sm:$0xff]   ;;  %v6212_v45 = vld [vmem:[#allocation2 + $0xf8] sm:$0xff] }
  0x4d   : > { %v505_v12 = vrot.slane %v6141_v48, 1  ;;  %v6161_v27 = vpack.c.bf16 %v503_v35, %v501_v43  ;;  %364 = vst [vmem:[#allocation2 + $0x181] sm:$0xff] %v7913_v54  ;;  %365 = vst [vmem:[#allocation2 + $0x189] sm:$0xff] %v7912_v37  ;;  %v6176_v18 = vpack.c.bf16 %v611_v30, %v609_v9  ;;  %v615_v40 = vrot.slane %v6042_v14, 2  ;;  %v6182_v43 = vld [vmem:[#allocation2 + $0xc8] sm:$0xff]  ;;  %v5534_v35 = vld [vmem:[%s7887_s1 + $0x1f0] sm:$0xff]  }
  0x4e   : > { %4770 = vmatpush3.bf16.msra.mxu1 %v5531_v15  ;;  %v509_v14 = vrot.slane %v6180_v38, 1  ;;  %v6196_v54 = vld [vmem:[#allocation2 + $0xd8] sm:$0xff]  ;;  %v6204_v60 = vpack.c.bf16 %v6141_v48, %v6129_v3  ;;  %v6224_v30 = vld [vmem:[#allocation2 + $0x100] sm:$0x3]  ;;  %v6240_v44 = vld [vmem:[#allocation2 + $0x110] sm:$0xff] }
  0x4f   : > { %1430 = vmatmul.mubr.bf16.gmra.mrb[16].mxu0 %v5982_v34  ;;  %v506_v26 = vsel %vm468_vm0, %v504_v8, %v505_v12  ;;  %4771 = vmatprep.subr.bf16.mxu1 %v5532_v62  ;;  %v510_v8 = vrot.slane %v6182_v43, 1  ;;  %v508_v37 = vsel %vm468_vm0, %v505_v12, %v507_v39  ;;  %v512_v62 = vrot.slane %v6167_v6, 1  ;;  %v6210_v39 = vld [vmem:[#allocation2 + $0xf0] sm:$0xff]  ;;  %v6265_v19 = vld [vmem:[#allocation2 + $0x120] sm:$0xff]  ;;  %v6276_v9 = vld [vmem:[#allocation2 + $0x148] sm:$0x3] }
  0x50   : > { %1437 = vmatprep.mubr.bf16.mxu0 %v6081_v25  ;;  %v616_v59 = vsel %vm581_vm1, %v613_v0, %v615_v40  ;;  %v6221_v5 = vpack.c.bf16 %v508_v37, %v506_v26  ;;  %v517_v12 = vrot.slane %v6200_v56, 1  ;;  %v6235_v37 = vld [vmem:[#allocation2 + $0x118] sm:$0x3]  ;;  %v6238_v26 = vld [vmem:[#allocation2 + $0x108] sm:$0xff]  ;;  %v6256_v40 = vpack.c.bf16 %v6182_v43, %v6180_v38  ;;  %v6282_v23 = vld [vmem:[#allocation2 + $0x140] sm:$0xff] }
  0x51   : > { %1591 = vmatmul.mubr.bf16.gmra.mrb[16].mxu1 %v6126_v17  ;;  %v513_v15 = vsel %vm468_vm0, %v510_v8, %v512_v62  ;;  %v525_v10 = vrot.slane %v6240_v44, 1  ;;  %v527_v28 = vrot.slane %v6235_v37, 1  ;;  %v529_v0 = vrot.slane %v6265_v19, 1  ;;  %v6280_v22 = vld [vmem:[#allocation2 + $0x138] sm:$0xff] }
  0x52   : > { %1598 = vmatprep.mubr.bf16.mxu1 %v6137_v41  ;;  %4772 = vmatpush3.bf16.msra.mxu1 %v5533_v2  ;;  %v5536_v2 = vld [vmem:[%s7887_s1 + $0x1f8] sm:$0xff]   ;;  %v7974_v62 = vrot.slane %v6141_v48, 2  ;;  %v7979_v36 = vrot.slane %v6196_v54, 1  ;;  %v7985_v6 = vrot.slane %v6212_v45, 1  ;;  %v7999_v52 = vrot.slane %v6235_v37, 2 }
  0x53   : > { %4773 = vmatprep.subr.bf16.mxu1 %v5534_v35  ;;  %v6249_v35 = vld [vmem:[%s7887_s1 + $0x200] sm:$0xff]   ;;  %v413_v57 = vld [vmem:[#allocation2 + $0x178] sm:$0x3] }
  0x54   : > { %5369 = vmatprep.subr.bf16.mxu0 %v6249_v35  ;;  %v7977_v11 = vmov %v7974_v62 }
  0x55   : > { %v621_v61 = vsel %vm581_vm1, %v7977_v11, %v7976_v7  ;;  %v6312_v7 = vpack.c.bf16 %v6206_v55, %v6196_v54  ;;  %v7978_v11 = vrot.slane %v6206_v55, 1 }
  0x56   : > { %4774 = vmatpush3.bf16.msra.mxu1 %v5535_v49  ;;  %v6252_v49 = vpack.c.bf16 %v616_v59, %v614_v63  ;;  %v6267_v59 = vld [vmem:[#allocation2 + $0x128] sm:$0xff]  ;;  %v524_v63 = vrot.slane %v6238_v26, 1 }
  0x57   : > { %1438 = vmatmul.mubr.bf16.gmra.mrb[20].mxu0 %v6050_v32  ;;  %4775 = vmatprep.subr.bf16.mxu1 %v5536_v2  ;;  %v511_v2 = vsel %vm468_vm0, %v509_v14, %v510_v8  ;;  %v530_v31 = vrot.slane %v6267_v59, 1  ;;  %v7975_v8 = vrot.slane %v6129_v3, 2  ;;  %v537_v3 = vrot.slane %v6276_v9, 1 }
  0x58   : > { %1445 = vmatprep.mubr.bf16.mxu0 %v6161_v27  ;;  %v6285_v46 = vpack.c.bf16 %v513_v15, %v511_v2  ;;  %v516_v48 = vsel %vm468_vm0, %v7979_v36, %v7978_v11  ;;  %v7980_v2 = vmov %v7978_v11 }
  0x59   : > { %1599 = vmatmul.mubr.bf16.gmra.mrb[20].mxu1 %v6176_v18  ;;  %v619_v13 = vsel %vm581_vm1, %v7975_v8, %v7974_v62  ;;  %v518_v15 = vsel %vm468_vm0, %v7980_v2, %v517_v12  ;;  %v7982_v8 = vrot.slane %v6180_v38, 2  ;;  %v6344_v38 = vpack.c.bf16 %v6212_v45, %v6210_v39 }
  0x5a   : > { %1606 = vmatprep.mubr.bf16.mxu1 %v6204_v60  ;;  %4776 = vmatpush3.bf16.msra.mxu1 %v5537_v50  ;;  %v532_v50 = vrot.slane %v6258_v16, 1  ;;  %v6307_v62 = vpack.c.bf16 %v621_v61, %v619_v13  ;;  %v6323_v61 = vpack.c.bf16 %v518_v15, %v516_v48  ;;  %v7981_v13 = vrot.slane %v6182_v43, 2 }
  0x5b   : > { %v7986_v43 = vrot.slane %v6210_v39, 1  ;;  %v7988_v48 = vmov %v7985_v6 }
  0x5c   : > { %v624_v14 = vsel %vm581_vm1, %v7982_v8, %v7981_v13  ;;  %v7984_v11 = vmov %v7981_v13  ;;  %v7987_v8 = vrot.slane %v6224_v30, 1 }
  0x5d   : > { %v626_v36 = vsel %vm581_vm1, %v7984_v11, %v7983_v1  ;;  %v521_v1 = vsel %vm468_vm0, %v7986_v43, %v7985_v6  ;;  %v7989_v11 = vrot.slane %v6206_v55, 2  ;;  %v7991_v6 = vrot.slane %v6200_v56, 2  ;;  %v408_v55 = vld [vmem:[#allocation2 + $0x150] sm:$0xff] }
  0x5e   : > { %v6339_v2 = vpack.c.bf16 %v626_v36, %v624_v14  ;;  %v523_v13 = vsel %vm468_vm0, %v7988_v48, %v7987_v8  ;;  %v7990_v36 = vrot.slane %v6196_v54, 2  ;;  %v526_v54 = vsel %vm468_vm0, %v524_v63, %v525_v10 }
  0x5f   : > { %1446 = vmatmul.mubr.bf16.gmra.mrb[24].mxu0 %v6137_v41  ;;  %v6357_v14 = vpack.c.bf16 %v523_v13, %v521_v1  ;;  %v7992_v43 = vmov %v7989_v11  ;;  %v6376_v1 = vpack.c.bf16 %v6240_v44, %v6238_v26  ;;  %v528_v48 = vsel %vm468_vm0, %v525_v10, %v527_v28  ;;  %v409_v13 = vld [vmem:[#allocation2 + $0x158] sm:$0xff]  ;;  %v410_v28 = vld [vmem:[#allocation2 + $0x160] sm:$0x3] }
  0x60   : > { %1453 = vmatprep.mubr.bf16.mxu0 %v6221_v5  ;;  %v629_v15 = vsel %vm581_vm1, %v7990_v36, %v7989_v11  ;;  %v631_v12 = vsel %vm581_vm1, %v7992_v43, %v7991_v6  ;;  %v6381_v56 = vpack.c.bf16 %v528_v48, %v526_v54  ;;  %v7995_v36 = vrot.slane %v6224_v30, 2 }
  0x61   : > { %1607 = vmatmul.mubr.bf16.gmra.mrb[24].mxu1 %v6252_v49  ;;  %v6371_v8 = vpack.c.bf16 %v631_v12, %v629_v15  ;;  %v7993_v12 = vrot.slane %v6212_v45, 2  ;;  %v7994_v15 = vrot.slane %v6210_v39, 2  ;;  %v539_v6 = vrot.slane %v408_v55, 1  ;;  %v411_v45 = vld [vmem:[#allocation2 + $0x168] sm:$0xff] }
  0x62   : > { %1614 = vmatprep.mubr.bf16.mxu1 %v6256_v40  ;;  %v540_v43 = vrot.slane %v409_v13, 1  ;;  %v6400_v39 = vpack.c.bf16 %v6267_v59, %v6265_v19  ;;  %v531_v48 = vsel %vm468_vm0, %v529_v0, %v530_v31  ;;  %v533_v30 = vsel %vm468_vm0, %v530_v31, %v532_v50 }
  0x63   : > { %v634_v11 = vsel %vm581_vm1, %v7994_v15, %v7993_v12  ;;  %v7996_v63 = vmov %v7993_v12  ;;  %v6405_v12 = vpack.c.bf16 %v533_v30, %v531_v48  ;;  %v542_v15 = vrot.slane %v410_v28, 1 }
  0x64   : > { %v636_v10 = vsel %vm581_vm1, %v7996_v63, %v7995_v36  ;;  %v544_v36 = vrot.slane %v411_v45, 1  ;;  %v7998_v63 = vrot.slane %v6238_v26, 2  ;;  %v6424_v48 = vpack.c.bf16 %v6282_v23, %v6280_v22 }
  0x65   : > { %v6395_v54 = vpack.c.bf16 %v636_v10, %v634_v11  ;;  %v7997_v11 = vrot.slane %v6240_v44, 2  ;;  %v8001_v26 = vrot.slane %v6282_v23, 1  ;;  %v8002_v30 = vrot.slane %v6280_v22, 1 }
  0x66   : > { %v655_v42 = vrot.slane %v410_v28, 2  ;;  %v657_v28 = vrot.slane %v411_v45, 2 }
  0x67   : > { %1454 = vmatmul.mubr.bf16.gmra.mrb[28].mxu0 %v6204_v60  ;;  %v639_v10 = vsel %vm581_vm1, %v7998_v63, %v7997_v11  ;;  %v8000_v0 = vmov %v7997_v11  ;;  %v536_v37 = vsel %vm468_vm0, %v8002_v30, %v8001_v26  ;;  %v8003_v44 = vmov %v8001_v26 }
  0x68   : > { %1461 = vmatprep.mubr.bf16.mxu0 %v6285_v46  ;;  %v641_v31 = vsel %vm581_vm1, %v8000_v0, %v7999_v52  ;;  %v538_v52 = vsel %vm468_vm0, %v8003_v44, %v537_v3  ;;  %v8004_v63 = vrot.slane %v6267_v59, 2  ;;  %v6452_v44 = vpack.c.bf16 %v409_v13, %v408_v55 }
  0x69   : > { %1615 = vmatmul.mubr.bf16.gmra.mrb[28].mxu1 %v6307_v62  ;;  %v6419_v50 = vpack.c.bf16 %v641_v31, %v639_v10  ;;  %v6435_v11 = vpack.c.bf16 %v538_v52, %v536_v37  ;;  %v8005_v10 = vrot.slane %v6265_v19, 2  ;;  %v8006_v31 = vrot.slane %v6258_v16, 2  ;;  %v412_v37 = vld [vmem:[#allocation2 + $0x170] sm:$0xff] }
  0x6a   : > { %1622 = vmatprep.mubr.bf16.mxu1 %v6312_v7  ;;  %v8007_v26 = vmov %v8004_v63  ;;  %v541_v19 = vsel %vm468_vm0, %v539_v6, %v540_v43  ;;  %v543_v52 = vsel %vm468_vm0, %v540_v43, %v542_v15  ;;  %v547_v16 = vrot.slane %v413_v57, 1 }
  0x6b   : > { %v644_v0 = vsel %vm581_vm1, %v8005_v10, %v8004_v63  ;;  %v646_v30 = vsel %vm581_vm1, %v8007_v26, %v8006_v31  ;;  %v545_v63 = vrot.slane %v412_v37, 1  ;;  %v6457_v59 = vpack.c.bf16 %v543_v52, %v541_v19 }
  0x6c   : > { %v6449_v3 = vpack.c.bf16 %v646_v30, %v644_v0  ;;  %v8008_v10 = vrot.slane %v6282_v23, 2  ;;  %v8009_v0 = vrot.slane %v6280_v22, 2  ;;  %v8010_v26 = vrot.slane %v6276_v9, 2 }
  0x6d   : > { %v6474_v30 = vpack.c.bf16 %v412_v37, %v411_v45  ;;  %v652_v19 = vrot.slane %v408_v55, 2  ;;  %v653_v52 = vrot.slane %v409_v13, 2  ;;  %v546_v22 = vsel %vm468_vm0, %v544_v36, %v545_v63  ;;  %v5540_v45 = vld [vmem:[%s7887_s1 + $0x210] sm:$0xff]  }
  0x6e   : > { %v649_v31 = vsel %vm581_vm1, %v8009_v0, %v8008_v10  ;;  %v8011_v6 = vmov %v8008_v10  ;;  %v548_v10 = vsel %vm468_vm0, %v545_v63, %v547_v16  ;;  %v658_v36 = vrot.slane %v412_v37, 2 }
  0x6f   : > { %1462 = vmatmul.mubr.bf16.gmra.mrb[32].mxu0 %v6256_v40  ;;  %v651_v43 = vsel %vm581_vm1, %v8011_v6, %v8010_v26  ;;  %v6479_v23 = vpack.c.bf16 %v548_v10, %v546_v22  ;;  %v654_v9 = vsel %vm581_vm1, %v652_v19, %v653_v52  ;;  %v656_v0 = vsel %vm581_vm1, %v653_v52, %v655_v42  ;;  %v6486_v26 = vld [vmem:[#allocation2 + $0x188] sm:$0xff] }
  0x70   : > { %1469 = vmatprep.mubr.bf16.mxu0 %v6323_v61  ;;  %v6471_v15 = vpack.c.bf16 %v651_v43, %v649_v31  ;;  %v6484_v31 = vld [vmem:[#allocation2 + $0x180] sm:$0xff]  ;;  %v6489_v55 = vpack.c.bf16 %v656_v0, %v654_v9  ;;  %v660_v63 = vrot.slane %v413_v57, 2  ;;  %v659_v42 = vsel %vm581_vm1, %v657_v28, %v658_v36  ;;  %v5539_v57 = vld [vmem:[%s7887_s1 + $0x208] sm:$0xff]  }
  0x71   : > { %1623 = vmatmul.mubr.bf16.gmra.mrb[32].mxu1 %v6339_v2  ;;  %v6494_v13 = vpack.c.bf16 %v6486_v26, %v6484_v31 }
  0x72   : > { %1630 = vmatprep.mubr.bf16.mxu1 %v6344_v38  ;;  %v661_v16 = vsel %vm581_vm1, %v658_v36, %v660_v63 }
  0x73   : > { %v6501_v6 = vpack.c.bf16 %v661_v16, %v659_v42 }
  0x77   : > { %1470 = vmatmul.mubr.bf16.gmra.mrb[36].mxu0 %v6312_v7 }
  0x78   : > { %1477 = vmatprep.mubr.bf16.mxu0 %v6357_v14 }
  0x79   : > { %1631 = vmatmul.mubr.bf16.gmra.mrb[36].mxu1 %v6371_v8 }
  0x7a   : > { %1638 = vmatprep.mubr.bf16.mxu1 %v6376_v1 }
  0x7f   : > { %1478 = vmatmul.mubr.bf16.gmra.mrb[40].mxu0 %v6344_v38 }
  0x80   : > { %1485 = vmatprep.mubr.bf16.mxu0 %v6381_v56 }
  0x81   : > { %1639 = vmatmul.mubr.bf16.gmra.mrb[40].mxu1 %v6395_v54 }
  0x82   : > { %1646 = vmatprep.mubr.bf16.mxu1 %v6400_v39 }
  0x87   : > { %1486 = vmatmul.mubr.bf16.gmra.mrb[44].mxu0 %v6376_v1 }
  0x88   : > { %1493 = vmatprep.mubr.bf16.mxu0 %v6405_v12 }
  0x89   : > { %1647 = vmatmul.mubr.bf16.gmra.mrb[44].mxu1 %v6419_v50 }
  0x8a   : > { %1654 = vmatprep.mubr.bf16.mxu1 %v6424_v48 }
  0x8f   : > { %1494 = vmatmul.mubr.bf16.gmra.mrb[48].mxu0 %v6400_v39 }
  0x90   : > { %1501 = vmatprep.mubr.bf16.mxu0 %v6435_v11 }
  0x91   : > { %1655 = vmatmul.mubr.bf16.gmra.mrb[48].mxu1 %v6449_v3 }
  0x92   : > { %1662 = vmatprep.mubr.bf16.mxu1 %v6452_v44 }
  0x97   : > { %1502 = vmatmul.mubr.bf16.gmra.mrb[52].mxu0 %v6424_v48 }
  0x98   : > { %1509 = vmatprep.mubr.bf16.mxu0 %v6457_v59 }
  0x99   : > { %1663 = vmatmul.mubr.bf16.gmra.mrb[52].mxu1 %v6471_v15 }
  0x9a   : > { %1670 = vmatprep.mubr.bf16.mxu1 %v6474_v30 }
  0x9f   : > { %1510 = vmatmul.mubr.bf16.gmra.mrb[56].mxu0 %v6452_v44 }
  0xa0   : > { %1517 = vmatprep.mubr.bf16.mxu0 %v6479_v23 }
  0xa1   : > { %1671 = vmatmul.mubr.bf16.gmra.mrb[56].mxu1 %v6489_v55 }
  0xa2   : > { %1678 = vmatprep.mubr.bf16.mxu1 %v6494_v13 }
  0xa7   : > { %1518 = vmatmul.mubr.bf16.gmra.mrb[60].mxu0 %v6474_v30 }
  0xa8   : > { %1719 = vmatprep.mubr.bf16.mxu0 %v5939_v58  ;;  %v5541_v58 = vld [vmem:[%s7887_s1 + $0x218] sm:$0xff]  }
  0xa9   : > { %1679 = vmatmul.mubr.bf16.gmra.mrb[60].mxu1 %v6501_v6 }
  0xaa   : > { %1880 = vmatprep.mubr.bf16.mxu1 %v5936_v51 }
  0xaf   : > { %1720 = vmatmul.mubr.bf16.vlgmr.msra.gmra.mrb[64].mxu0 %v5920_v33  ;;  %v5542_v33 = vld [vmem:[%s7887_s1 + $0x220] sm:$0xff]  }
  0xb0   : > { %5370 = vmatpush3.bf16.msra.mxu0 %v6249_v35  ;;  %1727 = vmatprep.mubr.bf16.mxu0 %v5974_v29 }
  0xb1   : > { %5371 = vmatprep.subr.bf16.mxu0 %v5539_v57  ;;  %1881 = vmatmul.mubr.bf16.vlgmr.msra.gmra.mrb[64].mxu1 %v5912_v24  ;;  %v5543_v24 = vld [vmem:[%s7887_s1 + $0x228] sm:$0xff]  }
  0xb2   : > { %1888 = vmatprep.mubr.bf16.mxu1 %v5958_v20 }
  0xb4   : > { %5372 = vmatpush3.bf16.msra.mxu0 %v5539_v57 }
  0xb5   : > { %5373 = vmatprep.subr.bf16.mxu0 %v5540_v45 }
  0xb7   : > { %1728 = vmatmul.mubr.bf16.gmra.mrb[68].mxu0 %v5936_v51  ;;  %v5544_v51 = vld [vmem:[%s7887_s1 + $0x230] sm:$0xff]  }
  0xb8   : > { %1735 = vmatprep.mubr.bf16.mxu0 %v6039_v21  ;;  %5374 = vmatpush3.bf16.msra.mxu0 %v5540_v45 }
  0xb9   : > { %5375 = vmatprep.subr.bf16.mxu0 %v5541_v58  ;;  %1889 = vmatmul.mubr.bf16.gmra.mrb[68].mxu1 %v5945_v4  ;;  %v5545_v4 = vld [vmem:[%s7887_s1 + $0x238] sm:$0xff]  }
  0xba   : > { %1896 = vmatprep.mubr.bf16.mxu1 %v6004_v53 }
  0xbc   : > { %5376 = vmatpush3.bf16.msra.mxu0 %v5541_v58 }
  0xbd   : > { %5377 = vmatprep.subr.bf16.mxu0 %v5542_v33 }
  0xbf   : > { %1736 = vmatmul.mubr.bf16.gmra.mrb[72].mxu0 %v5958_v20  ;;  %v6555_v20 = vld [vmem:[#allocation2 + $0x198] sm:$0xff] }
  0xc0   : > { %1743 = vmatprep.mubr.bf16.mxu0 %v6126_v17  ;;  %5378 = vmatpush3.bf16.msra.mxu0 %v5542_v33  ;;  %v697_v33 = vrot.slane %v6484_v31, 1 }
  0xc1   : > { %5379 = vmatprep.subr.bf16.mxu0 %v5543_v24  ;;  %1897 = vmatmul.mubr.bf16.gmra.mrb[72].mxu1 %v5982_v34  ;;  %v6557_v34 = vld [vmem:[#allocation2 + $0x1a8] sm:$0x3] }
  0xc2   : > { %1904 = vmatprep.mubr.bf16.mxu1 %v6081_v25 }
  0xc4   : > { %5380 = vmatpush3.bf16.msra.mxu0 %v5543_v24 }
  0xc5   : > { %5381 = vmatprep.subr.bf16.mxu0 %v5544_v51 }
  0xc7   : > { %1744 = vmatmul.mubr.bf16.gmra.mrb[76].mxu0 %v6004_v53  ;;  %v721_v53 = vrot.slane %v6555_v20, 2 }
  0xc8   : > { %1751 = vmatprep.mubr.bf16.mxu0 %v6176_v18  ;;  %5382 = vmatpush3.bf16.msra.mxu0 %v5544_v51 }
  0xc9   : > { %5383 = vmatprep.subr.bf16.mxu0 %v5545_v4  ;;  %1905 = vmatmul.mubr.bf16.gmra.mrb[76].mxu1 %v6050_v32  ;;  %v724_v32 = vrot.slane %v6557_v34, 2 }
  0xca   : > { %1912 = vmatprep.mubr.bf16.mxu1 %v6161_v27 }
  0xcc   : > { %5384 = vmatpush3.bf16.msra.mxu0 %v5545_v4 }
  0xcf   : > { %1752 = vmatmul.mubr.bf16.gmra.mrb[80].mxu0 %v6081_v25 }
  0xd0   : > { %1759 = vmatprep.mubr.bf16.mxu0 %v6252_v49 }
  0xd1   : > { %1913 = vmatmul.mubr.bf16.gmra.mrb[80].mxu1 %v6137_v41 }
  0xd2   : > { %1920 = vmatprep.mubr.bf16.mxu1 %v6221_v5 }
  0xd7   : > { %1760 = vmatmul.mubr.bf16.gmra.mrb[84].mxu0 %v6161_v27  ;;  %v6561_v27 = vld [vmem:[#allocation2 + $0x8] sm:$0xff] }
  0xd8   : > { %1767 = vmatprep.mubr.bf16.mxu0 %v6307_v62 }
  0xd9   : > { %1921 = vmatmul.mubr.bf16.gmra.mrb[84].mxu1 %v6204_v60  ;;  %v6564_v60 = vrot.slane %v6561_v27, 2 }
  0xda   : > { %1928 = vmatprep.mubr.bf16.mxu1 %v6285_v46 }
  0xdb   : > { %v6574_v25 = vsel %vm581_vm1, %v6564_v60, %v724_v32 }
  0xdf   : > { %1768 = vmatmul.mubr.bf16.gmra.mrb[88].mxu0 %v6221_v5  ;;  %v6570_v5 = vsel %vm581_vm1, %v721_v53, %v6564_v60 }
  0xe0   : > { %1775 = vmatprep.mubr.bf16.mxu0 %v6339_v2  ;;  %v781_v41 = vpack.c.bf16 %v6574_v25, %v6570_v5 }
  0xe1   : > { %1929 = vmatmul.mubr.bf16.gmra.mrb[88].mxu1 %v6256_v40 }
  0xe2   : > { %1936 = vmatprep.mubr.bf16.mxu1 %v6323_v61 }
  0xe7   : > { %1776 = vmatmul.mubr.bf16.gmra.mrb[92].mxu0 %v6285_v46 }
  0xe8   : > { %1783 = vmatprep.mubr.bf16.mxu0 %v6371_v8 }
  0xe9   : > { %1937 = vmatmul.mubr.bf16.gmra.mrb[92].mxu1 %v6312_v7 }
  0xea   : > { %1944 = vmatprep.mubr.bf16.mxu1 %v6357_v14 }
  0xef   : > { %1784 = vmatmul.mubr.bf16.gmra.mrb[96].mxu0 %v6323_v61 }
  0xf0   : > { %1791 = vmatprep.mubr.bf16.mxu0 %v6395_v54 }
  0xf1   : > { %1945 = vmatmul.mubr.bf16.gmra.mrb[96].mxu1 %v6344_v38 }
  0xf2   : > { %1952 = vmatprep.mubr.bf16.mxu1 %v6381_v56 }
  0xf7   : > { %1792 = vmatmul.mubr.bf16.gmra.mrb[100].mxu0 %v6357_v14  ;;  %v6595_v14 = vld [vmem:[%s7888_s2] ss:$0 sm:$0xff] }
  0xf8   : > { %1799 = vmatprep.mubr.bf16.mxu0 %v6419_v50 }
  0xf9   : > { %1953 = vmatmul.mubr.bf16.gmra.mrb[100].mxu1 %v6376_v1 }
  0xfa   : > { %1960 = vmatprep.mubr.bf16.mxu1 %v6405_v12 }
  0xff   : > { %1800 = vmatmul.mubr.bf16.gmra.mrb[104].mxu0 %v6381_v56 }
 0x100   : > { %1807 = vmatprep.mubr.bf16.mxu0 %v6449_v3 }
 0x101   : > { %1961 = vmatmul.mubr.bf16.gmra.mrb[104].mxu1 %v6400_v39 }
 0x102   : > { %v4441_v46 = vpop.f32.mrb[0].mxu0  ;;  %1968 = vmatprep.mubr.bf16.mxu1 %v6435_v11 }
 0x103   : > { %v4442_v35 = vpop.f32.mrb[1].mxu0  ;;  %v4553_v37 = vpop.f32.mrb[0].mxu1 }
 0x104   : > { %v4443_v40 = vadd.f32 %v4442_v35, %v4441_v46  ;;  %v4444_v7 = vpop.f32.mrb[2].mxu0  ;;  %v4554_v56 = vpop.f32.mrb[1].mxu1 }
 0x105   : > { %v4445_v61 = vpop.f32.mrb[3].mxu0  ;;  %v4555_v19 = vadd.f32 %v4554_v56, %v4553_v37  ;;  %v4556_v52 = vpop.f32.mrb[2].mxu1 }
 0x106   : > { %v4446_v38 = vadd.f32 %v4445_v61, %v4444_v7  ;;  %v1400_v1 = vadd.f32 %v4443_v40, %v6595_v14  ;;  %v4557_v39 = vpop.f32.mrb[3].mxu1  ;;  %v5547_v61 = vld [vmem:[%s7889_s3] sm:$0xff]  }
 0x107   : > { %1808 = vmatmul.mubr.bf16.gmra.mrb[108].mxu0 %v6405_v12  ;;  %v4558_v10 = vadd.f32 %v4557_v39, %v4556_v52  ;;  %v416_v12 = vld [vmem:[#allocation2 + $0x190] sm:$0x3]  ;;  %v705_v52 = vrot.slane %v6486_v26, 2 }
 0x108   : > { %1815 = vmatprep.mubr.bf16.mxu0 %v6471_v15  ;;  %v1403_v43 = vadd.f32 %v4446_v38, %v6595_v14  ;;  %v6602_v0 = vadd.f32 %v4555_v19, %v1400_v1  ;;  %v700_v24 = vrot.slane %v416_v12, 1  ;;  %v704_v19 = vrot.slane %v6484_v31, 2 }
 0x109   : > { %1969 = vmatmul.mubr.bf16.gmra.mrb[108].mxu1 %v6424_v48  ;;  %v698_v48 = vrot.slane %v6486_v26, 1  ;;  %v707_v39 = vrot.slane %v416_v12, 2 }
 0x10a   : > { %v4447_v22 = vpop.f32.mrb[4].mxu0  ;;  %1976 = vmatprep.mubr.bf16.mxu1 %v6457_v59  ;;  %v6606_v42 = vadd.f32 %v4558_v10, %v1403_v43  ;;  %v706_v26 = vsel %vm581_vm1, %v704_v19, %v705_v52 }
 0x10b   : > { %v4448_v9 = vpop.f32.mrb[5].mxu0  ;;  %v699_v37 = vsel %vm468_vm0, %v697_v33, %v698_v48  ;;  %v701_v56 = vsel %vm468_vm0, %v698_v48, %v700_v24  ;;  %v708_v12 = vsel %vm581_vm1, %v705_v52, %v707_v39  ;;  %v6638_v33 = vrot.slane %v6561_v27, 1 }
 0x10c   : > { %v4449_v28 = vadd.f32 %v4448_v9, %v4447_v22  ;;  %v4450_v36 = vpop.f32.mrb[6].mxu0  ;;  %v4559_v45 = vpop.f32.mrb[4].mxu1 }
 0x10d   : > { %v4451_v63 = vpop.f32.mrb[7].mxu0  ;;  %v4560_v58 = vpop.f32.mrb[5].mxu1 }
 0x10e   : > { %v4452_v16 = vadd.f32 %v4451_v63, %v4450_v36  ;;  %v1408_v57 = vadd.f32 %v4449_v28, %v6595_v14  ;;  %v4561_v4 = vadd.f32 %v4560_v58, %v4559_v45  ;;  %v4562_v53 = vpop.f32.mrb[6].mxu1  ;;  %v777_v36 = vpack.c.bf16 %v701_v56, %v699_v37 }
 0x10f   : > { %1816 = vmatmul.mubr.bf16.gmra.mrb[112].mxu0 %v6435_v11  ;;  %v4563_v32 = vpop.f32.mrb[7].mxu1  ;;  %v5546_v11 = vld [vmem:[%s7889_s3 + $0x40] sm:$0xff]   ;;  %v714_v58 = vrot.slane %v6555_v20, 1 }
 0x110   : > { %1823 = vmatprep.mubr.bf16.mxu0 %v6489_v55  ;;  %v1411_v51 = vadd.f32 %v4452_v16, %v6595_v14  ;;  %v4564_v35 = vadd.f32 %v4563_v32, %v4562_v53  ;;  %v6614_v7 = vadd.f32 %v4561_v4, %v1408_v57  ;;  %4897 = vmatprep.subr.bf16.mxu1 %v5546_v11 }
 0x111   : > { %1977 = vmatmul.mubr.bf16.gmra.mrb[112].mxu1 %v6452_v44  ;;  %v6644_v32 = vpack.c.bf16 %v708_v12, %v706_v26  ;;  %v716_v11 = vsel %vm468_vm0, %v714_v58, %v6638_v33  ;;  %v779_v58 = vpack.c.bf16 %v6561_v27, %v6555_v20 }
 0x112   : > { %v4453_v46 = vpop.f32.mrb[8].mxu0  ;;  %1984 = vmatprep.mubr.bf16.mxu1 %v6479_v23  ;;  %v6628_v22 = vadd.f32 %v4564_v35, %v1411_v51  ;;  %4898 = vmatpush3.bf16.msra.mxu1 %v5547_v61 }
 0x113   : > { %v4454_v40 = vpop.f32.mrb[9].mxu0 }
 0x114   : > { %v4455_v38 = vadd.f32 %v4454_v40, %v4453_v46  ;;  %v4456_v1 = vpop.f32.mrb[10].mxu0  ;;  %v4565_v9 = vpop.f32.mrb[8].mxu1 }
 0x115   : > { %v4457_v43 = vpop.f32.mrb[11].mxu0  ;;  %v4566_v28 = vpop.f32.mrb[9].mxu1 }
 0x116   : > { %v4458_v10 = vadd.f32 %v4457_v43, %v4456_v1  ;;  %v1416_v44 = vadd.f32 %v4455_v38, %v6595_v14  ;;  %v4567_v31 = vadd.f32 %v4566_v28, %v4565_v9  ;;  %v4568_v16 = vpop.f32.mrb[10].mxu1  ;;  %v5548_v9 = vld [vmem:[%s7889_s3 + $0x48] sm:$0xff]  }
 0x117   : > { %1824 = vmatmul.mubr.bf16.gmra.mrb[116].mxu0 %v6457_v59  ;;  %v4569_v57 = vpop.f32.mrb[11].mxu1  ;;  %v717_v59 = vrot.slane %v6557_v34, 1  ;;  %4899 = vmatprep.subr.bf16.mxu1 %v5548_v9  ;;  %v5550_v9 = vld [vmem:[%s7889_s3 + $0x50] sm:$0xff]  }
 0x118   : > { %1831 = vmatprep.mubr.bf16.mxu0 %v6501_v6  ;;  %v1419_v63 = vadd.f32 %v4458_v10, %v6595_v14  ;;  %v4570_v48 = vadd.f32 %v4569_v57, %v4568_v16  ;;  %v6641_v51 = vadd.f32 %v4567_v31, %v1416_v44 }
 0x119   : > { %1985 = vmatmul.mubr.bf16.gmra.mrb[116].mxu1 %v6474_v30  ;;  %v718_v34 = vsel %vm468_vm0, %v6638_v33, %v717_v59 }
 0x11a   : > { %v4459_v45 = vpop.f32.mrb[12].mxu0  ;;  %1992 = vmatprep.mubr.bf16.mxu1 %v777_v36  ;;  %v6646_v35 = vadd.f32 %v4570_v48, %v1419_v63  ;;  %v780_v43 = vpack.c.bf16 %v718_v34, %v716_v11 }
 0x11b   : > { %v4460_v24 = vpop.f32.mrb[13].mxu0 }
 0x11c   : > { %v4461_v4 = vadd.f32 %v4460_v24, %v4459_v45  ;;  %v4462_v53 = vpop.f32.mrb[14].mxu0  ;;  %v4571_v38 = vpop.f32.mrb[12].mxu1 }
 0x11d   : > { %v4463_v46 = vpop.f32.mrb[15].mxu0  ;;  %v4572_v30 = vpop.f32.mrb[13].mxu1 }
 0x11e   : > { %v4464_v40 = vadd.f32 %v4463_v46, %v4462_v53  ;;  %v1424_v61 = vadd.f32 %v4461_v4, %v6595_v14  ;;  %v4573_v37 = vadd.f32 %v4572_v30, %v4571_v38  ;;  %v4574_v56 = vpop.f32.mrb[14].mxu1 }
 0x11f   : > { %1832 = vmatmul.mubr.bf16.gmra.mrb[120].mxu0 %v6479_v23  ;;  %v4575_v19 = vpop.f32.mrb[15].mxu1  ;;  %v5549_v23 = vld [vmem:[%s7889_s3 + $0x8] sm:$0xff]  }
 0x120   : > { %1839 = vmatprep.mubr.bf16.mxu0 %v6644_v32  ;;  %v1427_v1 = vadd.f32 %v4464_v40, %v6595_v14  ;;  %v4576_v39 = vadd.f32 %v4575_v19, %v4574_v56  ;;  %v6656_v44 = vadd.f32 %v4573_v37, %v1424_v61  ;;  %4900 = vmatpush3.bf16.msra.mxu1 %v5549_v23 }
 0x121   : > { %1993 = vmatmul.mubr.bf16.gmra.mrb[120].mxu1 %v6494_v13  ;;  %4901 = vmatprep.subr.bf16.mxu1 %v5550_v9 }
 0x122   : > { %v4465_v52 = vpop.f32.mrb[16].mxu0  ;;  %2000 = vmatprep.mubr.bf16.mxu1 %v780_v43  ;;  %v6665_v16 = vadd.f32 %v4576_v39, %v1427_v1 }
 0x123   : > { %v4466_v10 = vpop.f32.mrb[17].mxu0 }
 0x124   : > { %v4467_v28 = vadd.f32 %v4466_v10, %v4465_v52  ;;  %v4468_v63 = vpop.f32.mrb[18].mxu0  ;;  %v4577_v57 = vpop.f32.mrb[16].mxu1 }
 0x125   : > { %v4469_v31 = vpop.f32.mrb[19].mxu0  ;;  %v4578_v45 = vpop.f32.mrb[17].mxu1 }
 0x126   : > { %v4470_v26 = vadd.f32 %v4469_v31, %v4468_v63  ;;  %v1432_v12 = vadd.f32 %v4467_v28, %v6595_v14  ;;  %v4579_v59 = vadd.f32 %v4578_v45, %v4577_v57  ;;  %v4580_v48 = vpop.f32.mrb[18].mxu1 }
 0x127   : > { %1840 = vmatmul.mubr.bf16.gmra.mrb[124].mxu0 %v777_v36  ;;  %v4581_v24 = vpop.f32.mrb[19].mxu1 }
 0x128   : > { %5385 = vmatprep.mubr.bf16.mxu0 %v5974_v29  ;;  %v1435_v13 = vadd.f32 %v4470_v26, %v6595_v14  ;;  %v4582_v53 = vadd.f32 %v4581_v24, %v4580_v48  ;;  %v6672_v40 = vadd.f32 %v4579_v59, %v1432_v12 }
 0x129   : > { %2001 = vmatmul.mubr.bf16.gmra.mrb[124].mxu1 %v779_v58 }
 0x12a   : > { %v4471_v4 = vpop.f32.mrb[20].mxu0  ;;  %v6674_v61 = vadd.f32 %v4582_v53, %v1435_v13 }
 0x12b   : > { %v4472_v46 = vpop.f32.mrb[21].mxu0 }
 0x12c   : > { %v4473_v11 = vadd.f32 %v4472_v46, %v4471_v4  ;;  %v4474_v34 = vpop.f32.mrb[22].mxu0  ;;  %v4583_v29 = vpop.f32.mrb[20].mxu1 }
 0x12d   : > { %v4475_v36 = vpop.f32.mrb[23].mxu0  ;;  %v4584_v30 = vpop.f32.mrb[21].mxu1 }
 0x12e   : > { %v4476_v38 = vadd.f32 %v4475_v36, %v4474_v34  ;;  %v1440_v20 = vadd.f32 %v4473_v11, %v6595_v14  ;;  %v4585_v37 = vadd.f32 %v4584_v30, %v4583_v29  ;;  %v4586_v56 = vpop.f32.mrb[22].mxu1 }
 0x12f   : > { %5386 = vmatmul.mubr.bf16.vlgmr.msra.gmra.mrb[128].mxu0 %v6039_v21  ;;  %v4587_v43 = vpop.f32.mrb[23].mxu1  ;;  %v5551_v21 = vld [vmem:[%s7889_s3 + $0x10] sm:$0xff]  }
 0x130   : > { %5389 = vmatprep.mubr.bf16.mxu0 %v6126_v17  ;;  %v1443_v1 = vadd.f32 %v4476_v38, %v6595_v14  ;;  %v4588_v52 = vadd.f32 %v4587_v43, %v4586_v56  ;;  %v6680_v10 = vadd.f32 %v4585_v37, %v1440_v20  ;;  %4902 = vmatpush3.bf16.msra.mxu1 %v5551_v21 }
 0x132   : > { %v4477_v19 = vpop.f32.mrb[24].mxu0  ;;  %v6688_v63 = vadd.f32 %v4588_v52, %v1443_v1 }
 0x133   : > { %v4478_v39 = vpop.f32.mrb[25].mxu0 }
 0x134   : > { %v4479_v23 = vadd.f32 %v4478_v39, %v4477_v19  ;;  %v4480_v17 = vpop.f32.mrb[26].mxu0  ;;  %v4589_v12 = vpop.f32.mrb[24].mxu1  ;;  %v5552_v39 = vld [vmem:[%s7889_s3 + $0x58] sm:$0xff]  }
 0x135   : > { %v4481_v28 = vpop.f32.mrb[27].mxu0  ;;  %v4590_v57 = vpop.f32.mrb[25].mxu1  ;;  %4903 = vmatprep.subr.bf16.mxu1 %v5552_v39 }
 0x136   : > { %v4482_v31 = vadd.f32 %v4481_v28, %v4480_v17  ;;  %v1448_v26 = vadd.f32 %v4479_v23, %v6595_v14  ;;  %v4591_v58 = vadd.f32 %v4590_v57, %v4589_v12  ;;  %v4592_v13 = vpop.f32.mrb[26].mxu1 }
 0x137   : > { %5390 = vmatmul.mubr.bf16.gmra.mrb[132].mxu0 %v6176_v18  ;;  %v4593_v59 = vpop.f32.mrb[27].mxu1 }
 0x138   : > { %5393 = vmatprep.mubr.bf16.mxu0 %v6252_v49  ;;  %v1451_v45 = vadd.f32 %v4482_v31, %v6595_v14  ;;  %v4594_v24 = vadd.f32 %v4593_v59, %v4592_v13  ;;  %v6694_v53 = vadd.f32 %v4591_v58, %v1448_v26 }
 0x13a   : > { %v4483_v48 = vpop.f32.mrb[28].mxu0  ;;  %v6696_v36 = vadd.f32 %v4594_v24, %v1451_v45 }
 0x13b   : > { %v4484_v4 = vpop.f32.mrb[29].mxu0 }
 0x13c   : > { %v4485_v46 = vadd.f32 %v4484_v4, %v4483_v48  ;;  %v4486_v11 = vpop.f32.mrb[30].mxu0  ;;  %v4595_v20 = vpop.f32.mrb[28].mxu1 }
 0x13d   : > { %v4487_v34 = vpop.f32.mrb[31].mxu0  ;;  %v4596_v49 = vpop.f32.mrb[29].mxu1 }
 0x13e   : > { %v4488_v38 = vadd.f32 %v4487_v34, %v4486_v11  ;;  %v1456_v18 = vadd.f32 %v4485_v46, %v6595_v14  ;;  %v4597_v30 = vadd.f32 %v4596_v49, %v4595_v20  ;;  %v4598_v1 = vpop.f32.mrb[30].mxu1 }
 0x13f   : > { %5394 = vmatmul.mubr.bf16.gmra.mrb[136].mxu0 %v6307_v62  ;;  %v4599_v37 = vpop.f32.mrb[31].mxu1  ;;  %v5553_v62 = vld [vmem:[%s7889_s3 + $0x18] sm:$0xff]  }
 0x140   : > { %5397 = vmatprep.mubr.bf16.mxu0 %v6339_v2  ;;  %v1459_v29 = vadd.f32 %v4488_v38, %v6595_v14  ;;  %v4600_v43 = vadd.f32 %v4599_v37, %v4598_v1  ;;  %v6702_v52 = vadd.f32 %v4597_v30, %v1456_v18  ;;  %4904 = vmatpush3.bf16.msra.mxu1 %v5553_v62 }
 0x142   : > { %v4489_v56 = vpop.f32.mrb[32].mxu0  ;;  %v6710_v23 = vadd.f32 %v4600_v43, %v1459_v29 }
 0x143   : > { %v4490_v19 = vpop.f32.mrb[33].mxu0 }
 0x144   : > { %v4491_v9 = vadd.f32 %v4490_v19, %v4489_v56  ;;  %v4492_v2 = vpop.f32.mrb[34].mxu0  ;;  %v4601_v31 = vpop.f32.mrb[32].mxu1  ;;  %v5554_v19 = vld [vmem:[%s7889_s3 + $0x60] sm:$0xff]  }
 0x145   : > { %v4493_v21 = vpop.f32.mrb[35].mxu0  ;;  %v4602_v26 = vpop.f32.mrb[33].mxu1  ;;  %4905 = vmatprep.subr.bf16.mxu1 %v5554_v19 }
 0x146   : > { %v4494_v17 = vadd.f32 %v4493_v21, %v4492_v2  ;;  %v1464_v28 = vadd.f32 %v4491_v9, %v6595_v14  ;;  %v4603_v57 = vadd.f32 %v4602_v26, %v4601_v31  ;;  %v4604_v45 = vpop.f32.mrb[34].mxu1 }
 0x147   : > { %5398 = vmatmul.mubr.bf16.gmra.mrb[140].mxu0 %v6371_v8  ;;  %v4605_v58 = vpop.f32.mrb[35].mxu1 }
 0x148   : > { %5401 = vmatprep.mubr.bf16.mxu0 %v6395_v54  ;;  %v1467_v12 = vadd.f32 %v4494_v17, %v6595_v14  ;;  %v6716_v59 = vadd.f32 %v4603_v57, %v1464_v28  ;;  %v4606_v48 = vadd.f32 %v4605_v58, %v4604_v45 }
 0x14a   : > { %v4495_v13 = vpop.f32.mrb[36].mxu0  ;;  %v6718_v11 = vadd.f32 %v4606_v48, %v1467_v12 }
 0x14b   : > { %v4496_v24 = vpop.f32.mrb[37].mxu0 }
 0x14c   : > { %v4497_v4 = vadd.f32 %v4496_v24, %v4495_v13  ;;  %v4498_v46 = vpop.f32.mrb[38].mxu0  ;;  %v4607_v18 = vpop.f32.mrb[36].mxu1 }
 0x14d   : > { %v4499_v34 = vpop.f32.mrb[39].mxu0  ;;  %v4608_v54 = vpop.f32.mrb[37].mxu1 }
 0x14e   : > { %v4500_v38 = vadd.f32 %v4499_v34, %v4498_v46  ;;  %v1472_v8 = vadd.f32 %v4497_v4, %v6595_v14  ;;  %v4609_v49 = vadd.f32 %v4608_v54, %v4607_v18  ;;  %v4610_v29 = vpop.f32.mrb[38].mxu1 }
 0x14f   : > { %5402 = vmatmul.mubr.bf16.gmra.mrb[144].mxu0 %v6419_v50  ;;  %v4611_v30 = vpop.f32.mrb[39].mxu1  ;;  %v5555_v50 = vld [vmem:[%s7889_s3 + $0x20] sm:$0xff]  }
 0x150   : > { %5405 = vmatprep.mubr.bf16.mxu0 %v6449_v3  ;;  %v1475_v20 = vadd.f32 %v4500_v38, %v6595_v14  ;;  %v6724_v37 = vadd.f32 %v4609_v49, %v1472_v8  ;;  %v4612_v56 = vadd.f32 %v4611_v30, %v4610_v29  ;;  %4906 = vmatpush3.bf16.msra.mxu1 %v5555_v50 }
 0x152   : > { %v4501_v1 = vpop.f32.mrb[40].mxu0  ;;  %v6732_v62 = vadd.f32 %v4612_v56, %v1475_v20 }
 0x153   : > { %v4502_v43 = vpop.f32.mrb[41].mxu0 }
 0x154   : > { %v4503_v39 = vadd.f32 %v4502_v43, %v4501_v1  ;;  %v4504_v3 = vpop.f32.mrb[42].mxu0  ;;  %v4613_v17 = vpop.f32.mrb[40].mxu1  ;;  %v5556_v43 = vld [vmem:[%s7889_s3 + $0x68] sm:$0xff]  }
 0x155   : > { %v4505_v9 = vpop.f32.mrb[43].mxu0  ;;  %v4614_v28 = vpop.f32.mrb[41].mxu1  ;;  %4907 = vmatprep.subr.bf16.mxu1 %v5556_v43 }
 0x156   : > { %v4506_v2 = vadd.f32 %v4505_v9, %v4504_v3  ;;  %v1480_v21 = vadd.f32 %v4503_v39, %v6595_v14  ;;  %v4615_v26 = vadd.f32 %v4614_v28, %v4613_v17  ;;  %v4616_v12 = vpop.f32.mrb[42].mxu1 }
 0x157   : > { %5406 = vmatmul.mubr.bf16.gmra.mrb[148].mxu0 %v6471_v15  ;;  %v4617_v57 = vpop.f32.mrb[43].mxu1 }
 0x158   : > { %5409 = vmatprep.mubr.bf16.mxu0 %v6489_v55  ;;  %v1483_v31 = vadd.f32 %v4506_v2, %v6595_v14  ;;  %v6738_v58 = vadd.f32 %v4615_v26, %v1480_v21  ;;  %v4618_v13 = vadd.f32 %v4617_v57, %v4616_v12 }
 0x15a   : > { %v4507_v45 = vpop.f32.mrb[44].mxu0  ;;  %v6740_v46 = vadd.f32 %v4618_v13, %v1483_v31 }
 0x15b   : > { %v4508_v48 = vpop.f32.mrb[45].mxu0 }
 0x15c   : > { %v4509_v24 = vadd.f32 %v4508_v48, %v4507_v45  ;;  %v4510_v4 = vpop.f32.mrb[46].mxu0  ;;  %v4619_v8 = vpop.f32.mrb[44].mxu1 }
 0x15d   : > { %v4511_v34 = vpop.f32.mrb[47].mxu0  ;;  %v4620_v55 = vpop.f32.mrb[45].mxu1 }
 0x15e   : > { %v4512_v38 = vadd.f32 %v4511_v34, %v4510_v4  ;;  %v1488_v15 = vadd.f32 %v4509_v24, %v6595_v14  ;;  %v4621_v54 = vadd.f32 %v4620_v55, %v4619_v8  ;;  %v4622_v20 = vpop.f32.mrb[46].mxu1 }
 0x15f   : > { %5410 = vmatmul.mubr.bf16.gmra.mrb[152].mxu0 %v6501_v6  ;;  %v4623_v49 = vpop.f32.mrb[47].mxu1  ;;  %v5557_v6 = vld [vmem:[%s7889_s3 + $0x28] sm:$0xff]  }
 0x160   : > { %5413 = vmatprep.mubr.bf16.mxu0 %v6644_v32  ;;  %v1491_v18 = vadd.f32 %v4512_v38, %v6595_v14  ;;  %v6746_v30 = vadd.f32 %v4621_v54, %v1488_v15  ;;  %v4624_v1 = vadd.f32 %v4623_v49, %v4622_v20  ;;  %4908 = vmatpush3.bf16.msra.mxu1 %v5557_v6 }
 0x162   : > { %v4513_v29 = vpop.f32.mrb[48].mxu0  ;;  %v6754_v50 = vadd.f32 %v4624_v1, %v1491_v18  ;;  %v5558_v1 = vld [vmem:[%s7889_s3 + $0x70] sm:$0xff]  }
 0x163   : > { %v4514_v56 = vpop.f32.mrb[49].mxu0  ;;  %4909 = vmatprep.subr.bf16.mxu1 %v5558_v1 }
 0x164   : > { %v4515_v19 = vadd.f32 %v4514_v56, %v4513_v29  ;;  %v4516_v32 = vpop.f32.mrb[50].mxu0  ;;  %v4625_v2 = vpop.f32.mrb[48].mxu1  ;;  %v5559_v56 = vld [vmem:[%s7889_s3 + $0x30] sm:$0xff]  }
 0x165   : > { %v4517_v39 = vpop.f32.mrb[51].mxu0  ;;  %v4626_v21 = vpop.f32.mrb[49].mxu1  ;;  %4910 = vmatpush3.bf16.msra.mxu1 %v5559_v56 }
 0x166   : > { %v4518_v3 = vadd.f32 %v4517_v39, %v4516_v32  ;;  %v1496_v9 = vadd.f32 %v4515_v19, %v6595_v14  ;;  %v4627_v28 = vadd.f32 %v4626_v21, %v4625_v2  ;;  %v4628_v31 = vpop.f32.mrb[50].mxu1  ;;  %v5561_v21 = vld [vmem:[%s7889_s3 + $0x80] sm:$0xff]  }
 0x167   : > { %5414 = vmatmul.mubr.bf16.gmra.mrb[156].mxu0 %v781_v41  ;;  %v4629_v26 = vpop.f32.mrb[51].mxu1 }
 0x168   : > { %v1499_v17 = vadd.f32 %v4518_v3, %v6595_v14  ;;  %v6761_v57 = vadd.f32 %v4627_v28, %v1496_v9  ;;  %v4630_v45 = vadd.f32 %v4629_v26, %v4628_v31  ;;  %v5560_v3 = vld [vmem:[%s7889_s3 + $0xc0] sm:$0xff]  }
 0x169   : > { %5009 = vmatprep.subr.bf16.mxu0 %v5560_v3 }
 0x16a   : > { %v4519_v12 = vpop.f32.mrb[52].mxu0  ;;  %v6763_v4 = vadd.f32 %v4630_v45, %v1499_v17  ;;  %5010 = vmatpush3.bf16.msra.mxu0 %v5561_v21  ;;  %v5566_v21 = vld [vmem:[%s7889_s3 + $0x78] sm:$0xff]  }
 0x16b   : > { %v4520_v13 = vpop.f32.mrb[53].mxu0  ;;  %4911 = vmatprep.subr.bf16.mxu1 %v5566_v21 }
 0x16c   : > { %v4521_v48 = vadd.f32 %v4520_v13, %v4519_v12  ;;  %v4522_v24 = vpop.f32.mrb[54].mxu0  ;;  %v4631_v25 = vpop.f32.mrb[52].mxu1  ;;  %v5562_v13 = vld [vmem:[%s7889_s3 + $0xc8] sm:$0xff]  }
 0x16d   : > { %v4523_v34 = vpop.f32.mrb[55].mxu0  ;;  %v4632_v41 = vpop.f32.mrb[53].mxu1  ;;  %5011 = vmatprep.subr.bf16.mxu0 %v5562_v13 }
 0x16e   : > { %v4524_v38 = vadd.f32 %v4523_v34, %v4522_v24  ;;  %v1504_v5 = vadd.f32 %v4521_v48, %v6595_v14  ;;  %v4633_v8 = vadd.f32 %v4632_v41, %v4631_v25  ;;  %v4634_v55 = vpop.f32.mrb[54].mxu1 }
 0x16f   : > { %v4635_v18 = vpop.f32.mrb[55].mxu1 }
 0x170   : > { %v1507_v15 = vadd.f32 %v4524_v38, %v6595_v14  ;;  %v6767_v20 = vadd.f32 %v4633_v8, %v1504_v5  ;;  %v4636_v49 = vadd.f32 %v4635_v18, %v4634_v55  ;;  %v5563_v38 = vld [vmem:[%s7889_s3 + $0x88] sm:$0xff]   ;;  %v5564_v55 = vld [vmem:[%s7889_s3 + $0xd0] sm:$0xff]  }
 0x171   : > { %5012 = vmatpush3.bf16.msra.mxu0 %v5563_v38  ;;  %v5571_v38 = vld [vmem:[%s7889_s3 + $0xa0] sm:$0xff]  }
 0x172   : > { %v4525_v54 = vpop.f32.mrb[56].mxu0  ;;  %v6775_v19 = vadd.f32 %v4636_v49, %v1507_v15  ;;  %v5565_v49 = vld [vmem:[%s7889_s3 + $0x90] sm:$0xff]   ;;  %5013 = vmatprep.subr.bf16.mxu0 %v5564_v55  ;;  %v2234_v55 = vld [vmem:[#allocation2] sm:$0xff] }
 0x173   : > { %v4526_v29 = vpop.f32.mrb[57].mxu0 }
 0x174   : > { %v4527_v43 = vadd.f32 %v4526_v29, %v4525_v54  ;;  %v4528_v6 = vpop.f32.mrb[58].mxu0  ;;  %v4637_v2 = vpop.f32.mrb[56].mxu1 }
 0x175   : > { %v4529_v32 = vpop.f32.mrb[59].mxu0  ;;  %v4638_v17 = vpop.f32.mrb[57].mxu1  ;;  %5014 = vmatpush3.bf16.msra.mxu0 %v5565_v49  ;;  %v5572_v49 = vld [vmem:[%s7889_s3 + $0xe8] sm:$0xff]  }
 0x176   : > { %v4530_v39 = vadd.f32 %v4529_v32, %v4528_v6  ;;  %v1512_v9 = vadd.f32 %v4527_v43, %v6595_v14  ;;  %v4639_v31 = vadd.f32 %v4638_v17, %v4637_v2  ;;  %v4640_v26 = vpop.f32.mrb[58].mxu1  ;;  %v5569_v17 = vld [vmem:[%s7889_s3 + $0x98] sm:$0xff]  }
 0x177   : > { %v4641_v12 = vpop.f32.mrb[59].mxu1 }
 0x178   : > { %v1515_v28 = vadd.f32 %v4530_v39, %v6595_v14  ;;  %v6788_v48 = vadd.f32 %v4639_v31, %v1512_v9  ;;  %v4642_v24 = vadd.f32 %v4641_v12, %v4640_v26  ;;  %v5568_v39 = vld [vmem:[%s7889_s3 + $0xd8] sm:$0xff]  }
 0x179   : > { %5015 = vmatprep.subr.bf16.mxu0 %v5568_v39 }
 0x17a   : > { %v4531_v45 = vpop.f32.mrb[60].mxu0  ;;  %v6793_v41 = vadd.f32 %v4642_v24, %v1515_v28  ;;  %5016 = vmatpush3.bf16.msra.mxu0 %v5569_v17  ;;  %v5570_v24 = vld [vmem:[%s7889_s3 + $0xe0] sm:$0xff]  }
 0x17b   : > { %v4532_v34 = vpop.f32.mrb[61].mxu0  ;;  %5017 = vmatprep.subr.bf16.mxu0 %v5570_v24 }
 0x17c   : > { %v4533_v5 = vadd.f32 %v4532_v34, %v4531_v45  ;;  %v4534_v25 = vpop.f32.mrb[62].mxu0  ;;  %v4643_v54 = vpop.f32.mrb[60].mxu1 }
 0x17d   : > { %v4535_v15 = vpop.f32.mrb[63].mxu0  ;;  %v4644_v29 = vpop.f32.mrb[61].mxu1 }
 0x17e   : > { %v4536_v8 = vadd.f32 %v4535_v15, %v4534_v25  ;;  %v1520_v18 = vadd.f32 %v4533_v5, %v6595_v14  ;;  %v4645_v56 = vadd.f32 %v4644_v29, %v4643_v54  ;;  %v4646_v43 = vpop.f32.mrb[62].mxu1  ;;  %5018 = vmatpush3.bf16.msra.mxu0 %v5571_v38  ;;  %v2336_v29 = vrot.slane %v2234_v55, 1 }
 0x17f   : > { %v4647_v6 = vpop.f32.mrb[63].mxu1  ;;  %5019 = vmatprep.subr.bf16.mxu0 %v5572_v49 }
 0x180   : > { %v1523_v1 = vadd.f32 %v4536_v8, %v6595_v14  ;;  %v6806_v3 = vadd.f32 %v4645_v56, %v1520_v18  ;;  %v4648_v9 = vadd.f32 %v4647_v6, %v4646_v43  ;;  %v5567_v14 = vld [vmem:[%s7889_s3 + $0x38] sm:$0xff]  }
 0x181   : > { %4912 = vmatpush3.bf16.msra.mxu1 %v5567_v14 }
 0x182   : > { %v4665_v32 = vpop.f32.mrb[64].mxu0  ;;  %v6817_v26 = vadd.f32 %v4648_v9, %v1523_v1  ;;  %v2338_v9 = vsel %vm468_vm0, %v2336_v29, %v6638_v33  ;;  %v5578_v29 = vld [vmem:[%s7889_s3 + $0x100] sm:$0xff]  }
 0x183   : > { %v4666_v2 = vpop.f32.mrb[65].mxu0 }
 0x184   : > { %v4667_v28 = vadd.f32 %v4666_v2, %v4665_v32  ;;  %v4668_v31 = vpop.f32.mrb[66].mxu0  ;;  %v4777_v34 = vpop.f32.mrb[64].mxu1 }
 0x185   : > { %v4669_v12 = vpop.f32.mrb[67].mxu0  ;;  %v4778_v25 = vpop.f32.mrb[65].mxu1 }
 0x186   : > { %v1722_v45 = vadd.f32 %v4667_v28, %v6602_v0  ;;  %v4670_v13 = vadd.f32 %v4669_v12, %v4668_v31  ;;  %v4779_v15 = vadd.f32 %v4778_v25, %v4777_v34  ;;  %v4780_v8 = vpop.f32.mrb[66].mxu1  ;;  %v2236_v0 = vld [vmem:[#allocation2 + $0x10] sm:$0x3] }
 0x187   : > { %v4781_v18 = vpop.f32.mrb[67].mxu1  ;;  %v2339_v1 = vrot.slane %v2236_v0, 1  ;;  %v5574_v12 = vld [vmem:[%s7889_s3 + $0xf0] sm:$0xff]  }
 0x188   : > { %v1725_v5 = vadd.f32 %v4670_v13, %v6606_v42  ;;  %v4782_v56 = vadd.f32 %v4781_v18, %v4780_v8  ;;  %v6830_v6 = vadd.f32 %v4779_v15, %v1722_v45  ;;  %v5573_v42 = vld [vmem:[%s7889_s3 + $0xa8] sm:$0xff]   ;;  %v2594_v45 = vpack.c.bf16 %v6561_v27, %v2234_v55  ;;  %v5576_v27 = vld [vmem:[%s7889_s3 + $0x140] sm:$0xff]   ;;  %v5577_v18 = vld [vmem:[%s7889_s3 + $0xf8] sm:$0xff]  }
 0x189   : > { %v2340_v2 = vsel %vm468_vm0, %v6638_v33, %v2339_v1  ;;  %5020 = vmatpush3.bf16.msra.mxu0 %v5573_v42  ;;  %v5575_v33 = vld [vmem:[%s7889_s3 + $0xb0] sm:$0xff]   ;;  %v2448_v15 = vrot.slane %v2234_v55, 2  ;;  %v2451_v8 = vrot.slane %v2236_v0, 2  ;;  %v5579_v55 = vld [vmem:[%s7889_s3 + $0xb8] sm:$0xff]   ;;  %5121 = vmatprep.subr.bf16.mxu1 %v5576_v27 }
 0x18a   : > { %v4671_v54 = vpop.f32.mrb[68].mxu0  ;;  %v6839_v14 = vadd.f32 %v4782_v56, %v1725_v5  ;;  %v2595_v17 = vpack.c.bf16 %v2340_v2, %v2338_v9  ;;  %5021 = vmatprep.subr.bf16.mxu0 %v5574_v12 }
 0x18b   : > { %v4672_v43 = vpop.f32.mrb[69].mxu0  ;;  %v6868_v42 = vsel %vm581_vm1, %v2448_v15, %v6564_v60 }
 0x18c   : > { %v4673_v32 = vadd.f32 %v4672_v43, %v4671_v54  ;;  %v4674_v39 = vpop.f32.mrb[70].mxu0  ;;  %v4783_v13 = vpop.f32.mrb[68].mxu1  ;;  %3263 = vmatprep.mubr.bf16.mxu1 %v2595_v17 }
 0x18d   : > { %v4675_v21 = vpop.f32.mrb[71].mxu0  ;;  %v4784_v34 = vpop.f32.mrb[69].mxu1  ;;  %3264 = vmatmul.mubr.bf16.vlgmr.msra.gmra.mrb[128].mxu1 %v2594_v45  ;;  %5022 = vmatpush3.bf16.msra.mxu0 %v5575_v33 }
 0x18e   : > { %v1730_v28 = vadd.f32 %v4673_v32, %v6614_v7  ;;  %v4676_v31 = vadd.f32 %v4675_v21, %v4674_v39  ;;  %v4785_v38 = vadd.f32 %v4784_v34, %v4783_v13  ;;  %v4786_v7 = vpop.f32.mrb[70].mxu1  ;;  %5023 = vmatprep.subr.bf16.mxu0 %v5577_v18  ;;  %5122 = vmatpush3.bf16.msra.mxu1 %v5578_v29  ;;  %v5580_v29 = vld [vmem:[%s7889_s3 + $0x148] sm:$0xff]  }
 0x18f   : > { %v4787_v5 = vpop.f32.mrb[71].mxu1  ;;  %v6872_v32 = vsel %vm581_vm1, %v6564_v60, %v2451_v8  ;;  %5123 = vmatprep.subr.bf16.mxu1 %v5580_v29 }
 0x190   : > { %v1733_v24 = vadd.f32 %v4676_v31, %v6628_v22  ;;  %v4788_v54 = vadd.f32 %v4787_v5, %v4786_v7  ;;  %v6856_v49 = vadd.f32 %v4785_v38, %v1730_v28  ;;  %v2596_v2 = vpack.c.bf16 %v6872_v32, %v6868_v42 }
 0x191   : > { %5024 = vmatpush3.bf16.msra.mxu0 %v5579_v55  ;;  %v5581_v55 = vld [vmem:[%s7889_s3 + $0x108] sm:$0xff]  }
 0x192   : > { %v4677_v25 = vpop.f32.mrb[72].mxu0  ;;  %v6864_v43 = vadd.f32 %v4788_v54, %v1733_v24  ;;  %5124 = vmatpush3.bf16.msra.mxu1 %v5581_v55 }
 0x193   : > { %v4678_v22 = vpop.f32.mrb[73].mxu0 }
 0x194   : > { %v4679_v0 = vadd.f32 %v4678_v22, %v4677_v25  ;;  %v4680_v1 = vpop.f32.mrb[74].mxu0  ;;  %v4789_v21 = vpop.f32.mrb[72].mxu1 }
 0x195   : > { %v4681_v56 = vpop.f32.mrb[75].mxu0  ;;  %v4790_v28 = vpop.f32.mrb[73].mxu1 }
 0x196   : > { %v1738_v39 = vadd.f32 %v4679_v0, %v6641_v51  ;;  %v4682_v9 = vadd.f32 %v4681_v56, %v4680_v1  ;;  %v4791_v31 = vadd.f32 %v4790_v28, %v4789_v21  ;;  %v4792_v12 = vpop.f32.mrb[74].mxu1 }
 0x197   : > { %v4793_v45 = vpop.f32.mrb[75].mxu1 }
 0x198   : > { %v1741_v17 = vadd.f32 %v4682_v9, %v6646_v35  ;;  %v4794_v33 = vadd.f32 %v4793_v45, %v4792_v12  ;;  %v6878_v34 = vadd.f32 %v4791_v31, %v1738_v39 }
 0x19a   : > { %v4683_v13 = vpop.f32.mrb[76].mxu0  ;;  %v6880_v51 = vadd.f32 %v4794_v33, %v1741_v17 }
 0x19b   : > { %v4684_v24 = vpop.f32.mrb[77].mxu0 }
 0x19c   : > { %v4685_v60 = vadd.f32 %v4684_v24, %v4683_v13  ;;  %v4686_v38 = vpop.f32.mrb[78].mxu0  ;;  %v4795_v15 = vpop.f32.mrb[76].mxu1 }
 0x19d   : > { %v4687_v7 = vpop.f32.mrb[79].mxu0  ;;  %v4796_v8 = vpop.f32.mrb[77].mxu1 }
 0x19e   : > { %v1746_v5 = vadd.f32 %v4685_v60, %v6656_v44  ;;  %v4688_v25 = vadd.f32 %v4687_v7, %v4686_v38  ;;  %v4797_v27 = vadd.f32 %v4796_v8, %v4795_v15  ;;  %v4798_v18 = vpop.f32.mrb[78].mxu1 }
 0x19f   : > { %v4799_v54 = vpop.f32.mrb[79].mxu1 }
 0x1a0   : > { %v1749_v35 = vadd.f32 %v4688_v25, %v6665_v16  ;;  %v4800_v0 = vadd.f32 %v4799_v54, %v4798_v18  ;;  %v6890_v44 = vadd.f32 %v4797_v27, %v1746_v5 }
 0x1a2   : > { %v4689_v22 = vpop.f32.mrb[80].mxu0  ;;  %v6892_v9 = vadd.f32 %v4800_v0, %v1749_v35  ;;  %v5582_v0 = vld [vmem:[%s7889_s3 + $0x150] sm:$0xff]  }
 0x1a3   : > { %v4690_v1 = vpop.f32.mrb[81].mxu0  ;;  %5125 = vmatprep.subr.bf16.mxu1 %v5582_v0 }
 0x1a4   : > { %v4691_v56 = vadd.f32 %v4690_v1, %v4689_v22  ;;  %v4692_v39 = vpop.f32.mrb[82].mxu0  ;;  %v4801_v28 = vpop.f32.mrb[80].mxu1  ;;  %v5583_v1 = vld [vmem:[%s7889_s3 + $0x110] sm:$0xff]  }
 0x1a5   : > { %v4693_v16 = vpop.f32.mrb[83].mxu0  ;;  %v4802_v12 = vpop.f32.mrb[81].mxu1  ;;  %5126 = vmatpush3.bf16.msra.mxu1 %v5583_v1 }
 0x1a6   : > { %v1754_v21 = vadd.f32 %v4691_v56, %v6672_v40  ;;  %v4694_v17 = vadd.f32 %v4693_v16, %v4692_v39  ;;  %v4803_v45 = vadd.f32 %v4802_v12, %v4801_v28  ;;  %v4804_v13 = vpop.f32.mrb[82].mxu1 }
 0x1a7   : > { %v4805_v33 = vpop.f32.mrb[83].mxu1 }
 0x1a8   : > { %v1757_v31 = vadd.f32 %v4694_v17, %v6674_v61  ;;  %v4806_v60 = vadd.f32 %v4805_v33, %v4804_v13  ;;  %v6896_v7 = vadd.f32 %v4803_v45, %v1754_v21 }
 0x1aa   : > { %v4695_v24 = vpop.f32.mrb[84].mxu0  ;;  %v6898_v35 = vadd.f32 %v4806_v60, %v1757_v31 }
 0x1ab   : > { %v4696_v38 = vpop.f32.mrb[85].mxu0 }
 0x1ac   : > { %v4697_v5 = vadd.f32 %v4696_v38, %v4695_v24  ;;  %v4698_v25 = vpop.f32.mrb[86].mxu0  ;;  %v4807_v27 = vpop.f32.mrb[84].mxu1 }
 0x1ad   : > { %v4699_v15 = vpop.f32.mrb[87].mxu0  ;;  %v4808_v18 = vpop.f32.mrb[85].mxu1 }
 0x1ae   : > { %v1762_v40 = vadd.f32 %v4697_v5, %v6680_v10  ;;  %v4700_v8 = vadd.f32 %v4699_v15, %v4698_v25  ;;  %v4809_v54 = vadd.f32 %v4808_v18, %v4807_v27  ;;  %v4810_v22 = vpop.f32.mrb[86].mxu1 }
 0x1af   : > { %v4811_v29 = vpop.f32.mrb[87].mxu1 }
 0x1b0   : > { %v1765_v61 = vadd.f32 %v4700_v8, %v6688_v63  ;;  %v4812_v56 = vadd.f32 %v4811_v29, %v4810_v22  ;;  %v6908_v10 = vadd.f32 %v4809_v54, %v1762_v40 }
 0x1b2   : > { %v4701_v55 = vpop.f32.mrb[88].mxu0  ;;  %v6910_v17 = vadd.f32 %v4812_v56, %v1765_v61  ;;  %v5584_v56 = vld [vmem:[%s7889_s3 + $0x158] sm:$0xff]  }
 0x1b3   : > { %v4702_v39 = vpop.f32.mrb[89].mxu0  ;;  %5127 = vmatprep.subr.bf16.mxu1 %v5584_v56 }
 0x1b4   : > { %v4703_v16 = vadd.f32 %v4702_v39, %v4701_v55  ;;  %v4704_v21 = vpop.f32.mrb[90].mxu0  ;;  %v4813_v12 = vpop.f32.mrb[88].mxu1  ;;  %v5585_v39 = vld [vmem:[%s7889_s3 + $0x118] sm:$0xff]  }
 0x1b5   : > { %v4705_v63 = vpop.f32.mrb[91].mxu0  ;;  %v4814_v13 = vpop.f32.mrb[89].mxu1  ;;  %5128 = vmatpush3.bf16.msra.mxu1 %v5585_v39 }
 0x1b6   : > { %v1770_v28 = vadd.f32 %v4703_v16, %v6694_v53  ;;  %v4706_v31 = vadd.f32 %v4705_v63, %v4704_v21  ;;  %v4815_v33 = vadd.f32 %v4814_v13, %v4813_v12  ;;  %v4816_v24 = vpop.f32.mrb[90].mxu1 }
 0x1b7   : > { %v4817_v60 = vpop.f32.mrb[91].mxu1 }
 0x1b8   : > { %v1773_v45 = vadd.f32 %v4706_v31, %v6696_v36  ;;  %v4818_v5 = vadd.f32 %v4817_v60, %v4816_v24  ;;  %v6914_v15 = vadd.f32 %v4815_v33, %v1770_v28 }
 0x1ba   : > { %v4707_v38 = vpop.f32.mrb[92].mxu0  ;;  %v6916_v61 = vadd.f32 %v4818_v5, %v1773_v45  ;;  %v5586_v5 = vld [vmem:[%s7889_s3 + $0x1c0] sm:$0xff]  }
 0x1bb   : > { %v4708_v25 = vpop.f32.mrb[93].mxu0  ;;  %5233 = vmatprep.subr.bf16.mxu0 %v5586_v5 }
 0x1bc   : > { %v4709_v40 = vadd.f32 %v4708_v25, %v4707_v38  ;;  %v4710_v8 = vpop.f32.mrb[94].mxu0  ;;  %v4819_v54 = vpop.f32.mrb[92].mxu1 }
 0x1bd   : > { %v4711_v27 = vpop.f32.mrb[95].mxu0  ;;  %v4820_v22 = vpop.f32.mrb[93].mxu1 }
 0x1be   : > { %v1778_v53 = vadd.f32 %v4709_v40, %v6702_v52  ;;  %v4712_v18 = vadd.f32 %v4711_v27, %v4710_v8  ;;  %v4821_v29 = vadd.f32 %v4820_v22, %v4819_v54  ;;  %v4822_v55 = vpop.f32.mrb[94].mxu1 }
 0x1bf   : > { %v4823_v0 = vpop.f32.mrb[95].mxu1 }
 0x1c0   : > { %v1781_v36 = vadd.f32 %v4712_v18, %v6710_v23  ;;  %v4824_v16 = vadd.f32 %v4823_v0, %v4822_v55  ;;  %v6926_v52 = vadd.f32 %v4821_v29, %v1778_v53 }
 0x1c2   : > { %v4713_v1 = vpop.f32.mrb[96].mxu0  ;;  %v6928_v31 = vadd.f32 %v4824_v16, %v1781_v36  ;;  %v5589_v16 = vld [vmem:[%s7889_s3 + $0x120] sm:$0xff]  }
 0x1c3   : > { %v4714_v21 = vpop.f32.mrb[97].mxu0 }
 0x1c4   : > { %v4715_v63 = vadd.f32 %v4714_v21, %v4713_v1  ;;  %v4716_v28 = vpop.f32.mrb[98].mxu0  ;;  %v4825_v13 = vpop.f32.mrb[96].mxu1  ;;  %v5588_v1 = vld [vmem:[%s7889_s3 + $0x160] sm:$0xff]  }
 0x1c5   : > { %v4717_v23 = vpop.f32.mrb[99].mxu0  ;;  %v4826_v24 = vpop.f32.mrb[97].mxu1  ;;  %5129 = vmatprep.subr.bf16.mxu1 %v5588_v1 }
 0x1c6   : > { %v1786_v12 = vadd.f32 %v4715_v63, %v6716_v59  ;;  %v4718_v45 = vadd.f32 %v4717_v23, %v4716_v28  ;;  %v4827_v60 = vadd.f32 %v4826_v24, %v4825_v13  ;;  %v4828_v38 = vpop.f32.mrb[98].mxu1  ;;  %5130 = vmatpush3.bf16.msra.mxu1 %v5589_v16 }
 0x1c7   : > { %v4829_v25 = vpop.f32.mrb[99].mxu1 }
 0x1c8   : > { %v1789_v33 = vadd.f32 %v4718_v45, %v6718_v11  ;;  %v4830_v8 = vadd.f32 %v4829_v25, %v4828_v38  ;;  %v6935_v53 = vadd.f32 %v4827_v60, %v1786_v12 }
 0x1ca   : > { %v4719_v40 = vpop.f32.mrb[100].mxu0  ;;  %v6937_v36 = vadd.f32 %v4830_v8, %v1789_v33 }
 0x1cb   : > { %v4720_v27 = vpop.f32.mrb[101].mxu0 }
 0x1cc   : > { %v4721_v18 = vadd.f32 %v4720_v27, %v4719_v40  ;;  %v4722_v59 = vpop.f32.mrb[102].mxu0  ;;  %v4831_v29 = vpop.f32.mrb[100].mxu1 }
 0x1cd   : > { %v4723_v54 = vpop.f32.mrb[103].mxu0  ;;  %v4832_v0 = vpop.f32.mrb[101].mxu1 }
 0x1ce   : > { %v1794_v11 = vadd.f32 %v4721_v18, %v6724_v37  ;;  %v4724_v22 = vadd.f32 %v4723_v54, %v4722_v59  ;;  %v4833_v56 = vadd.f32 %v4832_v0, %v4831_v29  ;;  %v4834_v39 = vpop.f32.mrb[102].mxu1 }
 0x1cf   : > { %v4835_v21 = vpop.f32.mrb[103].mxu1 }
 0x1d0   : > { %v1797_v55 = vadd.f32 %v4724_v22, %v6732_v62  ;;  %v4836_v28 = vadd.f32 %v4835_v21, %v4834_v39  ;;  %v6947_v23 = vadd.f32 %v4833_v56, %v1794_v11  ;;  %v5592_v39 = vld [vmem:[%s7889_s3 + $0x168] sm:$0xff]  }
 0x1d1   : > { %5131 = vmatprep.subr.bf16.mxu1 %v5592_v39 }
 0x1d2   : > { %v4725_v63 = vpop.f32.mrb[104].mxu0  ;;  %v6949_v13 = vadd.f32 %v4836_v28, %v1797_v55 }
 0x1d3   : > { %v4726_v37 = vpop.f32.mrb[105].mxu0 }
 0x1d4   : > { %v4727_v62 = vadd.f32 %v4726_v37, %v4725_v63  ;;  %v4728_v12 = vpop.f32.mrb[106].mxu0  ;;  %v4837_v60 = vpop.f32.mrb[104].mxu1  ;;  %v5593_v63 = vld [vmem:[%s7889_s3 + $0x128] sm:$0xff]  }
 0x1d5   : > { %v4729_v45 = vpop.f32.mrb[107].mxu0  ;;  %v4838_v5 = vpop.f32.mrb[105].mxu1  ;;  %5132 = vmatpush3.bf16.msra.mxu1 %v5593_v63 }
 0x1d6   : > { %v1802_v33 = vadd.f32 %v4727_v62, %v6738_v58  ;;  %v4730_v24 = vadd.f32 %v4729_v45, %v4728_v12  ;;  %v4839_v25 = vadd.f32 %v4838_v5, %v4837_v60  ;;  %v4840_v40 = vpop.f32.mrb[106].mxu1 }
 0x1d7   : > { %v4841_v8 = vpop.f32.mrb[107].mxu1 }
 0x1d8   : > { %v1805_v38 = vadd.f32 %v4730_v24, %v6740_v46  ;;  %v4842_v18 = vadd.f32 %v4841_v8, %v4840_v40  ;;  %v6953_v54 = vadd.f32 %v4839_v25, %v1802_v33 }
 0x1da   : > { %v4731_v27 = vpop.f32.mrb[108].mxu0  ;;  %v6955_v55 = vadd.f32 %v4842_v18, %v1805_v38 }
 0x1db   : > { %v4732_v59 = vpop.f32.mrb[109].mxu0 }
 0x1dc   : > { %v4733_v11 = vadd.f32 %v4732_v59, %v4731_v27  ;;  %v4734_v22 = vpop.f32.mrb[110].mxu0  ;;  %v4843_v1 = vpop.f32.mrb[108].mxu1 }
 0x1dd   : > { %v4735_v29 = vpop.f32.mrb[111].mxu0  ;;  %v4844_v56 = vpop.f32.mrb[109].mxu1 }
 0x1de   : > { %v1810_v58 = vadd.f32 %v4733_v11, %v6746_v30  ;;  %v4736_v0 = vadd.f32 %v4735_v29, %v4734_v22  ;;  %v4845_v16 = vadd.f32 %v4844_v56, %v4843_v1  ;;  %v4846_v21 = vpop.f32.mrb[110].mxu1 }
 0x1df   : > { %v4847_v28 = vpop.f32.mrb[111].mxu1 }
 0x1e0   : > { %v1813_v46 = vadd.f32 %v4736_v0, %v6754_v50  ;;  %v4848_v62 = vadd.f32 %v4847_v28, %v4846_v21  ;;  %v6965_v12 = vadd.f32 %v4845_v16, %v1810_v58  ;;  %v5596_v21 = vld [vmem:[%s7889_s3 + $0x170] sm:$0xff]  }
 0x1e1   : > { %5133 = vmatprep.subr.bf16.mxu1 %v5596_v21 }
 0x1e2   : > { %v4737_v37 = vpop.f32.mrb[112].mxu0  ;;  %v6967_v24 = vadd.f32 %v4848_v62, %v1813_v46 }
 0x1e3   : > { %v4738_v30 = vpop.f32.mrb[113].mxu0 }
 0x1e4   : > { %v4739_v50 = vadd.f32 %v4738_v30, %v4737_v37  ;;  %v4740_v45 = vpop.f32.mrb[114].mxu0  ;;  %v4849_v5 = vpop.f32.mrb[112].mxu1  ;;  %v5597_v37 = vld [vmem:[%s7889_s3 + $0x130] sm:$0xff]  }
 0x1e5   : > { %v4741_v33 = vpop.f32.mrb[115].mxu0  ;;  %v4850_v40 = vpop.f32.mrb[113].mxu1  ;;  %5134 = vmatpush3.bf16.msra.mxu1 %v5597_v37 }
 0x1e6   : > { %v1818_v60 = vadd.f32 %v4739_v50, %v6761_v57  ;;  %v4742_v38 = vadd.f32 %v4741_v33, %v4740_v45  ;;  %v4851_v8 = vadd.f32 %v4850_v40, %v4849_v5  ;;  %v4852_v27 = vpop.f32.mrb[114].mxu1 }
 0x1e7   : > { %v4853_v18 = vpop.f32.mrb[115].mxu1 }
 0x1e8   : > { %v1821_v25 = vadd.f32 %v4742_v38, %v6763_v4  ;;  %v4854_v11 = vadd.f32 %v4853_v18, %v4852_v27  ;;  %v6971_v29 = vadd.f32 %v4851_v8, %v1818_v60 }
 0x1ea   : > { %v4743_v59 = vpop.f32.mrb[116].mxu0  ;;  %v6973_v46 = vadd.f32 %v4854_v11, %v1821_v25 }
 0x1eb   : > { %v4744_v22 = vpop.f32.mrb[117].mxu0 }
 0x1ec   : > { %v4745_v58 = vadd.f32 %v4744_v22, %v4743_v59  ;;  %v4746_v0 = vpop.f32.mrb[118].mxu0  ;;  %v4855_v39 = vpop.f32.mrb[116].mxu1 }
 0x1ed   : > { %v4747_v1 = vpop.f32.mrb[119].mxu0  ;;  %v4856_v16 = vpop.f32.mrb[117].mxu1 }
 0x1ee   : > { %v1826_v57 = vadd.f32 %v4745_v58, %v6767_v20  ;;  %v4748_v56 = vadd.f32 %v4747_v1, %v4746_v0  ;;  %v4857_v63 = vadd.f32 %v4856_v16, %v4855_v39  ;;  %v4858_v28 = vpop.f32.mrb[118].mxu1 }
 0x1ef   : > { %v4859_v62 = vpop.f32.mrb[119].mxu1 }
 0x1f0   : > { %v1829_v4 = vadd.f32 %v4748_v56, %v6775_v19  ;;  %v4860_v50 = vadd.f32 %v4859_v62, %v4858_v28  ;;  %v6983_v45 = vadd.f32 %v4857_v63, %v1826_v57  ;;  %v5600_v28 = vld [vmem:[%s7889_s3 + $0x178] sm:$0xff]  }
 0x1f1   : > { %5135 = vmatprep.subr.bf16.mxu1 %v5600_v28 }
 0x1f2   : > { %v4749_v30 = vpop.f32.mrb[120].mxu0  ;;  %v6985_v38 = vadd.f32 %v4860_v50, %v1829_v4 }
 0x1f3   : > { %v4750_v20 = vpop.f32.mrb[121].mxu0 }
 0x1f4   : > { %v4751_v19 = vadd.f32 %v4750_v20, %v4749_v30  ;;  %v4752_v33 = vpop.f32.mrb[122].mxu0  ;;  %v4861_v40 = vpop.f32.mrb[120].mxu1  ;;  %v5601_v30 = vld [vmem:[%s7889_s3 + $0x138] sm:$0xff]  }
 0x1f5   : > { %v4753_v60 = vpop.f32.mrb[123].mxu0  ;;  %v4862_v27 = vpop.f32.mrb[121].mxu1  ;;  %5136 = vmatpush3.bf16.msra.mxu1 %v5601_v30 }
 0x1f6   : > { %v1834_v5 = vadd.f32 %v4751_v19, %v6788_v48  ;;  %v4754_v25 = vadd.f32 %v4753_v60, %v4752_v33  ;;  %v4863_v18 = vadd.f32 %v4862_v27, %v4861_v40  ;;  %v4864_v59 = vpop.f32.mrb[122].mxu1 }
 0x1f7   : > { %v4865_v11 = vpop.f32.mrb[123].mxu1 }
 0x1f8   : > { %v1837_v8 = vadd.f32 %v4754_v25, %v6793_v41  ;;  %v4866_v58 = vadd.f32 %v4865_v11, %v4864_v59  ;;  %v6989_v1 = vadd.f32 %v4863_v18, %v1834_v5 }
 0x1fa   : > { %v4755_v22 = vpop.f32.mrb[124].mxu0  ;;  %v6991_v4 = vadd.f32 %v4866_v58, %v1837_v8 }
 0x1fb   : > { %v4756_v0 = vpop.f32.mrb[125].mxu0 }
 0x1fc   : > { %v4757_v57 = vadd.f32 %v4756_v0, %v4755_v22  ;;  %v4758_v56 = vpop.f32.mrb[126].mxu0  ;;  %v4867_v21 = vpop.f32.mrb[124].mxu1 }
 0x1fd   : > { %v4759_v39 = vpop.f32.mrb[127].mxu0  ;;  %v4868_v63 = vpop.f32.mrb[125].mxu1 }
 0x1fe   : > { %v1842_v48 = vadd.f32 %v4757_v57, %v6806_v3  ;;  %v4760_v16 = vadd.f32 %v4759_v39, %v4758_v56  ;;  %v4869_v37 = vadd.f32 %v4868_v63, %v4867_v21  ;;  %v4870_v62 = vpop.f32.mrb[126].mxu1 }
 0x1ff   : > { %v4871_v50 = vpop.f32.mrb[127].mxu1 }
 0x200   : > { %v1845_v41 = vadd.f32 %v4760_v16, %v6817_v26  ;;  %v4872_v19 = vadd.f32 %v4871_v50, %v4870_v62  ;;  %v7002_v60 = vadd.f32 %v4869_v37, %v1842_v48 }
 0x202   : > { %v5387_v20 = vpop.f32.mrb[128].mxu0  ;;  %v7006_v27 = vadd.f32 %v4872_v19, %v1845_v41 }
 0x203   : > { %v2052_v3 = vadd.f32 %v5387_v20, %v6856_v49  ;;  %v2043_v33 = vpop.f32.mrb[129].mxu0 }
 0x204   : > { %v2044_v26 = vadd.f32 %v2043_v33, %v6830_v6  ;;  %v5388_v5 = vpop.f32.mrb[130].mxu0 }
 0x205   : > { %v2172_v25 = vmax.f32 %v2052_v3, 0.0  ;;  %v2055_v40 = vadd.f32 %v5388_v5, %v6864_v43  ;;  %v2046_v8 = vpop.f32.mrb[131].mxu0  ;;  %v7032_v5 = vld [vmem:[%s7889_s3 + $0x200] sm:$0xff]  }
 0x206   : > { %v2170_v18 = vmax.f32 %v2044_v26, 0.0  ;;  %v2047_v59 = vadd.f32 %v2046_v8, %v6839_v14  ;;  %v5587_v26 = vld [vmem:[%s7889_s3 + $0x180] sm:$0xff]   ;;  %5417 = vmatprep.subr.bf16.mxu1 %v7032_v5 }
 0x207   : > { %2204 = vst [vmem:[#allocation2 + $0x31] sm:$0xff] %v2172_v25  ;;  %v2173_v11 = vmax.f32 %v2055_v40, 0.0 }
 0x208   : > { %2202 = vst [vmem:[#allocation2 + $0x19] sm:$0xff] %v2170_v18  ;;  %v2171_v49 = vmax.f32 %v2047_v59, 0.0 }
 0x209   : > { %2205 = vst [vmem:[#allocation2 + $0x39] sm:$0xff] %v2173_v11  ;;  %v5590_v11 = vld [vmem:[%s7889_s3 + $0x1c8] sm:$0xff]  }
 0x20a   : > { %2203 = vst [vmem:[#allocation2 + $0x21] sm:$0xff] %v2171_v49  ;;  %v5391_v22 = vpop.f32.mrb[132].mxu0 }
 0x20b   : > { %v2068_v58 = vadd.f32 %v5391_v22, %v6890_v44  ;;  %v2059_v6 = vpop.f32.mrb[133].mxu0 }
 0x20c   : > { %v2060_v0 = vadd.f32 %v2059_v6, %v6878_v34  ;;  %v5392_v57 = vpop.f32.mrb[134].mxu0 }
 0x20d   : > { %v2176_v43 = vmax.f32 %v2068_v58, 0.0  ;;  %v2071_v56 = vadd.f32 %v5392_v57, %v6892_v9  ;;  %v2062_v39 = vpop.f32.mrb[135].mxu0 }
 0x20e   : > { %v2174_v48 = vmax.f32 %v2060_v0, 0.0  ;;  %v2063_v14 = vadd.f32 %v2062_v39, %v6880_v51  ;;  %v7013_v16 = vld [vmem:[#allocation2 + $0x30] sm:$0xff] }
 0x20f   : > { %2208 = vst [vmem:[#allocation2 + $0x61] sm:$0xff] %v2176_v43  ;;  %v2177_v21 = vmax.f32 %v2071_v56, 0.0  ;;  %v2237_v41 = vld [vmem:[#allocation2 + $0x18] sm:$0xff]  ;;  %v2346_v44 = vrot.slane %v7013_v16, 1 }
 0x210   : > { %2206 = vst [vmem:[#allocation2 + $0x49] sm:$0xff] %v2174_v48  ;;  %v2175_v63 = vmax.f32 %v2063_v14, 0.0  ;;  %v7015_v28 = vld [vmem:[#allocation2 + $0x38] sm:$0xff]  ;;  %v7018_v34 = vld [vmem:[#allocation2 + $0x40] sm:$0x3]  ;;  %v2341_v9 = vrot.slane %v2237_v41, 1 }
 0x211   : > { %2209 = vst [vmem:[#allocation2 + $0x69] sm:$0xff] %v2177_v21  ;;  %v2238_v37 = vld [vmem:[#allocation2 + $0x20] sm:$0xff]  ;;  %v2347_v62 = vrot.slane %v7015_v28, 1  ;;  %v2239_v30 = vld [vmem:[#allocation2 + $0x28] sm:$0x3]  ;;  %v2349_v51 = vrot.slane %v7018_v34, 1  ;;  %v7024_v3 = vpack.c.bf16 %v7015_v28, %v7013_v16 }
 0x212   : > { %2207 = vst [vmem:[#allocation2 + $0x51] sm:$0xff] %v2175_v63  ;;  %v5395_v50 = vpop.f32.mrb[136].mxu0  ;;  %v2342_v20 = vrot.slane %v2238_v37, 1  ;;  %v2597_v19 = vpack.c.bf16 %v2238_v37, %v2237_v41  ;;  %v2344_v33 = vrot.slane %v2239_v30, 1  ;;  %v2454_v8 = vrot.slane %v2238_v37, 2 }
 0x213   : > { %v2084_v25 = vadd.f32 %v5395_v50, %v6908_v10  ;;  %v2075_v40 = vpop.f32.mrb[137].mxu0  ;;  %v2348_v18 = vsel %vm468_vm0, %v2346_v44, %v2347_v62  ;;  %v2350_v59 = vsel %vm468_vm0, %v2347_v62, %v2349_v51  ;;  %v2456_v0 = vrot.slane %v2239_v30, 2  ;;  %v5595_v51 = vld [vmem:[%s7889_s3 + $0x190] sm:$0xff]  }
 0x214   : > { %v2076_v49 = vadd.f32 %v2075_v40, %v6896_v7  ;;  %v5396_v22 = vpop.f32.mrb[138].mxu0  ;;  %3424 = vmatprep.mubr.bf16.mxu0 %v2597_v19  ;;  %v2343_v58 = vsel %vm468_vm0, %v2341_v9, %v2342_v20  ;;  %v2345_v6 = vsel %vm468_vm0, %v2342_v20, %v2344_v33  ;;  %v2453_v39 = vrot.slane %v2237_v41, 2 }
 0x215   : > { %v2180_v10 = vmax.f32 %v2084_v25, 0.0  ;;  %v2087_v57 = vadd.f32 %v5396_v22, %v6910_v17  ;;  %v2078_v43 = vpop.f32.mrb[139].mxu0  ;;  %3425 = vmatmul.mubr.bf16.vlgmr.msra.gmra.mrb[160].mxu0 %v2596_v2  ;;  %v7047_v56 = vpack.c.bf16 %v2345_v6, %v2343_v58  ;;  %v5591_v17 = vld [vmem:[%s7889_s3 + $0x188] sm:$0xff]   ;;  %v7056_v42 = vpack.c.bf16 %v2350_v59, %v2348_v18  ;;  %v5594_v2 = vld [vmem:[%s7889_s3 + $0x1d0] sm:$0xff]   ;;  %v5598_v25 = vld [vmem:[%s7889_s3 + $0x1d8] sm:$0xff]  }
 0x216   : > { %v2178_v7 = vmax.f32 %v2076_v49, 0.0  ;;  %v2079_v48 = vadd.f32 %v2078_v43, %v6898_v35  ;;  %3432 = vmatprep.mubr.bf16.mxu0 %v7024_v3  ;;  %5234 = vmatpush3.bf16.msra.mxu0 %v5587_v26  ;;  %v2455_v21 = vsel %vm581_vm1, %v2453_v39, %v2454_v8  ;;  %v2457_v41 = vsel %vm581_vm1, %v2454_v8, %v2456_v0 }
 0x217   : > { %2212 = vst [vmem:[#allocation2 + $0x91] sm:$0xff] %v2180_v10  ;;  %v2181_v14 = vmax.f32 %v2087_v57, 0.0  ;;  %3271 = vmatprep.mubr.bf16.mxu1 %v7047_v56  ;;  %v7058_v32 = vld [vmem:[#allocation2 + $0x48] sm:$0xff]  ;;  %5235 = vmatprep.subr.bf16.mxu0 %v5590_v11  ;;  %v2459_v50 = vrot.slane %v7015_v28, 2  ;;  %v7078_v33 = vpack.c.bf16 %v2457_v41, %v2455_v21  ;;  %v2461_v26 = vrot.slane %v7018_v34, 2  ;;  %v7106_v57 = vld [vmem:[#allocation2 + $0x60] sm:$0xff] }
 0x218   : > { %2210 = vst [vmem:[#allocation2 + $0x79] sm:$0xff] %v2178_v7  ;;  %v2179_v35 = vmax.f32 %v2079_v48, 0.0  ;;  %3272 = vmatmul.mubr.bf16.gmra.mrb[132].mxu1 %v2597_v19  ;;  %v2351_v9 = vrot.slane %v7058_v32, 1  ;;  %v2458_v59 = vrot.slane %v7013_v16, 2  ;;  %v7094_v22 = vld [vmem:[#allocation2 + $0x68] sm:$0xff]  ;;  %v5599_v16 = vld [vmem:[%s7889_s3 + $0x198] sm:$0xff]  }
 0x219   : > { %2213 = vst [vmem:[#allocation2 + $0x99] sm:$0xff] %v2181_v14  ;;  %3279 = vmatprep.mubr.bf16.mxu1 %v7056_v42  ;;  %v7066_v63 = vld [vmem:[#allocation2 + $0x50] sm:$0xff]  ;;  %v7068_v44 = vld [vmem:[#allocation2 + $0x58] sm:$0x3]  ;;  %v2462_v7 = vsel %vm581_vm1, %v2459_v50, %v2461_v26  ;;  %v2357_v39 = vrot.slane %v7094_v22, 1  ;;  %v2356_v14 = vrot.slane %v7106_v57, 1 }
 0x21a   : > { %2211 = vst [vmem:[#allocation2 + $0x81] sm:$0xff] %v2179_v35  ;;  %v5399_v37 = vpop.f32.mrb[140].mxu0  ;;  %v2352_v62 = vrot.slane %v7066_v63, 1  ;;  %v2354_v30 = vrot.slane %v7068_v44, 1  ;;  %5236 = vmatpush3.bf16.msra.mxu0 %v5591_v17  ;;  %v7087_v18 = vpack.c.bf16 %v7066_v63, %v7058_v32  ;;  %v2460_v10 = vsel %vm581_vm1, %v2458_v59, %v2459_v50 }
 0x21b   : > { %v2100_v20 = vadd.f32 %v5399_v37, %v6926_v52  ;;  %v2091_v19 = vpop.f32.mrb[141].mxu0  ;;  %5237 = vmatprep.subr.bf16.mxu0 %v5594_v2  ;;  %v5603_v2 = vld [vmem:[%s7889_s3 + $0x1a0] sm:$0xff]   ;;  %v2464_v35 = vrot.slane %v7066_v63, 2  ;;  %v7122_v37 = vpack.c.bf16 %v2462_v7, %v2460_v10  ;;  %v2358_v50 = vsel %vm468_vm0, %v2356_v14, %v2357_v39 }
 0x21c   : > { %v2092_v40 = vadd.f32 %v2091_v19, %v6914_v15  ;;  %v5400_v8 = vpop.f32.mrb[142].mxu0  ;;  %v2353_v28 = vsel %vm468_vm0, %v2351_v9, %v2352_v62  ;;  %v2355_v52 = vsel %vm468_vm0, %v2352_v62, %v2354_v30  ;;  %v7096_v15 = vld [vmem:[#allocation2 + $0x70] sm:$0x3]  ;;  %v7126_v9 = vpack.c.bf16 %v7094_v22, %v7106_v57  ;;  %v5604_v62 = vld [vmem:[%s7889_s3 + $0x1e8] sm:$0xff]  }
 0x21d   : > { %v2184_v11 = vmax.f32 %v2100_v20, 0.0  ;;  %v2103_v34 = vadd.f32 %v5400_v8, %v6928_v31  ;;  %v2094_v49 = vpop.f32.mrb[143].mxu0  ;;  %3433 = vmatmul.mubr.bf16.gmra.mrb[164].mxu0 %v7078_v33  ;;  %v7103_v31 = vpack.c.bf16 %v2355_v52, %v2353_v28  ;;  %v2359_v48 = vrot.slane %v7096_v15, 1 }
 0x21e   : > { %v2182_v58 = vmax.f32 %v2092_v40, 0.0  ;;  %v2095_v6 = vadd.f32 %v2094_v49, %v6916_v61  ;;  %3440 = vmatprep.mubr.bf16.mxu0 %v7087_v18  ;;  %5238 = vmatpush3.bf16.msra.mxu0 %v5595_v51  ;;  %v5602_v61 = vld [vmem:[%s7889_s3 + $0x1e0] sm:$0xff]   ;;  %v2463_v20 = vrot.slane %v7058_v32, 2  ;;  %v5605_v32 = vld [vmem:[%s7889_s3 + $0x1a8] sm:$0xff]   ;;  %v2469_v10 = vrot.slane %v7094_v22, 2 }
 0x21f   : > { %2216 = vst [vmem:[#allocation2 + $0xc1] sm:$0xff] %v2184_v11  ;;  %v2185_v0 = vmax.f32 %v2103_v34, 0.0  ;;  %5239 = vmatprep.subr.bf16.mxu0 %v5598_v25  ;;  %v2360_v63 = vsel %vm468_vm0, %v2357_v39, %v2359_v48  ;;  %v7150_v59 = vld [vmem:[#allocation2 + $0x78] sm:$0xff]  ;;  %v2471_v39 = vrot.slane %v7096_v15, 2 }
 0x220   : > { %2214 = vst [vmem:[#allocation2 + $0xa9] sm:$0xff] %v2182_v58  ;;  %v2183_v43 = vmax.f32 %v2095_v6, 0.0  ;;  %3280 = vmatmul.mubr.bf16.gmra.mrb[136].mxu1 %v7024_v3  ;;  %v2465_v52 = vsel %vm581_vm1, %v2463_v20, %v2464_v35  ;;  %v5609_v48 = vld [vmem:[%s7889_s3 + $0x1f8] sm:$0xff]  }
 0x221   : > { %2217 = vst [vmem:[#allocation2 + $0xc9] sm:$0xff] %v2185_v0  ;;  %3287 = vmatprep.mubr.bf16.mxu1 %v7103_v31  ;;  %v7138_v40 = vld [vmem:[#allocation2 + $0x80] sm:$0xff]  ;;  %v7140_v8 = vld [vmem:[#allocation2 + $0x88] sm:$0x3]  ;;  %v5607_v0 = vld [vmem:[%s7889_s3 + $0x1b0] sm:$0xff]  }
 0x222   : > { %2215 = vst [vmem:[#allocation2 + $0xb1] sm:$0xff] %v2183_v43  ;;  %v5403_v17 = vpop.f32.mrb[144].mxu0  ;;  %5240 = vmatpush3.bf16.msra.mxu0 %v5599_v16  ;;  %v2362_v49 = vrot.slane %v7138_v40, 1  ;;  %v2364_v58 = vrot.slane %v7140_v8, 1  ;;  %v2361_v16 = vrot.slane %v7150_v59, 1 }
 0x223   : > { %v2116_v21 = vadd.f32 %v5403_v17, %v6947_v23  ;;  %v2107_v41 = vpop.f32.mrb[145].mxu0  ;;  %5241 = vmatprep.subr.bf16.mxu0 %v5602_v61  ;;  %v2466_v23 = vrot.slane %v7068_v44, 2 }
 0x224   : > { %v2108_v30 = vadd.f32 %v2107_v41, %v6935_v53  ;;  %v5404_v51 = vpop.f32.mrb[146].mxu0  ;;  %v2363_v22 = vsel %vm468_vm0, %v2361_v16, %v2362_v49 }
 0x225   : > { %v2188_v19 = vmax.f32 %v2116_v21, 0.0  ;;  %v2119_v26 = vadd.f32 %v5404_v51, %v6949_v13  ;;  %v2110_v25 = vpop.f32.mrb[147].mxu0  ;;  %3441 = vmatmul.mubr.bf16.gmra.mrb[168].mxu0 %v7122_v37  ;;  %v7147_v13 = vpack.c.bf16 %v2360_v63, %v2358_v50  ;;  %v2467_v34 = vsel %vm581_vm1, %v2464_v35, %v2466_v23  ;;  %v7194_v23 = vld [vmem:[#allocation2 + $0x90] sm:$0xff] }
 0x226   : > { %v2186_v53 = vmax.f32 %v2108_v30, 0.0  ;;  %v2111_v28 = vadd.f32 %v2110_v25, %v6937_v36  ;;  %3448 = vmatprep.mubr.bf16.mxu0 %v7126_v9  ;;  %5242 = vmatpush3.bf16.msra.mxu0 %v5603_v2  ;;  %v5606_v36 = vld [vmem:[%s7889_s3 + $0x1f0] sm:$0xff]   ;;  %v7166_v7 = vpack.c.bf16 %v2467_v34, %v2465_v52  ;;  %v7175_v2 = vpack.c.bf16 %v7138_v40, %v7150_v59 }
 0x227   : > { %2220 = vst [vmem:[#allocation2 + $0xf1] sm:$0xff] %v2188_v19  ;;  %v2189_v44 = vmax.f32 %v2119_v26, 0.0  ;;  %5243 = vmatprep.subr.bf16.mxu0 %v5604_v62  ;;  %v2468_v35 = vrot.slane %v7106_v57, 2  ;;  %v7182_v62 = vld [vmem:[#allocation2 + $0x98] sm:$0xff] }
 0x228   : > { %2218 = vst [vmem:[#allocation2 + $0xd9] sm:$0xff] %v2186_v53  ;;  %v2187_v11 = vmax.f32 %v2111_v28, 0.0  ;;  %3288 = vmatmul.mubr.bf16.gmra.mrb[140].mxu1 %v7087_v18  ;;  %v5610_v57 = vld [vmem:[%s7889_s3 + $0x1b8] sm:$0xff]   ;;  %v2367_v19 = vrot.slane %v7182_v62, 1  ;;  %v2366_v53 = vrot.slane %v7194_v23, 1  ;;  %v2474_v28 = vrot.slane %v7138_v40, 2 }
 0x229   : > { %2221 = vst [vmem:[#allocation2 + $0xf9] sm:$0xff] %v2189_v44  ;;  %3295 = vmatprep.mubr.bf16.mxu1 %v7147_v13  ;;  %v2470_v63 = vsel %vm581_vm1, %v2468_v35, %v2469_v10  ;;  %v2473_v40 = vrot.slane %v7150_v59, 2  ;;  %v2479_v35 = vrot.slane %v7182_v62, 2 }
 0x22a   : > { %2219 = vst [vmem:[#allocation2 + $0xe1] sm:$0xff] %v2187_v11  ;;  %v5407_v6 = vpop.f32.mrb[148].mxu0  ;;  %5244 = vmatpush3.bf16.msra.mxu0 %v5605_v32 }
 0x22b   : > { %v2132_v61 = vadd.f32 %v5407_v6, %v6965_v12  ;;  %v2123_v43 = vpop.f32.mrb[149].mxu0  ;;  %5245 = vmatprep.subr.bf16.mxu0 %v5606_v36  ;;  %v2365_v12 = vsel %vm468_vm0, %v2362_v49, %v2364_v58  ;;  %v7208_v36 = vpack.c.bf16 %v7182_v62, %v7194_v23  ;;  %v2368_v49 = vsel %vm468_vm0, %v2366_v53, %v2367_v19 }
 0x22c   : > { %v2124_v17 = vadd.f32 %v2123_v43, %v6953_v54  ;;  %v5408_v14 = vpop.f32.mrb[150].mxu0  ;;  %v7184_v54 = vld [vmem:[#allocation2 + $0xa0] sm:$0x3]  ;;  %v2476_v6 = vrot.slane %v7140_v8, 2  ;;  %v2475_v59 = vsel %vm581_vm1, %v2473_v40, %v2474_v28  ;;  %v2478_v62 = vrot.slane %v7194_v23, 2 }
 0x22d   : > { %v2192_v21 = vmax.f32 %v2132_v61, 0.0  ;;  %v2135_v15 = vadd.f32 %v5408_v14, %v6967_v24  ;;  %v2126_v41 = vpop.f32.mrb[151].mxu0  ;;  %3449 = vmatmul.mubr.bf16.gmra.mrb[172].mxu0 %v7166_v7  ;;  %v7191_v24 = vpack.c.bf16 %v2365_v12, %v2363_v22  ;;  %v2369_v26 = vrot.slane %v7184_v54, 1  ;;  %v7219_v61 = vld [vmem:[#allocation2 + $0xb8] sm:$0x3] }
 0x22e   : > { %v2190_v30 = vmax.f32 %v2124_v17, 0.0  ;;  %v2127_v51 = vadd.f32 %v2126_v41, %v6955_v55  ;;  %3456 = vmatprep.mubr.bf16.mxu0 %v7175_v2  ;;  %5246 = vmatpush3.bf16.msra.mxu0 %v5607_v0  ;;  %v2472_v55 = vsel %vm581_vm1, %v2469_v10, %v2471_v39  ;;  %v7217_v10 = vld [vmem:[#allocation2 + $0xb0] sm:$0xff]  ;;  %v2477_v17 = vsel %vm581_vm1, %v2474_v28, %v2476_v6 }
 0x22f   : > { %2224 = vst [vmem:[#allocation2 + $0x121] sm:$0xff] %v2192_v21  ;;  %v2193_v50 = vmax.f32 %v2135_v15, 0.0  ;;  %5247 = vmatprep.subr.bf16.mxu0 %v5609_v48  ;;  %v7204_v52 = vpack.c.bf16 %v2472_v55, %v2470_v63  ;;  %v2370_v58 = vsel %vm468_vm0, %v2367_v19, %v2369_v26  ;;  %v7226_v48 = vld [vmem:[#allocation2 + $0xa8] sm:$0xff]  ;;  %v2372_v14 = vrot.slane %v7217_v10, 1 }
 0x230   : > { %2222 = vst [vmem:[#allocation2 + $0x109] sm:$0xff] %v2190_v30  ;;  %v2191_v20 = vmax.f32 %v2127_v51, 0.0  ;;  %3296 = vmatmul.mubr.bf16.gmra.mrb[144].mxu1 %v7126_v9  ;;  %v7223_v8 = vpack.c.bf16 %v2370_v58, %v2368_v49  ;;  %v2371_v12 = vrot.slane %v7226_v48, 1  ;;  %v7236_v41 = vpack.c.bf16 %v2477_v17, %v2475_v59 }
 0x231   : > { %2225 = vst [vmem:[#allocation2 + $0x129] sm:$0xff] %v2193_v50  ;;  %3303 = vmatprep.mubr.bf16.mxu1 %v7191_v24  ;;  %v2481_v30 = vrot.slane %v7184_v54, 2  ;;  %v7242_v50 = vpack.c.bf16 %v7217_v10, %v7226_v48  ;;  %v7249_v54 = vld [vmem:[#allocation2 + $0xc8] sm:$0xff]  ;;  %v2480_v23 = vsel %vm581_vm1, %v2478_v62, %v2479_v35  ;;  %v2484_v49 = vrot.slane %v7217_v10, 2 }
 0x232   : > { %2223 = vst [vmem:[#allocation2 + $0x111] sm:$0xff] %v2191_v20  ;;  %v5411_v25 = vpop.f32.mrb[152].mxu0  ;;  %5248 = vmatpush3.bf16.msra.mxu0 %v5610_v57  ;;  %v2373_v63 = vsel %vm468_vm0, %v2371_v12, %v2372_v14 }
 0x233   : > { %v2148_v32 = vadd.f32 %v5411_v25, %v6983_v45  ;;  %v2139_v44 = vpop.f32.mrb[153].mxu0 }
 0x234   : > { %v2140_v11 = vadd.f32 %v2139_v44, %v6971_v29  ;;  %v5412_v34 = vpop.f32.mrb[154].mxu0  ;;  %v2482_v44 = vsel %vm581_vm1, %v2479_v35, %v2481_v30 }
 0x235   : > { %v2196_v16 = vmax.f32 %v2148_v32, 0.0  ;;  %v2151_v45 = vadd.f32 %v5412_v34, %v6985_v38  ;;  %v2142_v0 = vpop.f32.mrb[155].mxu0  ;;  %3457 = vmatmul.mubr.bf16.gmra.mrb[176].mxu0 %v7204_v52  ;;  %v2258_v32 = vld [vmem:[#allocation2 + $0xc0] sm:$0xff]  ;;  %v7264_v58 = vpack.c.bf16 %v2482_v44, %v2480_v23  ;;  %v2264_v44 = vld [vmem:[#allocation2 + $0xf0] sm:$0xff] }
 0x236   : > { %v2194_v29 = vmax.f32 %v2140_v11, 0.0  ;;  %v2143_v43 = vadd.f32 %v2142_v0, %v6973_v46  ;;  %3464 = vmatprep.mubr.bf16.mxu0 %v7208_v36  ;;  %v2374_v46 = vrot.slane %v7219_v61, 1  ;;  %v2377_v11 = vrot.slane %v7249_v54, 1  ;;  %v7273_v0 = vld [vmem:[#allocation2 + $0xe0] sm:$0xff] }
 0x237   : > { %2228 = vst [vmem:[#allocation2 + $0x151] sm:$0xff] %v2196_v16  ;;  %v2197_v39 = vmax.f32 %v2151_v45, 0.0  ;;  %v7267_v6 = vpack.c.bf16 %v7249_v54, %v2258_v32  ;;  %v2486_v45 = vrot.slane %v7219_v61, 2  ;;  %v2382_v61 = vrot.slane %v7273_v0, 1 }
 0x238   : > { %2226 = vst [vmem:[#allocation2 + $0x139] sm:$0xff] %v2194_v29  ;;  %v2195_v38 = vmax.f32 %v2143_v43, 0.0  ;;  %3304 = vmatmul.mubr.bf16.gmra.mrb[148].mxu1 %v7175_v2  ;;  %v2375_v20 = vsel %vm468_vm0, %v2372_v14, %v2374_v46  ;;  %v7275_v29 = vld [vmem:[#allocation2 + $0xe8] sm:$0x3]  ;;  %v2483_v43 = vrot.slane %v7226_v48, 2 }
 0x239   : > { %2229 = vst [vmem:[#allocation2 + $0x159] sm:$0xff] %v2197_v39  ;;  %3311 = vmatprep.mubr.bf16.mxu1 %v7223_v8  ;;  %v7255_v28 = vpack.c.bf16 %v2375_v20, %v2373_v63  ;;  %v2261_v39 = vld [vmem:[#allocation2 + $0xd8] sm:$0xff]  ;;  %v2384_v17 = vrot.slane %v7275_v29, 1 }
 0x23a   : > { %2227 = vst [vmem:[#allocation2 + $0x141] sm:$0xff] %v2195_v38  ;;  %v5415_v22 = vpop.f32.mrb[156].mxu0  ;;  %v2485_v59 = vsel %vm581_vm1, %v2483_v43, %v2484_v49  ;;  %v2487_v38 = vsel %vm581_vm1, %v2484_v49, %v2486_v45  ;;  %v2381_v12 = vrot.slane %v2261_v39, 1  ;;  %v7300_v63 = vpack.c.bf16 %v7273_v0, %v2261_v39 }
 0x23b   : > { %v2164_v21 = vadd.f32 %v5415_v22, %v7002_v60  ;;  %v2155_v15 = vpop.f32.mrb[157].mxu0  ;;  %v2489_v22 = vrot.slane %v7249_v54, 2  ;;  %v2385_v62 = vsel %vm468_vm0, %v2382_v61, %v2384_v17  ;;  %v2494_v45 = vrot.slane %v7273_v0, 2  ;;  %v2267_v0 = vld [vmem:[#allocation2 + $0x108] sm:$0xff] }
 0x23c   : > { %v2156_v51 = vadd.f32 %v2155_v15, %v6989_v1  ;;  %v5416_v57 = vpop.f32.mrb[158].mxu0  ;;  %v7251_v1 = vld [vmem:[#allocation2 + $0xd0] sm:$0x3]  ;;  %v7294_v15 = vpack.c.bf16 %v2487_v38, %v2485_v59  ;;  %v2383_v20 = vsel %vm468_vm0, %v2381_v12, %v2382_v61  ;;  %v2496_v17 = vrot.slane %v7275_v29, 2 }
 0x23d   : > { %v2200_v55 = vmax.f32 %v2164_v21, 0.0  ;;  %v2167_v60 = vadd.f32 %v5416_v57, %v7006_v27  ;;  %v2158_v19 = vpop.f32.mrb[159].mxu0  ;;  %3465 = vmatmul.mubr.bf16.gmra.mrb[180].mxu0 %v7236_v41  ;;  %v2379_v34 = vrot.slane %v7251_v1, 1  ;;  %v2491_v35 = vrot.slane %v7251_v1, 2 }
 0x23e   : > { %v2198_v26 = vmax.f32 %v2156_v51, 0.0  ;;  %v2159_v25 = vadd.f32 %v2158_v19, %v6991_v4  ;;  %3472 = vmatprep.mubr.bf16.mxu0 %v7242_v50  ;;  %v2376_v4 = vrot.slane %v2258_v32, 1  ;;  %v2266_v19 = vld [vmem:[#allocation2 + $0x100] sm:$0x3]  ;;  %v2493_v12 = vrot.slane %v2261_v39, 2 }
 0x23f   : > { %2232 = vst [vmem:[#allocation2 + $0x181] sm:$0xff] %v2200_v55  ;;  %v2201_v53 = vmax.f32 %v2167_v60, 0.0  ;;  %v2380_v16 = vsel %vm468_vm0, %v2377_v11, %v2379_v34  ;;  %v2488_v55 = vrot.slane %v2258_v32, 2  ;;  %v2265_v60 = vld [vmem:[#allocation2 + $0xf8] sm:$0xff]  ;;  %v2389_v34 = vrot.slane %v2266_v19, 1 }
 0x240   : > { %2230 = vst [vmem:[#allocation2 + $0x169] sm:$0xff] %v2198_v26  ;;  %v2199_v27 = vmax.f32 %v2159_v25, 0.0  ;;  %3312 = vmatmul.mubr.bf16.gmra.mrb[152].mxu1 %v7208_v36  ;;  %v2378_v40 = vsel %vm468_vm0, %v2376_v4, %v2377_v11  ;;  %v2387_v11 = vrot.slane %v2265_v60, 1  ;;  %v7323_v59 = vpack.c.bf16 %v2265_v60, %v2264_v44 }
 0x241   : > { %2233 = vst [vmem:[#allocation2 + $0x189] sm:$0xff] %v2201_v53  ;;  %3319 = vmatprep.mubr.bf16.mxu1 %v7255_v28  ;;  %v7279_v10 = vpack.c.bf16 %v2380_v16, %v2378_v40  ;;  %v7308_v53 = vpack.c.bf16 %v2385_v62, %v2383_v20  ;;  %v2490_v23 = vsel %vm581_vm1, %v2488_v55, %v2489_v22  ;;  %v2386_v16 = vrot.slane %v2264_v44, 1 }
 0x242   : > { %2231 = vst [vmem:[#allocation2 + $0x171] sm:$0xff] %v2199_v27  ;;  %v2492_v27 = vsel %vm581_vm1, %v2489_v22, %v2491_v35  ;;  %v2390_v61 = vsel %vm468_vm0, %v2387_v11, %v2389_v34  ;;  %v2269_v22 = vld [vmem:[#allocation2 + $0x118] sm:$0x3]  ;;  %v2391_v29 = vrot.slane %v2267_v0, 1  ;;  %v2499_v20 = vrot.slane %v2265_v60, 2 }
 0x243   : > { %v7321_v43 = vpack.c.bf16 %v2492_v27, %v2490_v23  ;;  %v2388_v38 = vsel %vm468_vm0, %v2386_v16, %v2387_v11  ;;  %v2498_v23 = vrot.slane %v2264_v44, 2 }
 0x244   : > { %v7330_v35 = vpack.c.bf16 %v2390_v61, %v2388_v38 }
 0x245   : > { %3473 = vmatmul.mubr.bf16.gmra.mrb[184].mxu0 %v7264_v58  ;;  %v2500_v60 = vsel %vm581_vm1, %v2498_v23, %v2499_v20 }
 0x246   : > { %3480 = vmatprep.mubr.bf16.mxu0 %v7267_v6  ;;  %v7286_v14 = vld [vmem:[#allocation2 + $0x180] sm:$0xff] }
 0x247   : > { %v2563_v30 = vrot.slane %v7286_v14, 1  ;;  %v2570_v51 = vrot.slane %v7286_v14, 2 }
 0x248   : > { %3320 = vmatmul.mubr.bf16.gmra.mrb[156].mxu1 %v7242_v50  ;;  %v7288_v46 = vld [vmem:[#allocation2 + $0x188] sm:$0xff]  ;;  %v2284_v21 = vld [vmem:[#allocation2 + $0x190] sm:$0x3] }
 0x249   : > { %3327 = vmatprep.mubr.bf16.mxu1 %v7279_v10  ;;  %v2564_v48 = vrot.slane %v7288_v46, 1  ;;  %v2571_v57 = vrot.slane %v7288_v46, 2  ;;  %v2566_v1 = vrot.slane %v2284_v21, 1  ;;  %v2573_v25 = vrot.slane %v2284_v21, 2  ;;  %v2281_v47 = vld [vmem:[#allocation2 + $0x178] sm:$0x3] }
 0x24a   : > { %v2495_v21 = vsel %vm581_vm1, %v2493_v12, %v2494_v45  ;;  %v2506_v12 = vrot.slane %v2269_v22, 2 }
 0x24b   : > { %v2565_v54 = vsel %vm468_vm0, %v2563_v30, %v2564_v48  ;;  %v2572_v26 = vsel %vm581_vm1, %v2570_v51, %v2571_v57  ;;  %v2567_v32 = vsel %vm468_vm0, %v2564_v48, %v2566_v1  ;;  %v2574_v49 = vsel %vm581_vm1, %v2571_v57, %v2573_v25  ;;  %v2268_v48 = vld [vmem:[#allocation2 + $0x110] sm:$0xff] }
 0x24c   : > { %v7314_v4 = vpack.c.bf16 %v2567_v32, %v2565_v54  ;;  %v7318_v40 = vpack.c.bf16 %v2574_v49, %v2572_v26  ;;  %v2497_v30 = vsel %vm581_vm1, %v2494_v45, %v2496_v17  ;;  %v2392_v51 = vrot.slane %v2268_v48, 1  ;;  %v2271_v26 = vld [vmem:[#allocation2 + $0x128] sm:$0xff]  ;;  %v2272_v25 = vld [vmem:[#allocation2 + $0x130] sm:$0x3]  ;;  %v2270_v32 = vld [vmem:[#allocation2 + $0x120] sm:$0xff] }
 0x24d   : > { %3481 = vmatmul.mubr.bf16.gmra.mrb[188].mxu0 %v7294_v15  ;;  %v2394_v57 = vrot.slane %v2269_v22, 1  ;;  %v7336_v62 = vpack.c.bf16 %v2497_v30, %v2495_v21  ;;  %v7338_v39 = vpack.c.bf16 %v2268_v48, %v2267_v0  ;;  %v2501_v1 = vrot.slane %v2266_v19, 2  ;;  %v2274_v30 = vld [vmem:[#allocation2 + $0x140] sm:$0xff] }
 0x24e   : > { %3488 = vmatprep.mubr.bf16.mxu0 %v7300_v63  ;;  %8012 = vst [vmem:[#allocation19_spill] sm:$0xff] %v7314_v4  ;;  %8013 = vst [vmem:[#allocation20_spill] sm:$0xff] %v7318_v40  ;;  %v2393_v55 = vsel %vm468_vm0, %v2391_v29, %v2392_v51  ;;  %v2397_v34 = vrot.slane %v2271_v26, 1  ;;  %v2399_v49 = vrot.slane %v2272_v25, 1  ;;  %v2396_v19 = vrot.slane %v2270_v32, 1  ;;  %v2279_v40 = vld [vmem:[#allocation2 + $0x168] sm:$0xff] }
 0x24f   : > { %v2395_v54 = vsel %vm468_vm0, %v2392_v51, %v2394_v57  ;;  %v2502_v11 = vsel %vm581_vm1, %v2499_v20, %v2501_v1  ;;  %v2504_v16 = vrot.slane %v2268_v48, 2  ;;  %v7352_v38 = vpack.c.bf16 %v2271_v26, %v2270_v32  ;;  %v2275_v51 = vld [vmem:[#allocation2 + $0x148] sm:$0x3] }
 0x250   : > { %3328 = vmatmul.mubr.bf16.gmra.mrb[160].mxu1 %v7267_v6  ;;  %v7344_v27 = vpack.c.bf16 %v2395_v54, %v2393_v55  ;;  %v7350_v45 = vpack.c.bf16 %v2502_v11, %v2500_v60  ;;  %v2398_v61 = vsel %vm468_vm0, %v2396_v19, %v2397_v34  ;;  %v2400_v17 = vsel %vm468_vm0, %v2397_v34, %v2399_v49  ;;  %v2273_v54 = vld [vmem:[#allocation2 + $0x138] sm:$0xff] }
 0x251   : > { %3335 = vmatprep.mubr.bf16.mxu1 %v7308_v53  ;;  %v2503_v20 = vrot.slane %v2267_v0, 2  ;;  %v7360_v55 = vpack.c.bf16 %v2400_v17, %v2398_v61  ;;  %v2507_v23 = vsel %vm581_vm1, %v2504_v16, %v2506_v12  ;;  %v2402_v60 = vrot.slane %v2274_v30, 1 }
 0x252   : > { %v2404_v11 = vrot.slane %v2275_v51, 1  ;;  %v2401_v34 = vrot.slane %v2273_v54, 1  ;;  %v2509_v0 = vrot.slane %v2271_v26, 2  ;;  %v7370_v19 = vpack.c.bf16 %v2274_v30, %v2273_v54 }
 0x253   : > { %v2505_v22 = vsel %vm581_vm1, %v2503_v20, %v2504_v16  ;;  %v2511_v17 = vrot.slane %v2272_v25, 2  ;;  %v2508_v16 = vrot.slane %v2270_v32, 2  ;;  %v2276_v20 = vld [vmem:[#allocation2 + $0x150] sm:$0xff] }
 0x254   : > { %v7368_v49 = vpack.c.bf16 %v2507_v23, %v2505_v22  ;;  %v2405_v61 = vsel %vm468_vm0, %v2402_v60, %v2404_v11  ;;  %v2406_v25 = vrot.slane %v2276_v20, 1 }
 0x255   : > { %3489 = vmatmul.mubr.bf16.gmra.mrb[192].mxu0 %v7321_v43  ;;  %v2510_v26 = vsel %vm581_vm1, %v2508_v16, %v2509_v0  ;;  %v2280_v16 = vld [vmem:[#allocation2 + $0x170] sm:$0xff] }
 0x256   : > { %3496 = vmatprep.mubr.bf16.mxu0 %v7323_v59 }
 0x258   : > { %3336 = vmatmul.mubr.bf16.gmra.mrb[164].mxu1 %v7300_v63 }
 0x259   : > { %3343 = vmatprep.mubr.bf16.mxu1 %v7330_v35 }
 0x25d   : > { %3497 = vmatmul.mubr.bf16.gmra.mrb[196].mxu0 %v7336_v62 }
 0x25e   : > { %3504 = vmatprep.mubr.bf16.mxu0 %v7338_v39 }
 0x260   : > { %3344 = vmatmul.mubr.bf16.gmra.mrb[168].mxu1 %v7323_v59  ;;  %v4913_v44 = vpop.f32.mrb[128].mxu1 }
 0x261   : > { %3351 = vmatprep.mubr.bf16.mxu1 %v7344_v27  ;;  %v4914_v21 = vpop.f32.mrb[129].mxu1 }
 0x262   : > { %v7357_v57 = vadd.f32 %v4914_v21, %v4913_v44  ;;  %v4916_v29 = vpop.f32.mrb[130].mxu1  ;;  %v2403_v44 = vsel %vm468_vm0, %v2401_v34, %v2402_v60  ;;  %v2277_v21 = vld [vmem:[#allocation2 + $0x158] sm:$0xff]  ;;  %v2514_v60 = vrot.slane %v2274_v30, 2 }
 0x263   : > { %v4917_v48 = vpop.f32.mrb[131].mxu1  ;;  %v7376_v12 = vpack.c.bf16 %v2405_v61, %v2403_v44  ;;  %v2407_v22 = vrot.slane %v2277_v21, 1  ;;  %v7384_v32 = vpack.c.bf16 %v2277_v21, %v2276_v20  ;;  %v2516_v61 = vrot.slane %v2275_v51, 2 }
 0x264   : > { %v7362_v1 = vadd.f32 %v4917_v48, %v4916_v29  ;;  %v2278_v29 = vld [vmem:[#allocation2 + $0x160] sm:$0x3]  ;;  %v2512_v48 = vsel %vm581_vm1, %v2509_v0, %v2511_v17  ;;  %v2513_v0 = vrot.slane %v2273_v54, 2  ;;  %v2411_v51 = vrot.slane %v2279_v40, 1 }
 0x265   : > { %3505 = vmatmul.mubr.bf16.gmra.mrb[200].mxu0 %v7350_v45  ;;  %v2409_v23 = vrot.slane %v2278_v29, 1  ;;  %v7382_v11 = vpack.c.bf16 %v2512_v48, %v2510_v26  ;;  %v2408_v34 = vsel %vm468_vm0, %v2406_v25, %v2407_v22  ;;  %v2517_v26 = vsel %vm581_vm1, %v2514_v60, %v2516_v61 }
 0x266   : > { %3512 = vmatprep.mubr.bf16.mxu0 %v7352_v38  ;;  %v2515_v30 = vsel %vm581_vm1, %v2513_v0, %v2514_v60  ;;  %v2412_v48 = vrot.slane %v2280_v16, 1  ;;  %v2414_v25 = vrot.slane %v2281_v47, 1  ;;  %v7398_v54 = vpack.c.bf16 %v2280_v16, %v2279_v40 }
 0x267   : > { %v2410_v44 = vsel %vm468_vm0, %v2407_v22, %v2409_v23  ;;  %v2519_v22 = vrot.slane %v2277_v21, 2  ;;  %v7396_v23 = vpack.c.bf16 %v2517_v26, %v2515_v30  ;;  %v2521_v4 = vrot.slane %v2278_v29, 2 }
 0x268   : > { %3352 = vmatmul.mubr.bf16.gmra.mrb[172].mxu1 %v7338_v39  ;;  %v7390_v17 = vpack.c.bf16 %v2410_v44, %v2408_v34  ;;  %v2413_v34 = vsel %vm468_vm0, %v2411_v51, %v2412_v48  ;;  %v2415_v44 = vsel %vm468_vm0, %v2412_v48, %v2414_v25  ;;  %v2518_v0 = vrot.slane %v2276_v20, 2 }
 0x269   : > { %3359 = vmatprep.mubr.bf16.mxu1 %v7360_v55  ;;  %v7404_v60 = vpack.c.bf16 %v2415_v44, %v2413_v34  ;;  %v2522_v61 = vsel %vm581_vm1, %v2519_v22, %v2521_v4  ;;  %v2524_v26 = vrot.slane %v2280_v16, 2  ;;  %v7414_v29 = vpack.c.bf16 %v7288_v46, %v7286_v14  ;;  %v7429_v14 = vld [vmem:[#allocation2 + $0x198] sm:$0xff]  ;;  %v7431_v46 = vld [vmem:[#allocation2 + $0x1a8] sm:$0x3]  ;;  %v5612_v34 = vld [vmem:[%s7889_s3 + $0x210] sm:$0xff]  }
 0x26a   : > { %v2520_v21 = vsel %vm581_vm1, %v2518_v0, %v2519_v22  ;;  %v2526_v20 = vrot.slane %v2281_v47, 2  ;;  %v2523_v48 = vrot.slane %v2279_v40, 2  ;;  %v5611_v47 = vld [vmem:[%s7889_s3 + $0x208] sm:$0xff]   ;;  %v2590_v22 = vrot.slane %v7431_v46, 2 }
 0x26b   : > { %v7410_v30 = vpack.c.bf16 %v2522_v61, %v2520_v21  ;;  %v7433_v40 = vld [vmem:[#allocation2 + $0x8] sm:$0xff]  ;;  %v5614_v21 = vld [vmem:[%s7889_s3 + $0x220] sm:$0xff]  }
 0x26c   : > { %v2525_v25 = vsel %vm581_vm1, %v2523_v48, %v2524_v26  ;;  %v2527_v4 = vsel %vm581_vm1, %v2524_v26, %v2526_v20  ;;  %v2588_v16 = vrot.slane %v7433_v40, 2 }
 0x26d   : > { %3513 = vmatmul.mubr.bf16.gmra.mrb[204].mxu0 %v7368_v49  ;;  %v7422_v51 = vpack.c.bf16 %v2527_v4, %v2525_v25 }
 0x26e   : > { %3520 = vmatprep.mubr.bf16.mxu0 %v7370_v19  ;;  %v7448_v0 = vsel %vm581_vm1, %v2588_v16, %v2590_v22 }
 0x270   : > { %3360 = vmatmul.mubr.bf16.gmra.mrb[176].mxu1 %v7352_v38 }
 0x271   : > { %3367 = vmatprep.mubr.bf16.mxu1 %v7376_v12 }
 0x275   : > { %3521 = vmatmul.mubr.bf16.gmra.mrb[208].mxu0 %v7382_v11 }
 0x276   : > { %3528 = vmatprep.mubr.bf16.mxu0 %v7384_v32 }
 0x278   : > { %3368 = vmatmul.mubr.bf16.gmra.mrb[180].mxu1 %v7370_v19 }
 0x279   : > { %3375 = vmatprep.mubr.bf16.mxu1 %v7390_v17 }
 0x27d   : > { %3529 = vmatmul.mubr.bf16.gmra.mrb[212].mxu0 %v7396_v23 }
 0x27e   : > { %3536 = vmatprep.mubr.bf16.mxu0 %v7398_v54 }
 0x280   : > { %3376 = vmatmul.mubr.bf16.gmra.mrb[184].mxu1 %v7384_v32 }
 0x281   : > { %3383 = vmatprep.mubr.bf16.mxu1 %v7404_v60 }
 0x285   : > { %3537 = vmatmul.mubr.bf16.gmra.mrb[216].mxu0 %v7410_v30 }
 0x286   : > { %3544 = vmatprep.mubr.bf16.mxu0 %v7414_v29 }
 0x288   : > { %3384 = vmatmul.mubr.bf16.gmra.mrb[188].mxu1 %v7398_v54 }
 0x289   : > { %3585 = vmatprep.mubr.bf16.mxu1 %v7078_v33  ;;  %v2587_v33 = vrot.slane %v7429_v14, 2 }
 0x28b   : > { %v7445_v44 = vsel %vm581_vm1, %v2587_v33, %v2588_v16 }
 0x28d   : > { %3545 = vmatmul.mubr.bf16.gmra.mrb[220].mxu0 %v7422_v51 }
 0x28e   : > { %3746 = vmatprep.mubr.bf16.mxu0 %v7056_v42 }
 0x290   : > { %3586 = vmatmul.mubr.bf16.vlgmr.msra.gmra.mrb[192].mxu1 %v7047_v56  ;;  %v2647_v56 = vpack.c.bf16 %v7448_v0, %v7445_v44 }
 0x291   : > { %3593 = vmatprep.mubr.bf16.mxu1 %v7122_v37  ;;  %5418 = vmatpush3.bf16.msra.mxu1 %v7032_v5  ;;  %v5613_v5 = vld [vmem:[%s7889_s3 + $0x218] sm:$0xff]  }
 0x292   : > { %5419 = vmatprep.subr.bf16.mxu1 %v5611_v47 }
 0x295   : > { %3747 = vmatmul.mubr.bf16.vlgmr.msra.gmra.mrb[224].mxu0 %v7024_v3  ;;  %5420 = vmatpush3.bf16.msra.mxu1 %v5611_v47  ;;  %v5615_v3 = vld [vmem:[%s7889_s3 + $0x228] sm:$0xff]  }
 0x296   : > { %3754 = vmatprep.mubr.bf16.mxu0 %v7103_v31  ;;  %5421 = vmatprep.subr.bf16.mxu1 %v5612_v34 }
 0x298   : > { %3594 = vmatmul.mubr.bf16.gmra.mrb[196].mxu1 %v7056_v42  ;;  %v5616_v42 = vld [vmem:[%s7889_s3 + $0x230] sm:$0xff]  }
 0x299   : > { %3601 = vmatprep.mubr.bf16.mxu1 %v7166_v7  ;;  %5422 = vmatpush3.bf16.msra.mxu1 %v5612_v34 }
 0x29a   : > { %5423 = vmatprep.subr.bf16.mxu1 %v5613_v5 }
 0x29d   : > { %3755 = vmatmul.mubr.bf16.gmra.mrb[228].mxu0 %v7087_v18  ;;  %5424 = vmatpush3.bf16.msra.mxu1 %v5613_v5  ;;  %v5617_v18 = vld [vmem:[%s7889_s3 + $0x238] sm:$0xff]  }
 0x29e   : > { %3762 = vmatprep.mubr.bf16.mxu0 %v7147_v13  ;;  %5425 = vmatprep.subr.bf16.mxu1 %v5614_v21 }
 0x2a0   : > { %3602 = vmatmul.mubr.bf16.gmra.mrb[200].mxu1 %v7103_v31  ;;  %v7512_v31 = vld [vmem:[%s7890_s4] ss:$0 sm:$0xff] }
 0x2a1   : > { %3609 = vmatprep.mubr.bf16.mxu1 %v7204_v52  ;;  %5426 = vmatpush3.bf16.msra.mxu1 %v5614_v21 }
 0x2a2   : > { %5427 = vmatprep.subr.bf16.mxu1 %v5615_v3 }
 0x2a5   : > { %3763 = vmatmul.mubr.bf16.gmra.mrb[232].mxu0 %v7126_v9  ;;  %5428 = vmatpush3.bf16.msra.mxu1 %v5615_v3 }
 0x2a6   : > { %3770 = vmatprep.mubr.bf16.mxu0 %v7191_v24  ;;  %5429 = vmatprep.subr.bf16.mxu1 %v5616_v42 }
 0x2a8   : > { %3610 = vmatmul.mubr.bf16.gmra.mrb[204].mxu1 %v7147_v13 }
 0x2a9   : > { %3617 = vmatprep.mubr.bf16.mxu1 %v7236_v41  ;;  %5430 = vmatpush3.bf16.msra.mxu1 %v5616_v42 }
 0x2aa   : > { %5431 = vmatprep.subr.bf16.mxu1 %v5617_v18 }
 0x2ad   : > { %3771 = vmatmul.mubr.bf16.gmra.mrb[236].mxu0 %v7175_v2  ;;  %5432 = vmatpush3.bf16.msra.mxu1 %v5617_v18  ;;  %v3266_v2 = vadd.f32 %v7357_v57, %v7512_v31 }
 0x2ae   : > { %3778 = vmatprep.mubr.bf16.mxu0 %v7223_v8 }
 0x2b0   : > { %3618 = vmatmul.mubr.bf16.gmra.mrb[208].mxu1 %v7191_v24 }
 0x2b1   : > { %3625 = vmatprep.mubr.bf16.mxu1 %v7264_v58 }
 0x2b5   : > { %3779 = vmatmul.mubr.bf16.gmra.mrb[240].mxu0 %v7208_v36 }
 0x2b6   : > { %3786 = vmatprep.mubr.bf16.mxu0 %v7255_v28 }
 0x2b8   : > { %3626 = vmatmul.mubr.bf16.gmra.mrb[212].mxu1 %v7223_v8 }
 0x2b9   : > { %3633 = vmatprep.mubr.bf16.mxu1 %v7294_v15 }
 0x2bd   : > { %3787 = vmatmul.mubr.bf16.gmra.mrb[244].mxu0 %v7242_v50 }
 0x2be   : > { %3794 = vmatprep.mubr.bf16.mxu0 %v7279_v10 }
 0x2c0   : > { %3634 = vmatmul.mubr.bf16.gmra.mrb[216].mxu1 %v7255_v28  ;;  %v3269_v28 = vadd.f32 %v7362_v1, %v7512_v31 }
 0x2c1   : > { %3641 = vmatprep.mubr.bf16.mxu1 %v7321_v43 }
 0x2c5   : > { %3795 = vmatmul.mubr.bf16.gmra.mrb[248].mxu0 %v7267_v6 }
 0x2c6   : > { %3802 = vmatprep.mubr.bf16.mxu0 %v7308_v53 }
 0x2c8   : > { %3642 = vmatmul.mubr.bf16.gmra.mrb[220].mxu1 %v7279_v10 }
 0x2c9   : > { %3649 = vmatprep.mubr.bf16.mxu1 %v7336_v62 }
 0x2cd   : > { %3803 = vmatmul.mubr.bf16.gmra.mrb[252].mxu0 %v7300_v63 }
 0x2ce   : > { %3810 = vmatprep.mubr.bf16.mxu0 %v7330_v35 }
 0x2d0   : > { %3650 = vmatmul.mubr.bf16.gmra.mrb[224].mxu1 %v7308_v53 }
 0x2d1   : > { %3657 = vmatprep.mubr.bf16.mxu1 %v7350_v45 }
 0x2d5   : > { %3811 = vmatmul.mubr.bf16.gmra.mrb[0].mxu0 %v7323_v59 }
 0x2d6   : > { %3818 = vmatprep.mubr.bf16.mxu0 %v7344_v27 }
 0x2d8   : > { %3658 = vmatmul.mubr.bf16.gmra.mrb[228].mxu1 %v7330_v35 }
 0x2d9   : > { %3665 = vmatprep.mubr.bf16.mxu1 %v7368_v49 }
 0x2dd   : > { %3819 = vmatmul.mubr.bf16.gmra.mrb[4].mxu0 %v7338_v39 }
 0x2de   : > { %3826 = vmatprep.mubr.bf16.mxu0 %v7360_v55 }
 0x2e0   : > { %3666 = vmatmul.mubr.bf16.gmra.mrb[232].mxu1 %v7344_v27 }
 0x2e1   : > { %3673 = vmatprep.mubr.bf16.mxu1 %v7382_v11 }
 0x2e5   : > { %3827 = vmatmul.mubr.bf16.gmra.mrb[8].mxu0 %v7352_v38 }
 0x2e6   : > { %3834 = vmatprep.mubr.bf16.mxu0 %v7376_v12 }
 0x2e8   : > { %v5025_v9 = vpop.f32.mrb[160].mxu0  ;;  %3674 = vmatmul.mubr.bf16.gmra.mrb[236].mxu1 %v7360_v55 }
 0x2e9   : > { %v5026_v13 = vpop.f32.mrb[161].mxu0  ;;  %3681 = vmatprep.mubr.bf16.mxu1 %v7396_v23 }
 0x2ea   : > { %v5027_v24 = vadd.f32 %v5026_v13, %v5025_v9  ;;  %v5028_v36 = vpop.f32.mrb[162].mxu0  ;;  %v2581_v13 = vrot.slane %v7433_v40, 1 }
 0x2eb   : > { %v4919_v8 = vpop.f32.mrb[132].mxu1  ;;  %v5029_v50 = vpop.f32.mrb[163].mxu0 }
 0x2ec   : > { %v7520_v6 = vadd.f32 %v5027_v24, %v3266_v2  ;;  %v5030_v10 = vadd.f32 %v5029_v50, %v5028_v36  ;;  %v4920_v63 = vpop.f32.mrb[133].mxu1  ;;  %v2583_v2 = vrot.slane %v7431_v46, 1 }
 0x2ed   : > { %v4921_v53 = vadd.f32 %v4920_v63, %v4919_v8  ;;  %v4922_v59 = vpop.f32.mrb[134].mxu1  ;;  %3835 = vmatmul.mubr.bf16.gmra.mrb[12].mxu0 %v7370_v19 }
 0x2ee   : > { %v7523_v35 = vadd.f32 %v5030_v10, %v3269_v28  ;;  %v4923_v39 = vpop.f32.mrb[135].mxu1  ;;  %3842 = vmatprep.mubr.bf16.mxu0 %v7390_v17  ;;  %v2584_v46 = vsel %vm468_vm0, %v2581_v13, %v2583_v2 }
 0x2ef   : > { %v4924_v27 = vadd.f32 %v4923_v39, %v4922_v59  ;;  %v3274_v55 = vadd.f32 %v4921_v53, %v7512_v31  ;;  %v8014_v53 = vld [vmem:[#allocation19_spill] sm:$0xff] }
 0x2f0   : > { %v5031_v38 = vpop.f32.mrb[164].mxu0  ;;  %3682 = vmatmul.mubr.bf16.gmra.mrb[240].mxu1 %v7376_v12 }
 0x2f1   : > { %v5032_v57 = vpop.f32.mrb[165].mxu0  ;;  %3689 = vmatprep.mubr.bf16.mxu1 %v7410_v30  ;;  %v3277_v19 = vadd.f32 %v4924_v27, %v7512_v31 }
 0x2f2   : > { %v5033_v1 = vadd.f32 %v5032_v57, %v5031_v38  ;;  %v5034_v61 = vpop.f32.mrb[166].mxu0  ;;  %v8015_v57 = vld [vmem:[#allocation20_spill] sm:$0xff] }
 0x2f3   : > { %v4925_v26 = vpop.f32.mrb[136].mxu1  ;;  %v5035_v20 = vpop.f32.mrb[167].mxu0 }
 0x2f4   : > { %v7530_v48 = vadd.f32 %v5033_v1, %v3274_v55  ;;  %v5036_v25 = vadd.f32 %v5035_v20, %v5034_v61  ;;  %v4926_v4 = vpop.f32.mrb[137].mxu1 }
 0x2f5   : > { %v4927_v47 = vadd.f32 %v4926_v4, %v4925_v26  ;;  %v4928_v16 = vpop.f32.mrb[138].mxu1  ;;  %3843 = vmatmul.mubr.bf16.gmra.mrb[16].mxu0 %v7384_v32  ;;  %v2580_v32 = vrot.slane %v7429_v14, 1 }
 0x2f6   : > { %v7533_v12 = vadd.f32 %v5036_v25, %v3277_v19  ;;  %v4929_v33 = vpop.f32.mrb[139].mxu1  ;;  %3850 = vmatprep.mubr.bf16.mxu0 %v7404_v60 }
 0x2f7   : > { %v4930_v22 = vadd.f32 %v4929_v33, %v4928_v16  ;;  %v3282_v21 = vadd.f32 %v4927_v47, %v7512_v31  ;;  %v2582_v39 = vsel %vm468_vm0, %v2580_v32, %v2581_v13 }
 0x2f8   : > { %v5037_v34 = vpop.f32.mrb[168].mxu0  ;;  %3690 = vmatmul.mubr.bf16.gmra.mrb[244].mxu1 %v7390_v17  ;;  %v2646_v61 = vpack.c.bf16 %v2584_v46, %v2582_v39 }
 0x2f9   : > { %v5038_v5 = vpop.f32.mrb[169].mxu0  ;;  %3697 = vmatprep.mubr.bf16.mxu1 %v7422_v51  ;;  %v3285_v24 = vadd.f32 %v4930_v22, %v7512_v31 }
 0x2fa   : > { %v5039_v3 = vadd.f32 %v5038_v5, %v5037_v34  ;;  %v5040_v42 = vpop.f32.mrb[170].mxu0 }
 0x2fb   : > { %v4931_v18 = vpop.f32.mrb[140].mxu1  ;;  %v5041_v9 = vpop.f32.mrb[171].mxu0 }
 0x2fc   : > { %v7543_v36 = vadd.f32 %v5039_v3, %v3282_v21  ;;  %v5042_v17 = vadd.f32 %v5041_v9, %v5040_v42  ;;  %v4932_v8 = vpop.f32.mrb[141].mxu1  ;;  %v2645_v3 = vpack.c.bf16 %v7433_v40, %v7429_v14 }
 0x2fd   : > { %v4933_v50 = vadd.f32 %v4932_v8, %v4931_v18  ;;  %v4934_v28 = vpop.f32.mrb[142].mxu1  ;;  %3851 = vmatmul.mubr.bf16.gmra.mrb[20].mxu0 %v7398_v54 }
 0x2fe   : > { %v7546_v10 = vadd.f32 %v5042_v17, %v3285_v24  ;;  %v4935_v63 = vpop.f32.mrb[143].mxu1  ;;  %3858 = vmatprep.mubr.bf16.mxu0 %v8014_v53 }
 0x2ff   : > { %v4936_v59 = vadd.f32 %v4935_v63, %v4934_v28  ;;  %v3290_v55 = vadd.f32 %v4933_v50, %v7512_v31 }
 0x300   : > { %v5043_v27 = vpop.f32.mrb[172].mxu0  ;;  %3698 = vmatmul.mubr.bf16.gmra.mrb[248].mxu1 %v7404_v60 }
 0x301   : > { %v5044_v38 = vpop.f32.mrb[173].mxu0  ;;  %3705 = vmatprep.mubr.bf16.mxu1 %v8015_v57  ;;  %v3293_v19 = vadd.f32 %v4936_v59, %v7512_v31 }
 0x302   : > { %v5045_v1 = vadd.f32 %v5044_v38, %v5043_v27  ;;  %v5046_v54 = vpop.f32.mrb[174].mxu0 }
 0x303   : > { %v4937_v26 = vpop.f32.mrb[144].mxu1  ;;  %v5047_v20 = vpop.f32.mrb[175].mxu0 }
 0x304   : > { %v7555_v25 = vadd.f32 %v5045_v1, %v3290_v55  ;;  %v5048_v4 = vadd.f32 %v5047_v20, %v5046_v54  ;;  %v4938_v47 = vpop.f32.mrb[145].mxu1 }
 0x305   : > { %v4939_v16 = vadd.f32 %v4938_v47, %v4937_v26  ;;  %v4940_v33 = vpop.f32.mrb[146].mxu1  ;;  %3859 = vmatmul.mubr.bf16.gmra.mrb[24].mxu0 %v7414_v29 }
 0x306   : > { %v7558_v60 = vadd.f32 %v5048_v4, %v3293_v19  ;;  %v4941_v22 = vpop.f32.mrb[147].mxu1  ;;  %3866 = vmatprep.mubr.bf16.mxu0 %v2646_v61 }
 0x307   : > { %v4942_v34 = vadd.f32 %v4941_v22, %v4940_v33  ;;  %v3298_v42 = vadd.f32 %v4939_v16, %v7512_v31 }
 0x308   : > { %v5049_v5 = vpop.f32.mrb[176].mxu0  ;;  %3706 = vmatmul.mubr.bf16.gmra.mrb[252].mxu1 %v8014_v53 }
 0x309   : > { %v5050_v21 = vpop.f32.mrb[177].mxu0  ;;  %5433 = vmatprep.mubr.bf16.mxu1 %v7122_v37  ;;  %v3301_v13 = vadd.f32 %v4942_v34, %v7512_v31 }
 0x30a   : > { %v5051_v18 = vadd.f32 %v5050_v21, %v5049_v5  ;;  %v5052_v9 = vpop.f32.mrb[178].mxu0 }
 0x30b   : > { %v4943_v32 = vpop.f32.mrb[148].mxu1  ;;  %v5053_v29 = vpop.f32.mrb[179].mxu0 }
 0x30c   : > { %v7566_v2 = vadd.f32 %v5051_v18, %v3298_v42  ;;  %v5054_v24 = vadd.f32 %v5053_v29, %v5052_v9  ;;  %v4944_v17 = vpop.f32.mrb[149].mxu1 }
 0x30d   : > { %v4945_v8 = vadd.f32 %v4944_v17, %v4943_v32  ;;  %v4946_v50 = vpop.f32.mrb[150].mxu1  ;;  %3867 = vmatmul.mubr.bf16.gmra.mrb[28].mxu0 %v2645_v3 }
 0x30e   : > { %v7568_v28 = vadd.f32 %v5054_v24, %v3301_v13  ;;  %v4947_v37 = vpop.f32.mrb[151].mxu1 }
 0x30f   : > { %v4948_v63 = vadd.f32 %v4947_v37, %v4946_v50  ;;  %v3306_v53 = vadd.f32 %v4945_v8, %v7512_v31 }
 0x310   : > { %v5055_v14 = vpop.f32.mrb[180].mxu0  ;;  %5434 = vmatmul.mubr.bf16.vlgmr.msra.gmra.mrb[0].mxu1 %v7166_v7 }
 0x311   : > { %v5056_v40 = vpop.f32.mrb[181].mxu0  ;;  %5437 = vmatprep.mubr.bf16.mxu1 %v7204_v52  ;;  %v3309_v38 = vadd.f32 %v4948_v63, %v7512_v31 }
 0x312   : > { %v5057_v59 = vadd.f32 %v5056_v40, %v5055_v14  ;;  %v5058_v39 = vpop.f32.mrb[182].mxu0 }
 0x313   : > { %v4949_v46 = vpop.f32.mrb[152].mxu1  ;;  %v5059_v27 = vpop.f32.mrb[183].mxu0 }
 0x314   : > { %v7574_v55 = vadd.f32 %v5057_v59, %v3306_v53  ;;  %v5060_v1 = vadd.f32 %v5059_v27, %v5058_v39  ;;  %v4950_v54 = vpop.f32.mrb[153].mxu1 }
 0x315   : > { %v4951_v61 = vadd.f32 %v4950_v54, %v4949_v46  ;;  %v4952_v26 = vpop.f32.mrb[154].mxu1 }
 0x316   : > { %v7576_v20 = vadd.f32 %v5060_v1, %v3309_v38  ;;  %v4953_v7 = vpop.f32.mrb[155].mxu1 }
 0x317   : > { %v4954_v19 = vadd.f32 %v4953_v7, %v4952_v26  ;;  %v3314_v47 = vadd.f32 %v4951_v61, %v7512_v31 }
 0x318   : > { %v5061_v4 = vpop.f32.mrb[184].mxu0  ;;  %5438 = vmatmul.mubr.bf16.gmra.mrb[4].mxu1 %v7236_v41 }
 0x319   : > { %v5062_v52 = vpop.f32.mrb[185].mxu0  ;;  %5441 = vmatprep.mubr.bf16.mxu1 %v7264_v58  ;;  %v3317_v5 = vadd.f32 %v4954_v19, %v7512_v31 }
 0x31a   : > { %v5063_v16 = vadd.f32 %v5062_v52, %v5061_v4  ;;  %v5064_v33 = vpop.f32.mrb[186].mxu0 }
 0x31b   : > { %v4955_v22 = vpop.f32.mrb[156].mxu1  ;;  %v5065_v34 = vpop.f32.mrb[187].mxu0 }
 0x31c   : > { %v7582_v21 = vadd.f32 %v5063_v16, %v3314_v47  ;;  %v5066_v3 = vadd.f32 %v5065_v34, %v5064_v33  ;;  %v4956_v42 = vpop.f32.mrb[157].mxu1 }
 0x31d   : > { %v4957_v18 = vadd.f32 %v4956_v42, %v4955_v22  ;;  %v4958_v9 = vpop.f32.mrb[158].mxu1 }
 0x31e   : > { %v7584_v32 = vadd.f32 %v5066_v3, %v3317_v5  ;;  %v4959_v41 = vpop.f32.mrb[159].mxu1 }
 0x31f   : > { %v4960_v29 = vadd.f32 %v4959_v41, %v4958_v9  ;;  %v3322_v24 = vadd.f32 %v4957_v18, %v7512_v31 }
 0x320   : > { %v5067_v13 = vpop.f32.mrb[188].mxu0  ;;  %5442 = vmatmul.mubr.bf16.gmra.mrb[8].mxu1 %v7294_v15 }
 0x321   : > { %v5068_v58 = vpop.f32.mrb[189].mxu0  ;;  %5445 = vmatprep.mubr.bf16.mxu1 %v7321_v43  ;;  %v3325_v63 = vadd.f32 %v4960_v29, %v7512_v31 }
 0x322   : > { %v5069_v17 = vadd.f32 %v5068_v58, %v5067_v13  ;;  %v5070_v8 = vpop.f32.mrb[190].mxu0 }
 0x323   : > { %v4961_v50 = vpop.f32.mrb[160].mxu1  ;;  %v5071_v37 = vpop.f32.mrb[191].mxu0 }
 0x324   : > { %v7590_v14 = vadd.f32 %v5069_v17, %v3322_v24  ;;  %v5072_v40 = vadd.f32 %v5071_v37, %v5070_v8  ;;  %v4962_v53 = vpop.f32.mrb[161].mxu1 }
 0x325   : > { %v4963_v59 = vadd.f32 %v4962_v53, %v4961_v50  ;;  %v4964_v39 = vpop.f32.mrb[162].mxu1 }
 0x326   : > { %v7592_v46 = vadd.f32 %v5072_v40, %v3325_v63  ;;  %v4965_v15 = vpop.f32.mrb[163].mxu1 }
 0x327   : > { %v4966_v27 = vadd.f32 %v4965_v15, %v4964_v39  ;;  %v3330_v1 = vadd.f32 %v4963_v59, %v7512_v31 }
 0x328   : > { %v5073_v38 = vpop.f32.mrb[192].mxu0  ;;  %5446 = vmatmul.mubr.bf16.gmra.mrb[12].mxu1 %v7336_v62 }
 0x329   : > { %v5074_v43 = vpop.f32.mrb[193].mxu0  ;;  %5449 = vmatprep.mubr.bf16.mxu1 %v7350_v45  ;;  %v3333_v19 = vadd.f32 %v4966_v27, %v7512_v31 }
 0x32a   : > { %v5075_v54 = vadd.f32 %v5074_v43, %v5073_v38  ;;  %v5076_v61 = vpop.f32.mrb[194].mxu0 }
 0x32b   : > { %v4967_v26 = vpop.f32.mrb[164].mxu1  ;;  %v5077_v7 = vpop.f32.mrb[195].mxu0 }
 0x32c   : > { %v7598_v4 = vadd.f32 %v5075_v54, %v3330_v1  ;;  %v5078_v52 = vadd.f32 %v5077_v7, %v5076_v61  ;;  %v4968_v47 = vpop.f32.mrb[165].mxu1 }
 0x32d   : > { %v4969_v16 = vadd.f32 %v4968_v47, %v4967_v26  ;;  %v4970_v33 = vpop.f32.mrb[166].mxu1 }
 0x32e   : > { %v7600_v22 = vadd.f32 %v5078_v52, %v3333_v19  ;;  %v4971_v62 = vpop.f32.mrb[167].mxu1 }
 0x32f   : > { %v4972_v34 = vadd.f32 %v4971_v62, %v4970_v33  ;;  %v3338_v3 = vadd.f32 %v4969_v16, %v7512_v31 }
 0x330   : > { %v5079_v5 = vpop.f32.mrb[196].mxu0  ;;  %5450 = vmatmul.mubr.bf16.gmra.mrb[16].mxu1 %v7368_v49 }
 0x331   : > { %v5080_v45 = vpop.f32.mrb[197].mxu0  ;;  %5453 = vmatprep.mubr.bf16.mxu1 %v7382_v11  ;;  %v3341_v29 = vadd.f32 %v4972_v34, %v7512_v31 }
 0x332   : > { %v5081_v42 = vadd.f32 %v5080_v45, %v5079_v5  ;;  %v5082_v18 = vpop.f32.mrb[198].mxu0 }
 0x333   : > { %v4973_v9 = vpop.f32.mrb[168].mxu1  ;;  %v5083_v41 = vpop.f32.mrb[199].mxu0 }
 0x334   : > { %v7606_v13 = vadd.f32 %v5081_v42, %v3338_v3  ;;  %v5084_v58 = vadd.f32 %v5083_v41, %v5082_v18  ;;  %v4974_v24 = vpop.f32.mrb[169].mxu1 }
 0x335   : > { %v4975_v17 = vadd.f32 %v4974_v24, %v4973_v9  ;;  %v4976_v8 = vpop.f32.mrb[170].mxu1 }
 0x336   : > { %v7608_v50 = vadd.f32 %v5084_v58, %v3341_v29  ;;  %v4977_v49 = vpop.f32.mrb[171].mxu1 }
 0x337   : > { %v4978_v37 = vadd.f32 %v4977_v49, %v4976_v8  ;;  %v3346_v40 = vadd.f32 %v4975_v17, %v7512_v31 }
 0x338   : > { %v5085_v63 = vpop.f32.mrb[200].mxu0  ;;  %5454 = vmatmul.mubr.bf16.gmra.mrb[20].mxu1 %v7396_v23 }
 0x339   : > { %v5086_v11 = vpop.f32.mrb[201].mxu0  ;;  %5457 = vmatprep.mubr.bf16.mxu1 %v7410_v30  ;;  %v3349_v27 = vadd.f32 %v4978_v37, %v7512_v31 }
 0x33a   : > { %v5087_v53 = vadd.f32 %v5086_v11, %v5085_v63  ;;  %v5088_v59 = vpop.f32.mrb[202].mxu0 }
 0x33b   : > { %v4979_v39 = vpop.f32.mrb[172].mxu1  ;;  %v5089_v15 = vpop.f32.mrb[203].mxu0 }
 0x33c   : > { %v7614_v38 = vadd.f32 %v5087_v53, %v3346_v40  ;;  %v5090_v43 = vadd.f32 %v5089_v15, %v5088_v59  ;;  %v4980_v1 = vpop.f32.mrb[173].mxu1 }
 0x33d   : > { %v4981_v54 = vadd.f32 %v4980_v1, %v4979_v39  ;;  %v4982_v61 = vpop.f32.mrb[174].mxu1 }
 0x33e   : > { %v7616_v26 = vadd.f32 %v5090_v43, %v3349_v27  ;;  %v4983_v23 = vpop.f32.mrb[175].mxu1 }
 0x33f   : > { %v4984_v7 = vadd.f32 %v4983_v23, %v4982_v61  ;;  %v3354_v52 = vadd.f32 %v4981_v54, %v7512_v31 }
 0x340   : > { %v5091_v19 = vpop.f32.mrb[204].mxu0  ;;  %5458 = vmatmul.mubr.bf16.gmra.mrb[24].mxu1 %v7422_v51 }
 0x341   : > { %v5092_v30 = vpop.f32.mrb[205].mxu0  ;;  %5461 = vmatprep.mubr.bf16.mxu1 %v8015_v57  ;;  %v3357_v34 = vadd.f32 %v4984_v7, %v7512_v31 }
 0x342   : > { %v5093_v47 = vadd.f32 %v5092_v30, %v5091_v19  ;;  %v5094_v16 = vpop.f32.mrb[206].mxu0 }
 0x343   : > { %v4985_v33 = vpop.f32.mrb[176].mxu1  ;;  %v5095_v62 = vpop.f32.mrb[207].mxu0 }
 0x344   : > { %v7622_v5 = vadd.f32 %v5093_v47, %v3354_v52  ;;  %v5096_v45 = vadd.f32 %v5095_v62, %v5094_v16  ;;  %v4986_v3 = vpop.f32.mrb[177].mxu1 }
 0x345   : > { %v4987_v42 = vadd.f32 %v4986_v3, %v4985_v33  ;;  %v4988_v18 = vpop.f32.mrb[178].mxu1 }
 0x346   : > { %v7624_v9 = vadd.f32 %v5096_v45, %v3357_v34  ;;  %v4989_v51 = vpop.f32.mrb[179].mxu1 }
 0x347   : > { %v4990_v41 = vadd.f32 %v4989_v51, %v4988_v18  ;;  %v3362_v58 = vadd.f32 %v4987_v42, %v7512_v31 }
 0x348   : > { %v5097_v29 = vpop.f32.mrb[208].mxu0  ;;  %5462 = vmatmul.mubr.bf16.gmra.mrb[28].mxu1 %v2647_v56 }
 0x349   : > { %v5098_v57 = vpop.f32.mrb[209].mxu0  ;;  %v3365_v37 = vadd.f32 %v4990_v41, %v7512_v31 }
 0x34a   : > { %v5099_v24 = vadd.f32 %v5098_v57, %v5097_v29  ;;  %v5100_v17 = vpop.f32.mrb[210].mxu0 }
 0x34b   : > { %v4991_v8 = vpop.f32.mrb[180].mxu1  ;;  %v5101_v49 = vpop.f32.mrb[211].mxu0 }
 0x34c   : > { %v7631_v63 = vadd.f32 %v5099_v24, %v3362_v58  ;;  %v5102_v11 = vadd.f32 %v5101_v49, %v5100_v17  ;;  %v4992_v40 = vpop.f32.mrb[181].mxu1 }
 0x34d   : > { %v4993_v53 = vadd.f32 %v4992_v40, %v4991_v8  ;;  %v4994_v59 = vpop.f32.mrb[182].mxu1 }
 0x34e   : > { %v7633_v39 = vadd.f32 %v5102_v11, %v3365_v37  ;;  %v4995_v15 = vpop.f32.mrb[183].mxu1 }
 0x34f   : > { %v4996_v44 = vadd.f32 %v4995_v15, %v4994_v59  ;;  %v3370_v27 = vadd.f32 %v4993_v53, %v7512_v31 }
 0x350   : > { %v5103_v0 = vpop.f32.mrb[212].mxu0 }
 0x351   : > { %v5104_v56 = vpop.f32.mrb[213].mxu0  ;;  %v3373_v23 = vadd.f32 %v4996_v44, %v7512_v31 }
 0x352   : > { %v5105_v43 = vadd.f32 %v5104_v56, %v5103_v0  ;;  %v5106_v1 = vpop.f32.mrb[214].mxu0 }
 0x353   : > { %v4997_v54 = vpop.f32.mrb[184].mxu1  ;;  %v5107_v61 = vpop.f32.mrb[215].mxu0 }
 0x354   : > { %v7637_v7 = vadd.f32 %v5105_v43, %v3370_v27  ;;  %v5108_v19 = vadd.f32 %v5107_v61, %v5106_v1  ;;  %v4998_v30 = vpop.f32.mrb[185].mxu1 }
 0x355   : > { %v4999_v52 = vadd.f32 %v4998_v30, %v4997_v54  ;;  %v5000_v47 = vpop.f32.mrb[186].mxu1 }
 0x356   : > { %v7639_v16 = vadd.f32 %v5108_v19, %v3373_v23  ;;  %v5001_v33 = vpop.f32.mrb[187].mxu1 }
 0x357   : > { %v5002_v62 = vadd.f32 %v5001_v33, %v5000_v47  ;;  %v3378_v3 = vadd.f32 %v4999_v52, %v7512_v31 }
 0x358   : > { %v5109_v34 = vpop.f32.mrb[216].mxu0 }
 0x359   : > { %v5110_v45 = vpop.f32.mrb[217].mxu0  ;;  %v3381_v29 = vadd.f32 %v5002_v62, %v7512_v31 }
 0x35a   : > { %v5111_v42 = vadd.f32 %v5110_v45, %v5109_v34  ;;  %v5112_v18 = vpop.f32.mrb[218].mxu0 }
 0x35b   : > { %v5003_v51 = vpop.f32.mrb[188].mxu1  ;;  %v5113_v41 = vpop.f32.mrb[219].mxu0 }
 0x35c   : > { %v7643_v57 = vadd.f32 %v5111_v42, %v3378_v3  ;;  %v5114_v58 = vadd.f32 %v5113_v41, %v5112_v18  ;;  %v5004_v24 = vpop.f32.mrb[189].mxu1 }
 0x35d   : > { %v5005_v17 = vadd.f32 %v5004_v24, %v5003_v51  ;;  %v5006_v8 = vpop.f32.mrb[190].mxu1 }
 0x35e   : > { %v7645_v49 = vadd.f32 %v5114_v58, %v3381_v29  ;;  %v5007_v37 = vpop.f32.mrb[191].mxu1 }
 0x35f   : > { %v5008_v11 = vadd.f32 %v5007_v37, %v5006_v8  ;;  %v3386_v59 = vadd.f32 %v5005_v17, %v7512_v31 }
 0x360   : > { %v5115_v40 = vpop.f32.mrb[220].mxu0 }
 0x361   : > { %v5116_v53 = vpop.f32.mrb[221].mxu0  ;;  %v3389_v27 = vadd.f32 %v5008_v11, %v7512_v31 }
 0x362   : > { %v5117_v15 = vadd.f32 %v5116_v53, %v5115_v40  ;;  %v5118_v44 = vpop.f32.mrb[222].mxu0 }
 0x363   : > { %v5119_v0 = vpop.f32.mrb[223].mxu0  ;;  %v5137_v56 = vpop.f32.mrb[192].mxu1 }
 0x364   : > { %v7649_v43 = vadd.f32 %v5117_v15, %v3386_v59  ;;  %v5120_v1 = vadd.f32 %v5119_v0, %v5118_v44  ;;  %v5138_v54 = vpop.f32.mrb[193].mxu1 }
 0x365   : > { %v5139_v61 = vadd.f32 %v5138_v54, %v5137_v56  ;;  %v5140_v23 = vpop.f32.mrb[194].mxu1 }
 0x366   : > { %v7651_v19 = vadd.f32 %v5120_v1, %v3389_v27  ;;  %v5141_v30 = vpop.f32.mrb[195].mxu1 }
 0x367   : > { %v3588_v52 = vadd.f32 %v5139_v61, %v7520_v6  ;;  %v5142_v47 = vadd.f32 %v5141_v30, %v5140_v23 }
 0x368   : > { %v5249_v33 = vpop.f32.mrb[224].mxu0 }
 0x369   : > { %v3591_v62 = vadd.f32 %v5142_v47, %v7523_v35  ;;  %v5250_v34 = vpop.f32.mrb[225].mxu0 }
 0x36a   : > { %v5251_v45 = vadd.f32 %v5250_v34, %v5249_v33  ;;  %v5252_v3 = vpop.f32.mrb[226].mxu0 }
 0x36b   : > { %v5143_v42 = vpop.f32.mrb[196].mxu1  ;;  %v5253_v31 = vpop.f32.mrb[227].mxu0 }
 0x36c   : > { %v5254_v18 = vadd.f32 %v5253_v31, %v5252_v3  ;;  %v5144_v51 = vpop.f32.mrb[197].mxu1  ;;  %v7655_v41 = vadd.f32 %v5251_v45, %v3588_v52 }
 0x36d   : > { %v5145_v29 = vadd.f32 %v5144_v51, %v5143_v42  ;;  %v5146_v58 = vpop.f32.mrb[198].mxu1 }
 0x36e   : > { %v5147_v24 = vpop.f32.mrb[199].mxu1  ;;  %v7657_v17 = vadd.f32 %v5254_v18, %v3591_v62 }
 0x36f   : > { %v3596_v6 = vadd.f32 %v5145_v29, %v7530_v48  ;;  %v5148_v8 = vadd.f32 %v5147_v24, %v5146_v58 }
 0x370   : > { %v5255_v37 = vpop.f32.mrb[228].mxu0 }
 0x371   : > { %v3599_v35 = vadd.f32 %v5148_v8, %v7533_v12  ;;  %v5256_v11 = vpop.f32.mrb[229].mxu0 }
 0x372   : > { %v5257_v40 = vadd.f32 %v5256_v11, %v5255_v37  ;;  %v5258_v53 = vpop.f32.mrb[230].mxu0 }
 0x373   : > { %v5149_v59 = vpop.f32.mrb[200].mxu1  ;;  %v5259_v15 = vpop.f32.mrb[231].mxu0 }
 0x374   : > { %v5260_v44 = vadd.f32 %v5259_v15, %v5258_v53  ;;  %v5150_v0 = vpop.f32.mrb[201].mxu1  ;;  %v7661_v56 = vadd.f32 %v5257_v40, %v3596_v6 }
 0x375   : > { %v5151_v27 = vadd.f32 %v5150_v0, %v5149_v59  ;;  %v5152_v1 = vpop.f32.mrb[202].mxu1 }
 0x376   : > { %v5153_v54 = vpop.f32.mrb[203].mxu1  ;;  %v7663_v61 = vadd.f32 %v5260_v44, %v3599_v35 }
 0x377   : > { %v3604_v48 = vadd.f32 %v5151_v27, %v7543_v36  ;;  %v5154_v23 = vadd.f32 %v5153_v54, %v5152_v1 }
 0x378   : > { %v5261_v30 = vpop.f32.mrb[232].mxu0 }
 0x379   : > { %v3607_v12 = vadd.f32 %v5154_v23, %v7546_v10  ;;  %v5262_v52 = vpop.f32.mrb[233].mxu0 }
 0x37a   : > { %v5263_v47 = vadd.f32 %v5262_v52, %v5261_v30  ;;  %v5264_v33 = vpop.f32.mrb[234].mxu0 }
 0x37b   : > { %v5155_v62 = vpop.f32.mrb[204].mxu1  ;;  %v5265_v34 = vpop.f32.mrb[235].mxu0 }
 0x37c   : > { %v5266_v45 = vadd.f32 %v5265_v34, %v5264_v33  ;;  %v5156_v3 = vpop.f32.mrb[205].mxu1  ;;  %v7667_v42 = vadd.f32 %v5263_v47, %v3604_v48 }
 0x37d   : > { %v5157_v31 = vadd.f32 %v5156_v3, %v5155_v62  ;;  %v5158_v18 = vpop.f32.mrb[206].mxu1 }
 0x37e   : > { %v5159_v51 = vpop.f32.mrb[207].mxu1  ;;  %v7669_v29 = vadd.f32 %v5266_v45, %v3607_v12 }
 0x37f   : > { %v3612_v36 = vadd.f32 %v5157_v31, %v7555_v25  ;;  %v5160_v58 = vadd.f32 %v5159_v51, %v5158_v18 }
 0x380   : > { %v5267_v24 = vpop.f32.mrb[236].mxu0 }
 0x381   : > { %v3615_v10 = vadd.f32 %v5160_v58, %v7558_v60  ;;  %v5268_v6 = vpop.f32.mrb[237].mxu0 }
 0x382   : > { %v5269_v8 = vadd.f32 %v5268_v6, %v5267_v24  ;;  %v5270_v37 = vpop.f32.mrb[238].mxu0 }
 0x383   : > { %v5161_v35 = vpop.f32.mrb[208].mxu1  ;;  %v5271_v11 = vpop.f32.mrb[239].mxu0 }
 0x384   : > { %v5272_v40 = vadd.f32 %v5271_v11, %v5270_v37  ;;  %v5162_v53 = vpop.f32.mrb[209].mxu1  ;;  %v7673_v59 = vadd.f32 %v5269_v8, %v3612_v36 }
 0x385   : > { %v5163_v15 = vadd.f32 %v5162_v53, %v5161_v35  ;;  %v5164_v44 = vpop.f32.mrb[210].mxu1 }
 0x386   : > { %v5165_v0 = vpop.f32.mrb[211].mxu1  ;;  %v7675_v27 = vadd.f32 %v5272_v40, %v3615_v10 }
 0x387   : > { %v3620_v25 = vadd.f32 %v5163_v15, %v7566_v2  ;;  %v5166_v1 = vadd.f32 %v5165_v0, %v5164_v44 }
 0x388   : > { %v5273_v54 = vpop.f32.mrb[240].mxu0 }
 0x389   : > { %v3623_v60 = vadd.f32 %v5166_v1, %v7568_v28  ;;  %v5274_v48 = vpop.f32.mrb[241].mxu0 }
 0x38a   : > { %v5275_v23 = vadd.f32 %v5274_v48, %v5273_v54  ;;  %v5276_v30 = vpop.f32.mrb[242].mxu0 }
 0x38b   : > { %v5167_v12 = vpop.f32.mrb[212].mxu1  ;;  %v5277_v52 = vpop.f32.mrb[243].mxu0 }
 0x38c   : > { %v5278_v47 = vadd.f32 %v5277_v52, %v5276_v30  ;;  %v5168_v33 = vpop.f32.mrb[213].mxu1  ;;  %v7679_v62 = vadd.f32 %v5275_v23, %v3620_v25 }
 0x38d   : > { %v5169_v34 = vadd.f32 %v5168_v33, %v5167_v12  ;;  %v5170_v45 = vpop.f32.mrb[214].mxu1 }
 0x38e   : > { %v5171_v3 = vpop.f32.mrb[215].mxu1  ;;  %v7681_v31 = vadd.f32 %v5278_v47, %v3623_v60 }
 0x38f   : > { %v3628_v2 = vadd.f32 %v5169_v34, %v7574_v55  ;;  %v5172_v18 = vadd.f32 %v5171_v3, %v5170_v45 }
 0x390   : > { %v5279_v51 = vpop.f32.mrb[244].mxu0 }
 0x391   : > { %v3631_v28 = vadd.f32 %v5172_v18, %v7576_v20  ;;  %v5280_v36 = vpop.f32.mrb[245].mxu0 }
 0x392   : > { %v5281_v58 = vadd.f32 %v5280_v36, %v5279_v51  ;;  %v5282_v24 = vpop.f32.mrb[246].mxu0 }
 0x393   : > { %v5173_v10 = vpop.f32.mrb[216].mxu1  ;;  %v5283_v6 = vpop.f32.mrb[247].mxu0 }
 0x394   : > { %v5284_v8 = vadd.f32 %v5283_v6, %v5282_v24  ;;  %v5174_v37 = vpop.f32.mrb[217].mxu1  ;;  %v7685_v35 = vadd.f32 %v5281_v58, %v3628_v2 }
 0x395   : > { %v5175_v11 = vadd.f32 %v5174_v37, %v5173_v10  ;;  %v5176_v40 = vpop.f32.mrb[218].mxu1 }
 0x396   : > { %v5177_v53 = vpop.f32.mrb[219].mxu1  ;;  %v7687_v15 = vadd.f32 %v5284_v8, %v3631_v28 }
 0x397   : > { %v3636_v55 = vadd.f32 %v5175_v11, %v7582_v21  ;;  %v5178_v44 = vadd.f32 %v5177_v53, %v5176_v40 }
 0x398   : > { %v5285_v0 = vpop.f32.mrb[248].mxu0 }
 0x399   : > { %v3639_v20 = vadd.f32 %v5178_v44, %v7584_v32  ;;  %v5286_v25 = vpop.f32.mrb[249].mxu0 }
 0x39a   : > { %v5287_v1 = vadd.f32 %v5286_v25, %v5285_v0  ;;  %v5288_v54 = vpop.f32.mrb[250].mxu0 }
 0x39b   : > { %v5179_v60 = vpop.f32.mrb[220].mxu1  ;;  %v5289_v48 = vpop.f32.mrb[251].mxu0 }
 0x39c   : > { %v5290_v23 = vadd.f32 %v5289_v48, %v5288_v54  ;;  %v5180_v30 = vpop.f32.mrb[221].mxu1  ;;  %v7691_v12 = vadd.f32 %v5287_v1, %v3636_v55 }
 0x39d   : > { %v5181_v52 = vadd.f32 %v5180_v30, %v5179_v60  ;;  %v5182_v47 = vpop.f32.mrb[222].mxu1 }
 0x39e   : > { %v5183_v33 = vpop.f32.mrb[223].mxu1  ;;  %v7693_v34 = vadd.f32 %v5290_v23, %v3639_v20 }
 0x39f   : > { %v3644_v21 = vadd.f32 %v5181_v52, %v7590_v14  ;;  %v5184_v45 = vadd.f32 %v5183_v33, %v5182_v47 }
 0x3a0   : > { %v5291_v3 = vpop.f32.mrb[252].mxu0 }
 0x3a1   : > { %v3647_v32 = vadd.f32 %v5184_v45, %v7592_v46  ;;  %v5292_v2 = vpop.f32.mrb[253].mxu0 }
 0x3a2   : > { %v5293_v18 = vadd.f32 %v5292_v2, %v5291_v3  ;;  %v5294_v51 = vpop.f32.mrb[254].mxu0 }
 0x3a3   : > { %v5185_v28 = vpop.f32.mrb[224].mxu1  ;;  %v5295_v36 = vpop.f32.mrb[255].mxu0 }
 0x3a4   : > { %v5296_v58 = vadd.f32 %v5295_v36, %v5294_v51  ;;  %v5186_v24 = vpop.f32.mrb[225].mxu1  ;;  %v7697_v10 = vadd.f32 %v5293_v18, %v3644_v21 }
 0x3a5   : > { %v5187_v6 = vadd.f32 %v5186_v24, %v5185_v28  ;;  %v5188_v8 = vpop.f32.mrb[226].mxu1 }
 0x3a6   : > { %v5189_v37 = vpop.f32.mrb[227].mxu1  ;;  %v7699_v11 = vadd.f32 %v5296_v58, %v3647_v32 }
 0x3a7   : > { %v3652_v14 = vadd.f32 %v5187_v6, %v7598_v4  ;;  %v5190_v40 = vadd.f32 %v5189_v37, %v5188_v8 }
 0x3a8   : > { %v5297_v53 = vpop.f32.mrb[0].mxu0 }
 0x3a9   : > { %v3655_v46 = vadd.f32 %v5190_v40, %v7600_v22  ;;  %v5298_v55 = vpop.f32.mrb[1].mxu0 }
 0x3aa   : > { %v5299_v44 = vadd.f32 %v5298_v55, %v5297_v53  ;;  %v5300_v0 = vpop.f32.mrb[2].mxu0 }
 0x3ab   : > { %v5191_v20 = vpop.f32.mrb[228].mxu1  ;;  %v5301_v25 = vpop.f32.mrb[3].mxu0 }
 0x3ac   : > { %v5302_v1 = vadd.f32 %v5301_v25, %v5300_v0  ;;  %v5192_v54 = vpop.f32.mrb[229].mxu1  ;;  %v7703_v60 = vadd.f32 %v5299_v44, %v3652_v14 }
 0x3ad   : > { %v5193_v48 = vadd.f32 %v5192_v54, %v5191_v20  ;;  %v5194_v23 = vpop.f32.mrb[230].mxu1 }
 0x3ae   : > { %v5195_v30 = vpop.f32.mrb[231].mxu1  ;;  %v7705_v52 = vadd.f32 %v5302_v1, %v3655_v46 }
 0x3af   : > { %v3660_v4 = vadd.f32 %v5193_v48, %v7606_v13  ;;  %v5196_v47 = vadd.f32 %v5195_v30, %v5194_v23 }
 0x3b0   : > { %v5303_v33 = vpop.f32.mrb[4].mxu0 }
 0x3b1   : > { %v3663_v22 = vadd.f32 %v5196_v47, %v7608_v50  ;;  %v5304_v21 = vpop.f32.mrb[5].mxu0 }
 0x3b2   : > { %v5305_v45 = vadd.f32 %v5304_v21, %v5303_v33  ;;  %v5306_v3 = vpop.f32.mrb[6].mxu0 }
 0x3b3   : > { %v5197_v32 = vpop.f32.mrb[232].mxu1  ;;  %v5307_v2 = vpop.f32.mrb[7].mxu0 }
 0x3b4   : > { %v5308_v18 = vadd.f32 %v5307_v2, %v5306_v3  ;;  %v5198_v51 = vpop.f32.mrb[233].mxu1  ;;  %v7709_v28 = vadd.f32 %v5305_v45, %v3660_v4 }
 0x3b5   : > { %v5199_v36 = vadd.f32 %v5198_v51, %v5197_v32  ;;  %v5200_v58 = vpop.f32.mrb[234].mxu1 }
 0x3b6   : > { %v5201_v24 = vpop.f32.mrb[235].mxu1  ;;  %v7711_v6 = vadd.f32 %v5308_v18, %v3663_v22 }
 0x3b7   : > { %v3668_v13 = vadd.f32 %v5199_v36, %v7614_v38  ;;  %v5202_v8 = vadd.f32 %v5201_v24, %v5200_v58 }
 0x3b8   : > { %v5309_v37 = vpop.f32.mrb[8].mxu0 }
 0x3b9   : > { %v3671_v50 = vadd.f32 %v5202_v8, %v7616_v26  ;;  %v5310_v14 = vpop.f32.mrb[9].mxu0 }
 0x3ba   : > { %v5311_v40 = vadd.f32 %v5310_v14, %v5309_v37  ;;  %v5312_v53 = vpop.f32.mrb[10].mxu0 }
 0x3bb   : > { %v5203_v46 = vpop.f32.mrb[236].mxu1  ;;  %v5313_v55 = vpop.f32.mrb[11].mxu0 }
 0x3bc   : > { %v5314_v44 = vadd.f32 %v5313_v55, %v5312_v53  ;;  %v5204_v0 = vpop.f32.mrb[237].mxu1  ;;  %v7715_v20 = vadd.f32 %v5311_v40, %v3668_v13 }
 0x3bd   : > { %v5205_v25 = vadd.f32 %v5204_v0, %v5203_v46  ;;  %v5206_v1 = vpop.f32.mrb[238].mxu1 }
 0x3be   : > { %v5207_v54 = vpop.f32.mrb[239].mxu1  ;;  %v7717_v48 = vadd.f32 %v5314_v44, %v3671_v50 }
 0x3bf   : > { %v3676_v38 = vadd.f32 %v5205_v25, %v7622_v5  ;;  %v5208_v23 = vadd.f32 %v5207_v54, %v5206_v1 }
 0x3c0   : > { %v5315_v30 = vpop.f32.mrb[12].mxu0 }
 0x3c1   : > { %v3679_v26 = vadd.f32 %v5208_v23, %v7624_v9  ;;  %v5316_v4 = vpop.f32.mrb[13].mxu0 }
 0x3c2   : > { %v5317_v47 = vadd.f32 %v5316_v4, %v5315_v30  ;;  %v5318_v33 = vpop.f32.mrb[14].mxu0 }
 0x3c3   : > { %v5209_v22 = vpop.f32.mrb[240].mxu1  ;;  %v5319_v21 = vpop.f32.mrb[15].mxu0 }
 0x3c4   : > { %v5320_v45 = vadd.f32 %v5319_v21, %v5318_v33  ;;  %v5210_v3 = vpop.f32.mrb[241].mxu1  ;;  %v7721_v32 = vadd.f32 %v5317_v47, %v3676_v38 }
 0x3c5   : > { %v5211_v2 = vadd.f32 %v5210_v3, %v5209_v22  ;;  %v5212_v18 = vpop.f32.mrb[242].mxu1 }
 0x3c6   : > { %v5213_v51 = vpop.f32.mrb[243].mxu1  ;;  %v7723_v36 = vadd.f32 %v5320_v45, %v3679_v26 }
 0x3c7   : > { %v3684_v5 = vadd.f32 %v5211_v2, %v7631_v63  ;;  %v5214_v58 = vadd.f32 %v5213_v51, %v5212_v18 }
 0x3c8   : > { %v5321_v24 = vpop.f32.mrb[16].mxu0 }
 0x3c9   : > { %v3687_v9 = vadd.f32 %v5214_v58, %v7633_v39  ;;  %v5322_v13 = vpop.f32.mrb[17].mxu0 }
 0x3ca   : > { %v5323_v8 = vadd.f32 %v5322_v13, %v5321_v24  ;;  %v5324_v37 = vpop.f32.mrb[18].mxu0 }
 0x3cb   : > { %v5215_v50 = vpop.f32.mrb[244].mxu1  ;;  %v5325_v14 = vpop.f32.mrb[19].mxu0 }
 0x3cc   : > { %v5326_v40 = vadd.f32 %v5325_v14, %v5324_v37  ;;  %v5216_v53 = vpop.f32.mrb[245].mxu1  ;;  %v7727_v46 = vadd.f32 %v5323_v8, %v3684_v5 }
 0x3cd   : > { %v5217_v55 = vadd.f32 %v5216_v53, %v5215_v50  ;;  %v5218_v44 = vpop.f32.mrb[246].mxu1 }
 0x3ce   : > { %v5219_v0 = vpop.f32.mrb[247].mxu1  ;;  %v7729_v25 = vadd.f32 %v5326_v40, %v3687_v9 }
 0x3cf   : > { %v3692_v63 = vadd.f32 %v5217_v55, %v7637_v7  ;;  %v5220_v1 = vadd.f32 %v5219_v0, %v5218_v44 }
 0x3d0   : > { %v5327_v54 = vpop.f32.mrb[20].mxu0 }
 0x3d1   : > { %v3695_v39 = vadd.f32 %v5220_v1, %v7639_v16  ;;  %v5328_v38 = vpop.f32.mrb[21].mxu0 }
 0x3d2   : > { %v5329_v23 = vadd.f32 %v5328_v38, %v5327_v54  ;;  %v5330_v30 = vpop.f32.mrb[22].mxu0 }
 0x3d3   : > { %v5221_v26 = vpop.f32.mrb[248].mxu1  ;;  %v5331_v4 = vpop.f32.mrb[23].mxu0 }
 0x3d4   : > { %v5332_v47 = vadd.f32 %v5331_v4, %v5330_v30  ;;  %v5222_v33 = vpop.f32.mrb[249].mxu1  ;;  %v7733_v22 = vadd.f32 %v5329_v23, %v3692_v63 }
 0x3d5   : > { %v5223_v21 = vadd.f32 %v5222_v33, %v5221_v26  ;;  %v5224_v45 = vpop.f32.mrb[250].mxu1 }
 0x3d6   : > { %v5225_v3 = vpop.f32.mrb[251].mxu1  ;;  %v7735_v2 = vadd.f32 %v5332_v47, %v3695_v39 }
 0x3d7   : > { %v3700_v7 = vadd.f32 %v5223_v21, %v7643_v57  ;;  %v5226_v18 = vadd.f32 %v5225_v3, %v5224_v45 }
 0x3d8   : > { %v5333_v51 = vpop.f32.mrb[24].mxu0 }
 0x3d9   : > { %v3703_v16 = vadd.f32 %v5226_v18, %v7645_v49  ;;  %v5334_v5 = vpop.f32.mrb[25].mxu0 }
 0x3da   : > { %v5335_v58 = vadd.f32 %v5334_v5, %v5333_v51  ;;  %v5336_v24 = vpop.f32.mrb[26].mxu0 }
 0x3db   : > { %v5227_v9 = vpop.f32.mrb[252].mxu1  ;;  %v5337_v13 = vpop.f32.mrb[27].mxu0 }
 0x3dc   : > { %v5338_v8 = vadd.f32 %v5337_v13, %v5336_v24  ;;  %v5228_v37 = vpop.f32.mrb[253].mxu1  ;;  %v7739_v50 = vadd.f32 %v5335_v58, %v3700_v7 }
 0x3dd   : > { %v5229_v14 = vadd.f32 %v5228_v37, %v5227_v9  ;;  %v5230_v40 = vpop.f32.mrb[254].mxu1 }
 0x3de   : > { %v5231_v53 = vpop.f32.mrb[255].mxu1  ;;  %v7741_v55 = vadd.f32 %v5338_v8, %v3703_v16 }
 0x3df   : > { %v3708_v57 = vadd.f32 %v5229_v14, %v7649_v43  ;;  %v5232_v44 = vadd.f32 %v5231_v53, %v5230_v40  ;;  %v8016_v43 = vld [vmem:[#allocation4_spill] sm:$0xff] }
 0x3e0   : > { %v5339_v0 = vpop.f32.mrb[28].mxu0  ;;  %v8017_v21 = vunpack.c.l.bf16 %v8016_v43 }
 0x3e1   : > { %v3711_v49 = vadd.f32 %v5232_v44, %v7651_v19  ;;  %v5340_v63 = vpop.f32.mrb[29].mxu0 }
 0x3e2   : > { %v5341_v1 = vadd.f32 %v5340_v63, %v5339_v0  ;;  %v5342_v54 = vpop.f32.mrb[30].mxu0 }
 0x3e3   : > { %v5343_v39 = vpop.f32.mrb[31].mxu0  ;;  %v5435_v38 = vpop.f32.mrb[0].mxu1 }
 0x3e4   : > { %v5344_v23 = vadd.f32 %v5343_v39, %v5342_v54  ;;  %v3918_v30 = vadd.f32 %v5435_v38, %v7661_v56  ;;  %v3909_v26 = vpop.f32.mrb[1].mxu1  ;;  %v7747_v4 = vadd.f32 %v5341_v1, %v3708_v57  ;;  %v8018_v56 = vld [vmem:[#allocation3_spill] sm:$0xff]  ;;  %v8022_v57 = vld [vmem:[#allocation6_spill] sm:$0xff]  ;;  %v8024_v1 = vld [vmem:[#allocation5_spill] sm:$0xff] }
 0x3e5   : > { %v3910_v47 = vadd.f32 %v3909_v26, %v7655_v41  ;;  %v5436_v33 = vpop.f32.mrb[2].mxu1  ;;  %v8019_v18 = vunpack.c.l.bf16 %v8018_v56  ;;  %v8021_v24 = vunpack.c.h.bf16 %v8018_v56  ;;  %v8023_v44 = vunpack.c.l.bf16 %v8022_v57 }
 0x3e6   : > { %v4038_v45 = vadd.f32 %v8017_v21, %v3918_v30  ;;  %v3921_v19 = vadd.f32 %v5436_v33, %v7663_v61  ;;  %v3912_v3 = vpop.f32.mrb[3].mxu1  ;;  %v7753_v7 = vadd.f32 %v5344_v23, %v3711_v49  ;;  %v8020_v61 = vunpack.c.h.bf16 %v8016_v43 }
 0x3e7   : > { %v4036_v41 = vadd.f32 %v8019_v18, %v3910_v47  ;;  %v3913_v51 = vadd.f32 %v3912_v3, %v7657_v17  ;;  %v8025_v54 = vunpack.c.l.bf16 %v8024_v1  ;;  %v8026_v23 = vunpack.c.h.bf16 %v8022_v57  ;;  %v8028_v3 = vld [vmem:[#allocation8_spill] sm:$0xff]  ;;  %v8034_v57 = vld [vmem:[#allocation10_spill] sm:$0xff] }
 0x3e8   : > { %v4070_v16 = vmax.f32 %v4038_v45, 0.0  ;;  %v4039_v5 = vadd.f32 %v8020_v61, %v3921_v19  ;;  %v8029_v56 = vunpack.c.l.bf16 %v8028_v3 }
 0x3e9   : > { %v4068_v58 = vmax.f32 %v4036_v41, 0.0  ;;  %v4037_v9 = vadd.f32 %v8021_v24, %v3913_v51  ;;  %v8032_v24 = vunpack.c.h.bf16 %v8028_v3 }
 0x3ea   : > { %4102 = vst [vmem:[%s7758_s19 + $0x10] sm:$0xff] %v4070_v16  ;;  %v4071_v13 = vmax.f32 %v4039_v5, 0.0  ;;  %v8030_v16 = vld [vmem:[#allocation7_spill] sm:$0xff] }
 0x3eb   : > { %4100 = vst [vmem:[%s7758_s19] sm:$0xff] %v4068_v58  ;;  %v4069_v8 = vmax.f32 %v4037_v9, 0.0  ;;  %v5439_v37 = vpop.f32.mrb[4].mxu1  ;;  %v8031_v61 = vunpack.c.l.bf16 %v8030_v16 }
 0x3ec   : > { %4103 = vst [vmem:[%s7758_s19 + $0x18] sm:$0xff] %v4071_v13  ;;  %v3934_v14 = vadd.f32 %v5439_v37, %v7673_v59  ;;  %v3925_v40 = vpop.f32.mrb[5].mxu1 }
 0x3ed   : > { %4101 = vst [vmem:[%s7758_s19 + $0x8] sm:$0xff] %v4069_v8  ;;  %v3926_v17 = vadd.f32 %v3925_v40, %v7667_v42  ;;  %v5440_v53 = vpop.f32.mrb[6].mxu1  ;;  %v8027_v42 = vunpack.c.h.bf16 %v8024_v1  ;;  %v8036_v1 = vld [vmem:[#allocation9_spill] sm:$0xff] }
 0x3ee   : > { %v4042_v0 = vadd.f32 %v8023_v44, %v3934_v14  ;;  %v3937_v49 = vadd.f32 %v5440_v53, %v7675_v27  ;;  %v3928_v63 = vpop.f32.mrb[7].mxu1  ;;  %v8035_v44 = vunpack.c.l.bf16 %v8034_v57 }
 0x3ef   : > { %v4040_v39 = vadd.f32 %v8025_v54, %v3926_v17  ;;  %v3929_v38 = vadd.f32 %v3928_v63, %v7669_v29  ;;  %v8037_v54 = vunpack.c.l.bf16 %v8036_v1 }
 0x3f0   : > { %v4074_v59 = vmax.f32 %v4042_v0, 0.0  ;;  %v4043_v30 = vadd.f32 %v8026_v23, %v3937_v49 }
 0x3f1   : > { %v4072_v26 = vmax.f32 %v4040_v39, 0.0  ;;  %v4041_v47 = vadd.f32 %v8027_v42, %v3929_v38 }
 0x3f2   : > { %4106 = vst [vmem:[%s7758_s19 + $0x30] sm:$0xff] %v4074_v59  ;;  %v4075_v33 = vmax.f32 %v4043_v30, 0.0  ;;  %v8038_v59 = vunpack.c.h.bf16 %v8034_v57 }
 0x3f3   : > { %4104 = vst [vmem:[%s7758_s19 + $0x20] sm:$0xff] %v4072_v26  ;;  %v4073_v43 = vmax.f32 %v4041_v47, 0.0  ;;  %v5443_v27 = vpop.f32.mrb[8].mxu1 }
 0x3f4   : > { %4107 = vst [vmem:[%s7758_s19 + $0x38] sm:$0xff] %v4075_v33  ;;  %v3950_v21 = vadd.f32 %v5443_v27, %v7685_v35  ;;  %v3941_v45 = vpop.f32.mrb[9].mxu1 }
 0x3f5   : > { %4105 = vst [vmem:[%s7758_s19 + $0x28] sm:$0xff] %v4073_v43  ;;  %v3942_v29 = vadd.f32 %v3941_v45, %v7679_v62  ;;  %v5444_v19 = vpop.f32.mrb[10].mxu1  ;;  %v8033_v62 = vunpack.c.h.bf16 %v8030_v16 }
 0x3f6   : > { %v4046_v18 = vadd.f32 %v8029_v56, %v3950_v21  ;;  %v3953_v41 = vadd.f32 %v5444_v19, %v7687_v15  ;;  %v3944_v51 = vpop.f32.mrb[11].mxu1  ;;  %v8040_v21 = vld [vmem:[#allocation12_spill] sm:$0xff]  ;;  %v8042_v56 = vld [vmem:[#allocation11_spill] sm:$0xff] }
 0x3f7   : > { %v4044_v5 = vadd.f32 %v8031_v61, %v3942_v29  ;;  %v3945_v58 = vadd.f32 %v3944_v51, %v7681_v31  ;;  %v8041_v45 = vunpack.c.l.bf16 %v8040_v21  ;;  %v8044_v16 = vunpack.c.h.bf16 %v8040_v21 }
 0x3f8   : > { %v4078_v35 = vmax.f32 %v4046_v18, 0.0  ;;  %v4047_v9 = vadd.f32 %v8032_v24, %v3953_v41  ;;  %v8043_v18 = vunpack.c.l.bf16 %v8042_v56 }
 0x3f9   : > { %v4076_v13 = vmax.f32 %v4044_v5, 0.0  ;;  %v4045_v8 = vadd.f32 %v8033_v62, %v3945_v58 }
 0x3fa   : > { %4110 = vst [vmem:[%s7758_s19 + $0x50] sm:$0xff] %v4078_v35  ;;  %v4079_v37 = vmax.f32 %v4047_v9, 0.0 }
 0x3fb   : > { %4108 = vst [vmem:[%s7758_s19 + $0x40] sm:$0xff] %v4076_v13  ;;  %v4077_v14 = vmax.f32 %v4045_v8, 0.0  ;;  %v5447_v15 = vpop.f32.mrb[12].mxu1  ;;  %v8046_v8 = vld [vmem:[#allocation14_spill] sm:$0xff] }
 0x3fc   : > { %4111 = vst [vmem:[%s7758_s19 + $0x58] sm:$0xff] %v4079_v37  ;;  %v3966_v40 = vadd.f32 %v5447_v15, %v7697_v10  ;;  %v3957_v17 = vpop.f32.mrb[13].mxu1  ;;  %v8047_v37 = vunpack.c.l.bf16 %v8046_v8 }
 0x3fd   : > { %4109 = vst [vmem:[%s7758_s19 + $0x48] sm:$0xff] %v4077_v14  ;;  %v3958_v31 = vadd.f32 %v3957_v17, %v7691_v12  ;;  %v5448_v53 = vpop.f32.mrb[14].mxu1  ;;  %v8039_v12 = vunpack.c.h.bf16 %v8036_v1  ;;  %v8048_v17 = vld [vmem:[#allocation13_spill] sm:$0xff] }
 0x3fe   : > { %v4050_v0 = vadd.f32 %v8035_v44, %v3966_v40  ;;  %v3969_v49 = vadd.f32 %v5448_v53, %v7699_v11  ;;  %v3960_v63 = vpop.f32.mrb[15].mxu1  ;;  %v8050_v44 = vunpack.c.h.bf16 %v8046_v8 }
 0x3ff   : > { %v4048_v39 = vadd.f32 %v8037_v54, %v3958_v31  ;;  %v3961_v38 = vadd.f32 %v3960_v63, %v7693_v34  ;;  %v8049_v31 = vunpack.c.l.bf16 %v8048_v17 }
 0x400   : > { %v4082_v10 = vmax.f32 %v4050_v0, 0.0  ;;  %v4051_v23 = vadd.f32 %v8038_v59, %v3969_v49  ;;  %v8052_v59 = vld [vmem:[#allocation16_spill] sm:$0xff] }
 0x401   : > { %v4080_v30 = vmax.f32 %v4048_v39, 0.0  ;;  %v4049_v26 = vadd.f32 %v8039_v12, %v3961_v38 }
 0x402   : > { %4114 = vst [vmem:[%s7758_s19 + $0x70] sm:$0xff] %v4082_v10  ;;  %v4083_v42 = vmax.f32 %v4051_v23, 0.0  ;;  %v8053_v23 = vunpack.c.l.bf16 %v8052_v59 }
 0x403   : > { %4112 = vst [vmem:[%s7758_s19 + $0x60] sm:$0xff] %v4080_v30  ;;  %v4081_v47 = vmax.f32 %v4049_v26, 0.0  ;;  %v5451_v11 = vpop.f32.mrb[16].mxu1 }
 0x404   : > { %4115 = vst [vmem:[%s7758_s19 + $0x78] sm:$0xff] %v4083_v42  ;;  %v3982_v33 = vadd.f32 %v5451_v11, %v7709_v28  ;;  %v3973_v43 = vpop.f32.mrb[17].mxu1  ;;  %v8054_v42 = vld [vmem:[#allocation15_spill] sm:$0xff] }
 0x405   : > { %4113 = vst [vmem:[%s7758_s19 + $0x68] sm:$0xff] %v4081_v47  ;;  %v3974_v34 = vadd.f32 %v3973_v43, %v7703_v60  ;;  %v5452_v27 = vpop.f32.mrb[18].mxu1  ;;  %v8045_v60 = vunpack.c.h.bf16 %v8042_v56  ;;  %v8055_v47 = vunpack.c.l.bf16 %v8054_v42  ;;  %v8056_v43 = vunpack.c.h.bf16 %v8052_v59 }
 0x406   : > { %v4054_v29 = vadd.f32 %v8041_v45, %v3982_v33  ;;  %v3985_v19 = vadd.f32 %v5452_v27, %v7711_v6  ;;  %v3976_v3 = vpop.f32.mrb[19].mxu1 }
 0x407   : > { %v4052_v41 = vadd.f32 %v8043_v18, %v3974_v34  ;;  %v3977_v51 = vadd.f32 %v3976_v3, %v7705_v52  ;;  %v8058_v18 = vld [vmem:[#allocation18_spill] sm:$0xff] }
 0x408   : > { %v4086_v28 = vmax.f32 %v4054_v29, 0.0  ;;  %v4055_v61 = vadd.f32 %v8044_v16, %v3985_v19 }
 0x409   : > { %v4084_v5 = vmax.f32 %v4052_v41, 0.0  ;;  %v4053_v58 = vadd.f32 %v8045_v60, %v3977_v51  ;;  %v8059_v41 = vunpack.c.l.bf16 %v8058_v18 }
 0x40a   : > { %4118 = vst [vmem:[%s7758_s19 + $0x90] sm:$0xff] %v4086_v28  ;;  %v4087_v35 = vmax.f32 %v4055_v61, 0.0  ;;  %v8060_v61 = vld [vmem:[#allocation17_spill] sm:$0xff] }
 0x40b   : > { %4116 = vst [vmem:[%s7758_s19 + $0x80] sm:$0xff] %v4084_v5  ;;  %v4085_v24 = vmax.f32 %v4053_v58, 0.0  ;;  %v5455_v6 = vpop.f32.mrb[20].mxu1  ;;  %v8061_v5 = vunpack.c.l.bf16 %v8060_v61 }
 0x40c   : > { %4119 = vst [vmem:[%s7758_s19 + $0x98] sm:$0xff] %v4087_v35  ;;  %v3998_v9 = vadd.f32 %v5455_v6, %v7721_v32  ;;  %v3989_v13 = vpop.f32.mrb[21].mxu1  ;;  %v8062_v35 = vunpack.c.h.bf16 %v8058_v18 }
 0x40d   : > { %4117 = vst [vmem:[%s7758_s19 + $0x88] sm:$0xff] %v4085_v24  ;;  %v3990_v52 = vadd.f32 %v3989_v13, %v7715_v20  ;;  %v5456_v62 = vpop.f32.mrb[22].mxu1  ;;  %v8051_v20 = vunpack.c.h.bf16 %v8048_v17 }
 0x40e   : > { %v4058_v14 = vadd.f32 %v8047_v37, %v3998_v9  ;;  %v4001_v15 = vadd.f32 %v5456_v62, %v7723_v36  ;;  %v3992_v40 = vpop.f32.mrb[23].mxu1 }
 0x40f   : > { %v4056_v53 = vadd.f32 %v8049_v31, %v3990_v52  ;;  %v3993_v57 = vadd.f32 %v3992_v40, %v7717_v48 }
 0x410   : > { %v4090_v32 = vmax.f32 %v4058_v14, 0.0  ;;  %v4059_v0 = vadd.f32 %v8050_v44, %v4001_v15 }
 0x411   : > { %v4088_v49 = vmax.f32 %v4056_v53, 0.0  ;;  %v4057_v63 = vadd.f32 %v8051_v20, %v3993_v57 }
 0x412   : > { %4122 = vst [vmem:[%s7758_s19 + $0xb0] sm:$0xff] %v4090_v32  ;;  %v4091_v1 = vmax.f32 %v4059_v0, 0.0 }
 0x413   : > { %4120 = vst [vmem:[%s7758_s19 + $0xa0] sm:$0xff] %v4088_v49  ;;  %v4089_v54 = vmax.f32 %v4057_v63, 0.0  ;;  %v5459_v36 = vpop.f32.mrb[24].mxu1 }
 0x414   : > { %4123 = vst [vmem:[%s7758_s19 + $0xb8] sm:$0xff] %v4091_v1  ;;  %v4014_v39 = vadd.f32 %v5459_v36, %v7733_v22  ;;  %v4005_v38 = vpop.f32.mrb[25].mxu1 }
 0x415   : > { %4121 = vst [vmem:[%s7758_s19 + $0xa8] sm:$0xff] %v4089_v54  ;;  %v4006_v48 = vadd.f32 %v4005_v38, %v7727_v46  ;;  %v5460_v10 = vpop.f32.mrb[26].mxu1  ;;  %v8057_v46 = vunpack.c.h.bf16 %v8054_v42 }
 0x416   : > { %v4062_v30 = vadd.f32 %v8053_v23, %v4014_v39  ;;  %v4017_v12 = vadd.f32 %v5460_v10, %v7735_v2  ;;  %v4008_v26 = vpop.f32.mrb[27].mxu1 }
 0x417   : > { %v4060_v11 = vadd.f32 %v8055_v47, %v4006_v48  ;;  %v4009_v33 = vadd.f32 %v4008_v26, %v7729_v25 }
 0x418   : > { %v4094_v22 = vmax.f32 %v4062_v30, 0.0  ;;  %v4063_v34 = vadd.f32 %v8056_v43, %v4017_v12 }
 0x419   : > { %v4092_v27 = vmax.f32 %v4060_v11, 0.0  ;;  %v4061_v21 = vadd.f32 %v8057_v46, %v4009_v33 }
 0x41a   : > { %4126 = vst [vmem:[%s7758_s19 + $0xd0] sm:$0xff] %v4094_v22  ;;  %v4095_v45 = vmax.f32 %v4063_v34, 0.0 }
 0x41b   : > { %4124 = vst [vmem:[%s7758_s19 + $0xc0] sm:$0xff] %v4092_v27  ;;  %v4093_v29 = vmax.f32 %v4061_v21, 0.0  ;;  %v5463_v2 = vpop.f32.mrb[28].mxu1 }
 0x41c   : > { %4127 = vst [vmem:[%s7758_s19 + $0xd8] sm:$0xff] %v4095_v45  ;;  %v4030_v19 = vadd.f32 %v5463_v2, %v7747_v4  ;;  %v4021_v3 = vpop.f32.mrb[29].mxu1 }
 0x41d   : > { %4125 = vst [vmem:[%s7758_s19 + $0xc8] sm:$0xff] %v4093_v29  ;;  %v4022_v25 = vadd.f32 %v4021_v3, %v7739_v50  ;;  %v5464_v56 = vpop.f32.mrb[30].mxu1  ;;  %v8063_v50 = vunpack.c.h.bf16 %v8060_v61 }
 0x41e   : > { %v4066_v51 = vadd.f32 %v8059_v41, %v4030_v19  ;;  %v4033_v28 = vadd.f32 %v5464_v56, %v7753_v7  ;;  %v4024_v16 = vpop.f32.mrb[31].mxu1 }
 0x41f   : > { %v4064_v60 = vadd.f32 %v8061_v5, %v4022_v25  ;;  %v4025_v58 = vadd.f32 %v4024_v16, %v7741_v55 }
 0x420   : > { %v4098_v4 = vmax.f32 %v4066_v51, 0.0  ;;  %v4067_v24 = vadd.f32 %v8062_v35, %v4033_v28 }
 0x421   : > { %v4096_v6 = vmax.f32 %v4064_v60, 0.0  ;;  %v4065_v9 = vadd.f32 %v8063_v50, %v4025_v58 }
 0x422   : > { %4130 = vst [vmem:[%s7758_s19 + $0xf0] sm:$0xff] %v4098_v4  ;;  %v4099_v13 = vmax.f32 %v4067_v24, 0.0 }
 0x423   : > { %4128 = vst [vmem:[%s7758_s19 + $0xe0] sm:$0xff] %v4096_v6  ;;  %v4097_v52 = vmax.f32 %v4065_v9, 0.0 }
 0x424   : > { %4131 = vst [vmem:[%s7758_s19 + $0xf8] sm:$0xff] %v4099_v13 }
 0x425   : > { %4129 = vst [vmem:[%s7758_s19 + $0xe8] sm:$0xff] %v4097_v52 }
 0x426 PF: > { %s15_s18 = sadd.s32 1, %s5626_s18  }
 0x427   : > { %p12_p4 = scmp.ge.s32.totalorder %s15_s18, 4  }
 0x429   :  { %14 = sbr.rel (!%p12_p4) target bundleno = 1 (0x1), region = 72 }

</bundles_post_ra>
